<compile_context>
chip_gen: v7x
topology: tpu7x:2x2x1
jax: 0.10.0
libtpu: 0.0.40
codegen_flags: <defaults>
</compile_context>

<pallas_src>
import functools

import jax
import jax.numpy as jnp
from jax import lax
from jax.experimental import pallas as pl
from jax.experimental.pallas import tpu as pltpu


MODS = ("linguistic", "acoustic")
HIDDEN_DIM = {"linguistic": 128, "emotient": 20, "acoustic": 64, "image": 128}
FUSE_DIM = 64


# ---------------------------------------------------------------------------
# Fused kernel: two async LSTMCell recurrences + fuseOut MLP.
# Grid = (batch blocks ["parallel"], time chunks ["arbitrary", innermost]).
# ---------------------------------------------------------------------------
def _fused_kernel(x_l_ref, x_a_ref, flg_ref,
                  wih_l_ref, b_l_ref, wih_a_ref, b_a_ref, whh_ref,
                  w1_l_ref, w1_a_ref, b1_ref, w2_ref, b2_ref,
                  out_ref,
                  gx_l_scr, gx_a_scr, hs_l_scr, hs_a_scr,
                  h_l_st, c_l_st, h_a_st, c_a_st,
                  *, T_c, B, H_l, H_a):
    GL, GA = 4 * H_l, 4 * H_a

    # New batch block -> reset the recurrent state carried across time chunks.
    @pl.when(pl.program_id(1) == 0)
    def _():
        h_l_st[...] = jnp.zeros_like(h_l_st)
        c_l_st[...] = jnp.zeros_like(c_l_st)
        h_a_st[...] = jnp.zeros_like(h_a_st)
        c_a_st[...] = jnp.zeros_like(c_a_st)

    # Hoisted bf16 input projections (bias folded): one big MXU matmul per modality per
    # chunk, entirely off the serial critical path; stored bf16 to halve scratch.
    x_l = x_l_ref[...].reshape(T_c * B, x_l_ref.shape[-1])
    gx_l_scr[...] = (jnp.dot(x_l, wih_l_ref[...], preferred_element_type=jnp.float32)
                     + b_l_ref[...]).astype(jnp.bfloat16).reshape(T_c, B, GL)
    x_a = x_a_ref[...].reshape(T_c * B, x_a_ref.shape[-1])
    gx_a_scr[...] = (jnp.dot(x_a, wih_a_ref[...], preferred_element_type=jnp.float32)
                     + b_a_ref[...]).astype(jnp.bfloat16).reshape(T_c, B, GA)

    def cell(gates, c, H):
        # Gate columns were pre-permuted offline to [i, f, o, g]: one contiguous sigmoid
        # slab and one tanh slab per modality.
        # TODO(synk): on v6e/v7x the sigmoid/tanh could run in bf16 (~2x EUP); kept f32
        # for v5e compatibility and accuracy.
        sg = jax.nn.sigmoid(gates[:, :3 * H])
        gg = jnp.tanh(gates[:, 3 * H:])
        i_g = sg[:, :H]
        f_g = sg[:, H:2 * H]
        o_g = sg[:, 2 * H:]
        c_new = f_g * c + i_g * gg
        h_new = o_g * jnp.tanh(c_new)
        return h_new, c_new

    def step(j, carry):
        h_l, c_l, h_a, c_a = carry
        f = flg_ref[j]                       # (B, 1) int32: bit0=p_ling, bit1=p_ac, bit2=valid
        p_l = (f & 1) > 0
        p_a = (f & 2) > 0
        v = (f & 4) > 0

        # One block-diagonal recurrent matmul for both modalities (K = H_l + H_a),
        # Whh read from its VMEM-resident ref (not held live across the loop).
        h_cat = jnp.concatenate([h_l, h_a], axis=1).astype(jnp.bfloat16)        # (B, 192)
        rec = jnp.dot(h_cat, whh_ref[...], preferred_element_type=jnp.float32)  # (B, GL+GA)
        gates_l = gx_l_scr[j].astype(jnp.float32) + rec[:, :GL]
        gates_a = gx_a_scr[j].astype(jnp.float32) + rec[:, GL:]

        h_l_new, c_l_new = cell(gates_l, c_l, H_l)
        h_a_new, c_a_new = cell(gates_a, c_a, H_a)

        # Async semantics: only tokens containing a modality advance that modality's state.
        h_l = jnp.where(p_l, h_l_new, h_l)
        c_l = jnp.where(p_l, c_l_new, c_l)
        h_a = jnp.where(p_a, h_a_new, h_a)
        c_a = jnp.where(p_a, c_a_new, c_a)

        # Real tokens emit the current hidden state; padded slots emit zeros.
        # TODO(synk): could alias these writes into gx_*_scr[j, :, :H] to save VMEM on v7x.
        hs_l_scr[j] = jnp.where(v, h_l, 0.0).astype(jnp.bfloat16)
        hs_a_scr[j] = jnp.where(v, h_a, 0.0).astype(jnp.bfloat16)
        return h_l, c_l, h_a, c_a

    init = (h_l_st[...], c_l_st[...], h_a_st[...], c_a_st[...])
    h_l, c_l, h_a, c_a = lax.fori_loop(0, T_c, step, init, unroll=min(8, T_c))
    h_l_st[...] = h_l
    c_l_st[...] = c_l
    h_a_st[...] = h_a
    c_a_st[...] = c_a

    # ---- fuseOut: Linear(H_l+H_a, 64) -> Dropout(0.3) -> Linear(64, 1) ------------------
    # Concat-free: h_all @ W1 == h_ling @ W1[:H_l] + h_ac @ W1[H_l:].
    # TODO(synk): nn.Dropout(0.3) is identity at inference; training-mode dropout not done.
    hs_l = hs_l_scr[...].reshape(T_c * B, H_l)
    hs_a = hs_a_scr[...].reshape(T_c * B, H_a)
    z = (jnp.dot(hs_l, w1_l_ref[...], preferred_element_type=jnp.float32)
         + jnp.dot(hs_a, w1_a_ref[...], preferred_element_type=jnp.float32)
         + b1_ref[...])                                                    # (T_c*B, 64) f32
    z3 = z.reshape(T_c, B, z.shape[-1])
    # Lane-dense output: 64 -> 1 projection as a VPU multiply + lane reduce, stored (T_c, B).
    out_ref[...] = jnp.sum(z3 * w2_ref[...], axis=-1) + b2_ref[...]


def _round_up(x, m):
    return (x + m - 1) // m * m


def _perm_ifog(w, H):
    # PyTorch gate order [i, f, g, o] -> [i, f, o, g] along the last (4H) axis.
    return jnp.concatenate([w[..., :2 * H], w[..., 3 * H:4 * H], w[..., 2 * H:3 * H]], axis=-1)


# ---------------------------------------------------------------------------
# Full forward: wrapper only does layout plumbing / weight packing.
# ---------------------------------------------------------------------------
def async_naive_multimodal(inputs, presence, seq_length, lstm_masks, params):
    assert MODS == ("linguistic", "acoustic")
    n, t, _ = lstm_masks.shape
    H_l, H_a = HIDDEN_DIM["linguistic"], HIDDEN_DIM["acoustic"]
    D_l = inputs["linguistic"].shape[-1]
    D_a = inputs["acoustic"].shape[-1]

    # --- tiling ---------------------------------------------------------------------
    # Lane-dense (t, n_pad) output block requires B % 128 == 0 or B == n_pad, so:
    # single batch block for n <= 128, 128-row blocks (>= 2 blocks -> megacore) above.
    n_pad8 = _round_up(n, 8)
    if n_pad8 <= 128:
        B, n_pad = n_pad8, n_pad8
    else:
        B, n_pad = 128, _round_up(n, 128)
    # Time is a pipelined, VMEM-bounded grid axis: whole sequence in one chunk when
    # short, 32-step chunks otherwise (keeps gx/hs scratch well under v7x's 64 MiB).
    if t <= 64:
        T_c, t_pad = t, t
    else:
        T_c, t_pad = 32, _round_up(t, 32)

    def to_tnc(x, dtype):  # (n, t, C) -> (t_pad, n_pad, C)
        x = jnp.transpose(x, (1, 0, 2)).astype(dtype)
        return jnp.pad(x, ((0, t_pad - t), (0, n_pad - n), (0, 0)))

    x_l = to_tnc(inputs["linguistic"], jnp.bfloat16)
    x_a = to_tnc(inputs["acoustic"], jnp.bfloat16)

    # Pack presence + validity into one int32 bit-flag tensor (replaces 4 f32 mask inputs).
    valid = jnp.arange(t)[None, :] < seq_length[:, None]                     # (n, t) bool
    flags = ((presence["linguistic"][..., 0] > 0.5).astype(jnp.int32)
             + 2 * (presence["acoustic"][..., 0] > 0.5).astype(jnp.int32)
             + 4 * valid.astype(jnp.int32))[..., None]                       # (n, t, 1)
    flags = to_tnc(flags, jnp.int32)

    # --- weight packing (offline, once): gate permutation, bf16, block-diag Whh ------
    par_l, par_a, pf = params["linguistic"], params["acoustic"], params["fuse"]
    wih_l = _perm_ifog(par_l["wih"], H_l).astype(jnp.bfloat16)
    wih_a = _perm_ifog(par_a["wih"], H_a).astype(jnp.bfloat16)
    b_l = _perm_ifog(par_l["b"], H_l).astype(jnp.float32)
    b_a = _perm_ifog(par_a["b"], H_a).astype(jnp.float32)

    whh_f = jnp.zeros((H_l + H_a, 4 * (H_l + H_a)), jnp.float32)
    whh_f = whh_f.at[:H_l, :4 * H_l].set(_perm_ifog(par_l["whh"], H_l))
    whh_f = whh_f.at[H_l:, 4 * H_l:].set(_perm_ifog(par_a["whh"], H_a))
    whh_f = whh_f.astype(jnp.bfloat16)

    w1_l = pf["w1"][:H_l].astype(jnp.bfloat16)
    w1_a = pf["w1"][H_l:].astype(jnp.bfloat16)
    b1 = pf["b1"].astype(jnp.float32)                  # (1, 64)
    w2 = pf["w2"].reshape(1, FUSE_DIM).astype(jnp.float32)  # (64,1) -> (1,64), used on VPU
    b2 = pf["b2"].astype(jnp.float32)                  # (1, 1)

    kernel = functools.partial(_fused_kernel, T_c=T_c, B=B, H_l=H_l, H_a=H_a)

    def tok_spec(c):
        return pl.BlockSpec((T_c, B, c), lambda i, k: (k, i, 0))

    def w_spec(r, c):
        # TODO(synk): pipeline_mode=pl.Buffered(1) would drop the pointless double buffer
        # on these constant-index weight blocks (small VMEM saving).
        return pl.BlockSpec((r, c), lambda i, k: (0, 0))

    out = pl.pallas_call(
        kernel,
        out_shape=jax.ShapeDtypeStruct((t_pad, n_pad), jnp.float32),
        grid_spec=pltpu.PrefetchScalarGridSpec(
            num_scalar_prefetch=0,
            grid=(n_pad // B, t_pad // T_c),
            in_specs=[
                tok_spec(D_l), tok_spec(D_a), tok_spec(1),
                w_spec(D_l, 4 * H_l), w_spec(1, 4 * H_l),
                w_spec(D_a, 4 * H_a), w_spec(1, 4 * H_a),
                w_spec(H_l + H_a, 4 * (H_l + H_a)),
                w_spec(H_l, FUSE_DIM), w_spec(H_a, FUSE_DIM), w_spec(1, FUSE_DIM),
                w_spec(1, FUSE_DIM), w_spec(1, 1),
            ],
            out_specs=pl.BlockSpec((T_c, B), lambda i, k: (k, i)),
            scratch_shapes=[
                pltpu.VMEM((T_c, B, 4 * H_l), jnp.bfloat16),   # gates_x linguistic
                pltpu.VMEM((T_c, B, 4 * H_a), jnp.bfloat16),   # gates_x acoustic
                pltpu.VMEM((T_c, B, H_l), jnp.bfloat16),       # emitted hidden, linguistic
                pltpu.VMEM((T_c, B, H_a), jnp.bfloat16),       # emitted hidden, acoustic
                pltpu.VMEM((B, H_l), jnp.float32),             # h state carry (linguistic)
                pltpu.VMEM((B, H_l), jnp.float32),             # c state carry (linguistic)
                pltpu.VMEM((B, H_a), jnp.float32),             # h state carry (acoustic)
                pltpu.VMEM((B, H_a), jnp.float32),             # c state carry (acoustic)
            ],
        ),
        compiler_params=pltpu.CompilerParams(
            dimension_semantics=("parallel", "arbitrary"),
            vmem_limit_bytes=64 * 1024 * 1024),
    )(x_l, x_a, flags, wih_l, b_l, wih_a, b_a, whh_f, w1_l, w1_a, b1, w2, b2)

    y = jnp.transpose(out[:t, :n])[..., None]            # (n, t, 1)
    return y * lstm_masks.astype(jnp.float32)            # lstm_masks applied wrapper-side


# ---------------------------------------------------------------------------
# Deterministic parameter init (shapes match nn.LSTMCell / nn.Linear of the module,
# gate order stored as PyTorch's [i, f, g, o]; the wrapper repacks them).
# ---------------------------------------------------------------------------
def init_params(key, mods, dims):
    params = {}
    for mod in mods:
        D, H = dims[mod], HIDDEN_DIM[mod]
        key, k1, k2, k3, k4 = jax.random.split(key, 5)
        s = 1.0 / float(H) ** 0.5
        params[mod] = {
            "wih": jax.random.uniform(k1, (D, 4 * H), jnp.float32, -s, s),
            "whh": jax.random.uniform(k2, (H, 4 * H), jnp.float32, -s, s),
            "b": (jax.random.uniform(k3, (1, 4 * H), jnp.float32, -s, s)
                  + jax.random.uniform(k4, (1, 4 * H), jnp.float32, -s, s)),
        }
    TH = sum(HIDDEN_DIM[m] for m in mods)
    key, k1, k2, k3, k4 = jax.random.split(key, 5)
    params["fuse"] = {
        "w1": jax.random.uniform(k1, (TH, FUSE_DIM), jnp.float32, -0.1, 0.1),
        "b1": jax.random.uniform(k2, (1, FUSE_DIM), jnp.float32, -0.1, 0.1),
        "w2": jax.random.uniform(k3, (FUSE_DIM, 1), jnp.float32, -0.1, 0.1),
        "b2": jax.random.uniform(k4, (1, 1), jnp.float32, -0.1, 0.1),
    }
    return params


# ---------------------------------------------------------------------------
# Pure-JAX f32 reference (mirrors the PyTorch forward semantics).
# ---------------------------------------------------------------------------
def _lstm_ref(x, pres, valid, wih, whh, b):
    n, t, _ = x.shape
    H = whh.shape[0]
    outs = []
    for i in range(n):
        h = jnp.zeros((1, H), jnp.float32)
        c = jnp.zeros((1, H), jnp.float32)
        hs = []
        for j in range(t):
            gates = x[i, j:j + 1] @ wih + h @ whh + b
            ig = jax.nn.sigmoid(gates[:, 0:H])
            fg = jax.nn.sigmoid(gates[:, H:2 * H])
            gg = jnp.tanh(gates[:, 2 * H:3 * H])
            og = jax.nn.sigmoid(gates[:, 3 * H:4 * H])
            c_new = fg * c + ig * gg
            h_new = og * jnp.tanh(c_new)
            p = pres[i, j, 0]
            v = valid[i, j, 0]
            h = p * h_new + (1.0 - p) * h
            c = p * c_new + (1.0 - p) * c
            hs.append(v * h[0])
        outs.append(jnp.stack(hs))
    return jnp.stack(outs)


def reference_forward(inputs, presence, seq_length, lstm_masks, params):
    t = lstm_masks.shape[1]
    valid = (jnp.arange(t)[None, :] < seq_length[:, None]).astype(jnp.float32)[..., None]
    hs_list = [_lstm_ref(inputs[m], presence[m], valid,
                         params[m]["wih"], params[m]["whh"], params[m]["b"]) for m in MODS]
    hs_all = jnp.concatenate(hs_list, axis=2)
    z = hs_all @ params["fuse"]["w1"] + params["fuse"]["b1"][0]
    y = z @ params["fuse"]["w2"] + params["fuse"]["b2"][0]
    return y * lstm_masks


if __name__ == "__main__":
    n, t = 2, 8
    dims = {"linguistic": 32, "acoustic": 16}

    key = jax.random.PRNGKey(0)
    key, pkey = jax.random.split(key)
    params = init_params(pkey, MODS, dims)

    seq_length = jnp.array([8, 5], dtype=jnp.int32)
    valid = (jnp.arange(t)[None, :] < seq_length[:, None]).astype(jnp.float32)[..., None]

    inputs, presence = {}, {}
    for mod in MODS:
        key, kx, kp = jax.random.split(key, 3)
        inputs[mod] = 0.5 * jax.random.normal(kx, (n, t, dims[mod]), jnp.float32)
        presence[mod] = (jax.random.uniform(kp, (n, t, 1)) < 0.7).astype(jnp.float32) * valid
    lstm_masks = valid  # (n, t, 1)

    out = async_naive_multimodal(inputs, presence, seq_length, lstm_masks, params)
    out = jax.block_until_ready(out)

    ref = reference_forward(inputs, presence, seq_length, lstm_masks, params)
    assert out.shape == (n, t, 1), out.shape
    # Tolerance loosened vs. the f32 reference because all MXU matmuls run with bf16
    # operands (f32 accumulation).
    assert jnp.allclose(out, ref, atol=2e-2, rtol=2e-2), jnp.max(jnp.abs(out - ref))
    print("KERNEL_OK")
</pallas_src>

<mosaic_0001>
module attributes {stable_mosaic.version = 11 : i64} {
  func.func @_fused_kernel(%arg0: i32, %arg1: i32, %arg2: memref<8x8x32xbf16, #tpu.memory_space<vmem>>, %arg3: memref<8x8x16xbf16, #tpu.memory_space<vmem>>, %arg4: memref<8x8x1xi32, #tpu.memory_space<vmem>>, %arg5: memref<32x512xbf16, #tpu.memory_space<vmem>>, %arg6: memref<1x512xf32, #tpu.memory_space<vmem>>, %arg7: memref<16x256xbf16, #tpu.memory_space<vmem>>, %arg8: memref<1x256xf32, #tpu.memory_space<vmem>>, %arg9: memref<192x768xbf16, #tpu.memory_space<vmem>>, %arg10: memref<128x64xbf16, #tpu.memory_space<vmem>>, %arg11: memref<64x64xbf16, #tpu.memory_space<vmem>>, %arg12: memref<1x64xf32, #tpu.memory_space<vmem>>, %arg13: memref<1x64xf32, #tpu.memory_space<vmem>>, %arg14: memref<1x1xf32, #tpu.memory_space<vmem>>, %arg15: memref<8x8xf32, #tpu.memory_space<vmem>>, %arg16: memref<8x8x512xbf16, #tpu.memory_space<vmem>>, %arg17: memref<8x8x256xbf16, #tpu.memory_space<vmem>>, %arg18: memref<8x8x128xbf16, #tpu.memory_space<vmem>>, %arg19: memref<8x8x64xbf16, #tpu.memory_space<vmem>>, %arg20: memref<8x128xf32, #tpu.memory_space<vmem>>, %arg21: memref<8x128xf32, #tpu.memory_space<vmem>>, %arg22: memref<8x64xf32, #tpu.memory_space<vmem>>, %arg23: memref<8x64xf32, #tpu.memory_space<vmem>>) attributes {dimension_semantics = [#tpu.dimension_semantics<parallel>, #tpu.dimension_semantics<arbitrary>], iteration_bounds = array<i64: 1, 1>, scalar_prefetch = 0 : i64, scratch_operands = 8 : i64, tpu.core_type = #tpu.core_type<tc>, window_params = [{transform_indices = @transform_0, window_bounds = array<i64: 8, 8, 32>}, {transform_indices = @transform_1, window_bounds = array<i64: 8, 8, 16>}, {transform_indices = @transform_2, window_bounds = array<i64: 8, 8, 1>}, {pipeline_mode = #tpu.pipeline_mode<synchronous>, transform_indices = @transform_3, window_bounds = array<i64: 32, 512>}, {pipeline_mode = #tpu.pipeline_mode<synchronous>, transform_indices = @transform_4, window_bounds = array<i64: 1, 512>}, {pipeline_mode = #tpu.pipeline_mode<synchronous>, transform_indices = @transform_5, window_bounds = array<i64: 16, 256>}, {pipeline_mode = #tpu.pipeline_mode<synchronous>, transform_indices = @transform_6, window_bounds = array<i64: 1, 256>}, {pipeline_mode = #tpu.pipeline_mode<synchronous>, transform_indices = @transform_7, window_bounds = array<i64: 192, 768>}, {pipeline_mode = #tpu.pipeline_mode<synchronous>, transform_indices = @transform_8, window_bounds = array<i64: 128, 64>}, {pipeline_mode = #tpu.pipeline_mode<synchronous>, transform_indices = @transform_9, window_bounds = array<i64: 64, 64>}, {pipeline_mode = #tpu.pipeline_mode<synchronous>, transform_indices = @transform_10, window_bounds = array<i64: 1, 64>}, {pipeline_mode = #tpu.pipeline_mode<synchronous>, transform_indices = @transform_11, window_bounds = array<i64: 1, 64>}, {pipeline_mode = #tpu.pipeline_mode<synchronous>, transform_indices = @transform_12, window_bounds = array<i64: 1, 1>}, {transform_indices = @transform_13, window_bounds = array<i64: 8, 8>}]} {
    %c0_i32 = arith.constant 0 : i32
    %0 = arith.cmpi eq, %arg1, %c0_i32 : i32
    %1 = arith.extui %0 : i1 to i32
    %c0_i32_0 = arith.constant 0 : i32
    %2 = arith.cmpi ne, %1, %c0_i32_0 : i32
    scf.if %2 {
      %cst_243 = arith.constant 0.000000e+00 : f32
      %797 = vector.broadcast %cst_243 : f32 to vector<8x128xf32>
      %c0_244 = arith.constant 0 : index
      %c0_245 = arith.constant 0 : index
      %798 = vector.load %arg20[%c0_244, %c0_245] : memref<8x128xf32, #tpu.memory_space<vmem>>, vector<8x128xf32>
      tpu.vector_store %arg20[%c0_244, %c0_245], %797 {strides = array<i32>} : memref<8x128xf32, #tpu.memory_space<vmem>>, vector<8x128xf32>,
      %cst_246 = arith.constant 0.000000e+00 : f32
      %799 = vector.broadcast %cst_246 : f32 to vector<8x128xf32>
      %c0_247 = arith.constant 0 : index
      %c0_248 = arith.constant 0 : index
      %800 = vector.load %arg21[%c0_247, %c0_248] : memref<8x128xf32, #tpu.memory_space<vmem>>, vector<8x128xf32>
      tpu.vector_store %arg21[%c0_247, %c0_248], %799 {strides = array<i32>} : memref<8x128xf32, #tpu.memory_space<vmem>>, vector<8x128xf32>,
      %cst_249 = arith.constant 0.000000e+00 : f32
      %801 = vector.broadcast %cst_249 : f32 to vector<8x64xf32>
      %c0_250 = arith.constant 0 : index
      %c0_251 = arith.constant 0 : index
      %802 = vector.load %arg22[%c0_250, %c0_251] : memref<8x64xf32, #tpu.memory_space<vmem>>, vector<8x64xf32>
      tpu.vector_store %arg22[%c0_250, %c0_251], %801 {strides = array<i32>} : memref<8x64xf32, #tpu.memory_space<vmem>>, vector<8x64xf32>,
      %cst_252 = arith.constant 0.000000e+00 : f32
      %803 = vector.broadcast %cst_252 : f32 to vector<8x64xf32>
      %c0_253 = arith.constant 0 : index
      %c0_254 = arith.constant 0 : index
      %804 = vector.load %arg23[%c0_253, %c0_254] : memref<8x64xf32, #tpu.memory_space<vmem>>, vector<8x64xf32>
      tpu.vector_store %arg23[%c0_253, %c0_254], %803 {strides = array<i32>} : memref<8x64xf32, #tpu.memory_space<vmem>>, vector<8x64xf32>,
    } else {
    }
    %c0 = arith.constant 0 : index
    %c0_1 = arith.constant 0 : index
    %c0_2 = arith.constant 0 : index
    %3 = vector.load %arg2[%c0, %c0_1, %c0_2] : memref<8x8x32xbf16, #tpu.memory_space<vmem>>, vector<8x8x32xbf16>
    %4 = vector.shape_cast %3 : vector<8x8x32xbf16> to vector<64x32xbf16>
    %c0_3 = arith.constant 0 : index
    %c0_4 = arith.constant 0 : index
    %5 = vector.load %arg5[%c0_3, %c0_4] : memref<32x512xbf16, #tpu.memory_space<vmem>>, vector<32x512xbf16>
    %cst = arith.constant dense<0.000000e+00> : vector<64x512xf32>
    %6 = tpu.matmul %4, %5, %cst {dimension_numbers = #tpu.dot_dimension_numbers<[1], [0], [0], [1], [0, 0, 1, 1], [], []>} : vector<64x32xbf16>, vector<32x512xbf16>, vector<64x512xf32> -> vector<64x512xf32>
    %c0_5 = arith.constant 0 : index
    %c0_6 = arith.constant 0 : index
    %7 = vector.load %arg6[%c0_5, %c0_6] : memref<1x512xf32, #tpu.memory_space<vmem>>, vector<1x512xf32>
    %8 = vector.broadcast %7 : vector<1x512xf32> to vector<64x512xf32>
    %9 = arith.addf %6, %8 : vector<64x512xf32>
    %10 = arith.truncf %9 : vector<64x512xf32> to vector<64x512xbf16>
    %11 = vector.shape_cast %10 : vector<64x512xbf16> to vector<8x8x512xbf16>
    %c0_7 = arith.constant 0 : index
    %c0_8 = arith.constant 0 : index
    %c0_9 = arith.constant 0 : index
    %12 = vector.load %arg16[%c0_7, %c0_8, %c0_9] : memref<8x8x512xbf16, #tpu.memory_space<vmem>>, vector<8x8x512xbf16>
    tpu.vector_store %arg16[%c0_7, %c0_8, %c0_9], %11 {strides = array<i32>} : memref<8x8x512xbf16, #tpu.memory_space<vmem>>, vector<8x8x512xbf16>,
    %c0_10 = arith.constant 0 : index
    %c0_11 = arith.constant 0 : index
    %c0_12 = arith.constant 0 : index
    %13 = vector.load %arg3[%c0_10, %c0_11, %c0_12] : memref<8x8x16xbf16, #tpu.memory_space<vmem>>, vector<8x8x16xbf16>
    %14 = vector.shape_cast %13 : vector<8x8x16xbf16> to vector<64x16xbf16>
    %c0_13 = arith.constant 0 : index
    %c0_14 = arith.constant 0 : index
    %15 = vector.load %arg7[%c0_13, %c0_14] : memref<16x256xbf16, #tpu.memory_space<vmem>>, vector<16x256xbf16>
    %cst_15 = arith.constant dense<0.000000e+00> : vector<64x256xf32>
    %16 = tpu.matmul %14, %15, %cst_15 {dimension_numbers = #tpu.dot_dimension_numbers<[1], [0], [0], [1], [0, 0, 1, 1], [], []>} : vector<64x16xbf16>, vector<16x256xbf16>, vector<64x256xf32> -> vector<64x256xf32>
    %c0_16 = arith.constant 0 : index
    %c0_17 = arith.constant 0 : index
    %17 = vector.load %arg8[%c0_16, %c0_17] : memref<1x256xf32, #tpu.memory_space<vmem>>, vector<1x256xf32>
    %18 = vector.broadcast %17 : vector<1x256xf32> to vector<64x256xf32>
    %19 = arith.addf %16, %18 : vector<64x256xf32>
    %20 = arith.truncf %19 : vector<64x256xf32> to vector<64x256xbf16>
    %21 = vector.shape_cast %20 : vector<64x256xbf16> to vector<8x8x256xbf16>
    %c0_18 = arith.constant 0 : index
    %c0_19 = arith.constant 0 : index
    %c0_20 = arith.constant 0 : index
    %22 = vector.load %arg17[%c0_18, %c0_19, %c0_20] : memref<8x8x256xbf16, #tpu.memory_space<vmem>>, vector<8x8x256xbf16>
    tpu.vector_store %arg17[%c0_18, %c0_19, %c0_20], %21 {strides = array<i32>} : memref<8x8x256xbf16, #tpu.memory_space<vmem>>, vector<8x8x256xbf16>,
    %c0_21 = arith.constant 0 : index
    %c0_22 = arith.constant 0 : index
    %23 = vector.load %arg20[%c0_21, %c0_22] : memref<8x128xf32, #tpu.memory_space<vmem>>, vector<8x128xf32>
    %c0_23 = arith.constant 0 : index
    %c0_24 = arith.constant 0 : index
    %24 = vector.load %arg21[%c0_23, %c0_24] : memref<8x128xf32, #tpu.memory_space<vmem>>, vector<8x128xf32>
    %c0_25 = arith.constant 0 : index
    %c0_26 = arith.constant 0 : index
    %25 = vector.load %arg22[%c0_25, %c0_26] : memref<8x64xf32, #tpu.memory_space<vmem>>, vector<8x64xf32>
    %c0_27 = arith.constant 0 : index
    %c0_28 = arith.constant 0 : index
    %26 = vector.load %arg23[%c0_27, %c0_28] : memref<8x64xf32, #tpu.memory_space<vmem>>, vector<8x64xf32>
    %c0_i32_29 = arith.constant 0 : i32
    %27 = arith.index_cast %c0_i32_29 : i32 to index
    %c0_30 = arith.constant 0 : index
    %c0_31 = arith.constant 0 : index
    %28 = vector.load %arg4[%27, %c0_30, %c0_31] : memref<8x8x1xi32, #tpu.memory_space<vmem>>, vector<1x8x1xi32>
    %29 = vector.shape_cast %28 : vector<1x8x1xi32> to vector<8x1xi32>
    %c1_i32 = arith.constant 1 : i32
    %30 = vector.broadcast %c1_i32 : i32 to vector<8x1xi32>
    %31 = arith.andi %29, %30 : vector<8x1xi32>
    %c0_i32_32 = arith.constant 0 : i32
    %32 = vector.broadcast %c0_i32_32 : i32 to vector<8x1xi32>
    %33 = arith.cmpi sgt, %31, %32 : vector<8x1xi32>
    %c2_i32 = arith.constant 2 : i32
    %34 = vector.broadcast %c2_i32 : i32 to vector<8x1xi32>
    %35 = arith.andi %29, %34 : vector<8x1xi32>
    %c0_i32_33 = arith.constant 0 : i32
    %36 = vector.broadcast %c0_i32_33 : i32 to vector<8x1xi32>
    %37 = arith.cmpi sgt, %35, %36 : vector<8x1xi32>
    %c4_i32 = arith.constant 4 : i32
    %38 = vector.broadcast %c4_i32 : i32 to vector<8x1xi32>
    %39 = arith.andi %29, %38 : vector<8x1xi32>
    %c0_i32_34 = arith.constant 0 : i32
    %40 = vector.broadcast %c0_i32_34 : i32 to vector<8x1xi32>
    %41 = arith.cmpi sgt, %39, %40 : vector<8x1xi32>
    %42 = tpu.concatenate %23, %25 in 1 : vector<8x128xf32>, vector<8x64xf32> -> vector<8x192xf32>
    %43 = arith.truncf %42 : vector<8x192xf32> to vector<8x192xbf16>
    %c0_35 = arith.constant 0 : index
    %c0_36 = arith.constant 0 : index
    %44 = vector.load %arg9[%c0_35, %c0_36] : memref<192x768xbf16, #tpu.memory_space<vmem>>, vector<192x768xbf16>
    %cst_37 = arith.constant dense<0.000000e+00> : vector<8x768xf32>
    %45 = tpu.matmul %43, %44, %cst_37 {dimension_numbers = #tpu.dot_dimension_numbers<[1], [0], [0], [1], [0, 0, 1, 1], [], []>} : vector<8x192xbf16>, vector<192x768xbf16>, vector<8x768xf32> -> vector<8x768xf32>
    %46 = arith.index_cast %c0_i32_29 : i32 to index
    %c0_38 = arith.constant 0 : index
    %c0_39 = arith.constant 0 : index
    %47 = vector.load %arg16[%46, %c0_38, %c0_39] : memref<8x8x512xbf16, #tpu.memory_space<vmem>>, vector<1x8x512xbf16>
    %48 = vector.shape_cast %47 : vector<1x8x512xbf16> to vector<8x512xbf16>
    %49 = arith.extf %48 : vector<8x512xbf16> to vector<8x512xf32>
    %50 = vector.extract_strided_slice %45 {offsets = [0, 0], sizes = [8, 512], strides = [1, 1]} : vector<8x768xf32> to vector<8x512xf32>
    %51 = arith.addf %49, %50 : vector<8x512xf32>
    %52 = arith.index_cast %c0_i32_29 : i32 to index
    %c0_40 = arith.constant 0 : index
    %c0_41 = arith.constant 0 : index
    %53 = vector.load %arg17[%52, %c0_40, %c0_41] : memref<8x8x256xbf16, #tpu.memory_space<vmem>>, vector<1x8x256xbf16>
    %54 = vector.shape_cast %53 : vector<1x8x256xbf16> to vector<8x256xbf16>
    %55 = arith.extf %54 : vector<8x256xbf16> to vector<8x256xf32>
    %56 = vector.extract_strided_slice %45 {offsets = [0, 512], sizes = [8, 256], strides = [1, 1]} : vector<8x768xf32> to vector<8x256xf32>
    %57 = arith.addf %55, %56 : vector<8x256xf32>
    %58 = vector.extract_strided_slice %51 {offsets = [0, 0], sizes = [8, 384], strides = [1, 1]} : vector<8x512xf32> to vector<8x384xf32>
    %59 = arith.negf %58 : vector<8x384xf32>
    %60 = math.exp %59 : vector<8x384xf32>
    %cst_42 = arith.constant 1.000000e+00 : f32
    %61 = vector.broadcast %cst_42 : f32 to vector<8x384xf32>
    %62 = arith.addf %61, %60 : vector<8x384xf32>
    %63 = arith.divf %61, %62 : vector<8x384xf32>
    %64 = vector.extract_strided_slice %51 {offsets = [0, 384], sizes = [8, 128], strides = [1, 1]} : vector<8x512xf32> to vector<8x128xf32>
    %65 = math.tanh %64 : vector<8x128xf32>
    %66 = vector.extract_strided_slice %63 {offsets = [0, 0], sizes = [8, 128], strides = [1, 1]} : vector<8x384xf32> to vector<8x128xf32>
    %67 = vector.extract_strided_slice %63 {offsets = [0, 128], sizes = [8, 128], strides = [1, 1]} : vector<8x384xf32> to vector<8x128xf32>
    %68 = vector.extract_strided_slice %63 {offsets = [0, 256], sizes = [8, 128], strides = [1, 1]} : vector<8x384xf32> to vector<8x128xf32>
    %69 = arith.mulf %67, %24 : vector<8x128xf32>
    %70 = arith.mulf %66, %65 : vector<8x128xf32>
    %71 = arith.addf %69, %70 : vector<8x128xf32>
    %72 = math.tanh %71 : vector<8x128xf32>
    %73 = arith.mulf %68, %72 : vector<8x128xf32>
    %74 = vector.extract_strided_slice %57 {offsets = [0, 0], sizes = [8, 192], strides = [1, 1]} : vector<8x256xf32> to vector<8x192xf32>
    %75 = arith.negf %74 : vector<8x192xf32>
    %76 = math.exp %75 : vector<8x192xf32>
    %cst_43 = arith.constant 1.000000e+00 : f32
    %77 = vector.broadcast %cst_43 : f32 to vector<8x192xf32>
    %78 = arith.addf %77, %76 : vector<8x192xf32>
    %79 = arith.divf %77, %78 : vector<8x192xf32>
    %80 = vector.extract_strided_slice %57 {offsets = [0, 192], sizes = [8, 64], strides = [1, 1]} : vector<8x256xf32> to vector<8x64xf32>
    %81 = math.tanh %80 : vector<8x64xf32>
    %82 = vector.extract_strided_slice %79 {offsets = [0, 0], sizes = [8, 64], strides = [1, 1]} : vector<8x192xf32> to vector<8x64xf32>
    %83 = vector.extract_strided_slice %79 {offsets = [0, 64], sizes = [8, 64], strides = [1, 1]} : vector<8x192xf32> to vector<8x64xf32>
    %84 = vector.extract_strided_slice %79 {offsets = [0, 128], sizes = [8, 64], strides = [1, 1]} : vector<8x192xf32> to vector<8x64xf32>
    %85 = arith.mulf %83, %26 : vector<8x64xf32>
    %86 = arith.mulf %82, %81 : vector<8x64xf32>
    %87 = arith.addf %85, %86 : vector<8x64xf32>
    %88 = math.tanh %87 : vector<8x64xf32>
    %89 = arith.mulf %84, %88 : vector<8x64xf32>
    %90 = vector.shape_cast %33 : vector<8x1xi1> to vector<8x1xi1>
    %91 = vector.broadcast %90 : vector<8x1xi1> to vector<8x128xi1>
    %92 = arith.select %91, %73, %23 : vector<8x128xi1>, vector<8x128xf32>
    %93 = vector.shape_cast %33 : vector<8x1xi1> to vector<8x1xi1>
    %94 = vector.broadcast %93 : vector<8x1xi1> to vector<8x128xi1>
    %95 = arith.select %94, %71, %24 : vector<8x128xi1>, vector<8x128xf32>
    %96 = vector.shape_cast %37 : vector<8x1xi1> to vector<8x1xi1>
    %97 = vector.broadcast %96 : vector<8x1xi1> to vector<8x64xi1>
    %98 = arith.select %97, %89, %25 : vector<8x64xi1>, vector<8x64xf32>
    %99 = vector.shape_cast %37 : vector<8x1xi1> to vector<8x1xi1>
    %100 = vector.broadcast %99 : vector<8x1xi1> to vector<8x64xi1>
    %101 = arith.select %100, %87, %26 : vector<8x64xi1>, vector<8x64xf32>
    %cst_44 = arith.constant 0.000000e+00 : f32
    %102 = vector.shape_cast %41 : vector<8x1xi1> to vector<8x1xi1>
    %103 = vector.broadcast %102 : vector<8x1xi1> to vector<8x128xi1>
    %104 = vector.broadcast %cst_44 : f32 to vector<8x128xf32>
    %105 = arith.select %103, %92, %104 : vector<8x128xi1>, vector<8x128xf32>
    %106 = arith.truncf %105 : vector<8x128xf32> to vector<8x128xbf16>
    %107 = arith.index_cast %c0_i32_29 : i32 to index
    %c0_45 = arith.constant 0 : index
    %c0_46 = arith.constant 0 : index
    %108 = vector.load %arg18[%107, %c0_45, %c0_46] : memref<8x8x128xbf16, #tpu.memory_space<vmem>>, vector<1x8x128xbf16>
    %109 = vector.shape_cast %108 : vector<1x8x128xbf16> to vector<8x128xbf16>
    %110 = vector.shape_cast %106 : vector<8x128xbf16> to vector<1x8x128xbf16>
    tpu.vector_store %arg18[%107, %c0_45, %c0_46], %110 {strides = array<i32>} : memref<8x8x128xbf16, #tpu.memory_space<vmem>>, vector<1x8x128xbf16>,
    %cst_47 = arith.constant 0.000000e+00 : f32
    %111 = vector.shape_cast %41 : vector<8x1xi1> to vector<8x1xi1>
    %112 = vector.broadcast %111 : vector<8x1xi1> to vector<8x64xi1>
    %113 = vector.broadcast %cst_47 : f32 to vector<8x64xf32>
    %114 = arith.select %112, %98, %113 : vector<8x64xi1>, vector<8x64xf32>
    %115 = arith.truncf %114 : vector<8x64xf32> to vector<8x64xbf16>
    %116 = arith.index_cast %c0_i32_29 : i32 to index
    %c0_48 = arith.constant 0 : index
    %c0_49 = arith.constant 0 : index
    %117 = vector.load %arg19[%116, %c0_48, %c0_49] : memref<8x8x64xbf16, #tpu.memory_space<vmem>>, vector<1x8x64xbf16>
    %118 = vector.shape_cast %117 : vector<1x8x64xbf16> to vector<8x64xbf16>
    %119 = vector.shape_cast %115 : vector<8x64xbf16> to vector<1x8x64xbf16>
    tpu.vector_store %arg19[%116, %c0_48, %c0_49], %119 {strides = array<i32>} : memref<8x8x64xbf16, #tpu.memory_space<vmem>>, vector<1x8x64xbf16>,
    %c1_i32_50 = arith.constant 1 : i32
    %120 = arith.index_cast %c1_i32_50 : i32 to index
    %c0_51 = arith.constant 0 : index
    %c0_52 = arith.constant 0 : index
    %121 = vector.load %arg4[%120, %c0_51, %c0_52] : memref<8x8x1xi32, #tpu.memory_space<vmem>>, vector<1x8x1xi32>
    %122 = vector.shape_cast %121 : vector<1x8x1xi32> to vector<8x1xi32>
    %c1_i32_53 = arith.constant 1 : i32
    %123 = vector.broadcast %c1_i32_53 : i32 to vector<8x1xi32>
    %124 = arith.andi %122, %123 : vector<8x1xi32>
    %c0_i32_54 = arith.constant 0 : i32
    %125 = vector.broadcast %c0_i32_54 : i32 to vector<8x1xi32>
    %126 = arith.cmpi sgt, %124, %125 : vector<8x1xi32>
    %c2_i32_55 = arith.constant 2 : i32
    %127 = vector.broadcast %c2_i32_55 : i32 to vector<8x1xi32>
    %128 = arith.andi %122, %127 : vector<8x1xi32>
    %c0_i32_56 = arith.constant 0 : i32
    %129 = vector.broadcast %c0_i32_56 : i32 to vector<8x1xi32>
    %130 = arith.cmpi sgt, %128, %129 : vector<8x1xi32>
    %c4_i32_57 = arith.constant 4 : i32
    %131 = vector.broadcast %c4_i32_57 : i32 to vector<8x1xi32>
    %132 = arith.andi %122, %131 : vector<8x1xi32>
    %c0_i32_58 = arith.constant 0 : i32
    %133 = vector.broadcast %c0_i32_58 : i32 to vector<8x1xi32>
    %134 = arith.cmpi sgt, %132, %133 : vector<8x1xi32>
    %135 = tpu.concatenate %92, %98 in 1 : vector<8x128xf32>, vector<8x64xf32> -> vector<8x192xf32>
    %136 = arith.truncf %135 : vector<8x192xf32> to vector<8x192xbf16>
    %c0_59 = arith.constant 0 : index
    %c0_60 = arith.constant 0 : index
    %137 = vector.load %arg9[%c0_59, %c0_60] : memref<192x768xbf16, #tpu.memory_space<vmem>>, vector<192x768xbf16>
    %cst_61 = arith.constant dense<0.000000e+00> : vector<8x768xf32>
    %138 = tpu.matmul %136, %137, %cst_61 {dimension_numbers = #tpu.dot_dimension_numbers<[1], [0], [0], [1], [0, 0, 1, 1], [], []>} : vector<8x192xbf16>, vector<192x768xbf16>, vector<8x768xf32> -> vector<8x768xf32>
    %139 = arith.index_cast %c1_i32_50 : i32 to index
    %c0_62 = arith.constant 0 : index
    %c0_63 = arith.constant 0 : index
    %140 = vector.load %arg16[%139, %c0_62, %c0_63] : memref<8x8x512xbf16, #tpu.memory_space<vmem>>, vector<1x8x512xbf16>
    %141 = vector.shape_cast %140 : vector<1x8x512xbf16> to vector<8x512xbf16>
    %142 = arith.extf %141 : vector<8x512xbf16> to vector<8x512xf32>
    %143 = vector.extract_strided_slice %138 {offsets = [0, 0], sizes = [8, 512], strides = [1, 1]} : vector<8x768xf32> to vector<8x512xf32>
    %144 = arith.addf %142, %143 : vector<8x512xf32>
    %145 = arith.index_cast %c1_i32_50 : i32 to index
    %c0_64 = arith.constant 0 : index
    %c0_65 = arith.constant 0 : index
    %146 = vector.load %arg17[%145, %c0_64, %c0_65] : memref<8x8x256xbf16, #tpu.memory_space<vmem>>, vector<1x8x256xbf16>
    %147 = vector.shape_cast %146 : vector<1x8x256xbf16> to vector<8x256xbf16>
    %148 = arith.extf %147 : vector<8x256xbf16> to vector<8x256xf32>
    %149 = vector.extract_strided_slice %138 {offsets = [0, 512], sizes = [8, 256], strides = [1, 1]} : vector<8x768xf32> to vector<8x256xf32>
    %150 = arith.addf %148, %149 : vector<8x256xf32>
    %151 = vector.extract_strided_slice %144 {offsets = [0, 0], sizes = [8, 384], strides = [1, 1]} : vector<8x512xf32> to vector<8x384xf32>
    %152 = arith.negf %151 : vector<8x384xf32>
    %153 = math.exp %152 : vector<8x384xf32>
    %cst_66 = arith.constant 1.000000e+00 : f32
    %154 = vector.broadcast %cst_66 : f32 to vector<8x384xf32>
    %155 = arith.addf %154, %153 : vector<8x384xf32>
    %156 = arith.divf %154, %155 : vector<8x384xf32>
    %157 = vector.extract_strided_slice %144 {offsets = [0, 384], sizes = [8, 128], strides = [1, 1]} : vector<8x512xf32> to vector<8x128xf32>
    %158 = math.tanh %157 : vector<8x128xf32>
    %159 = vector.extract_strided_slice %156 {offsets = [0, 0], sizes = [8, 128], strides = [1, 1]} : vector<8x384xf32> to vector<8x128xf32>
    %160 = vector.extract_strided_slice %156 {offsets = [0, 128], sizes = [8, 128], strides = [1, 1]} : vector<8x384xf32> to vector<8x128xf32>
    %161 = vector.extract_strided_slice %156 {offsets = [0, 256], sizes = [8, 128], strides = [1, 1]} : vector<8x384xf32> to vector<8x128xf32>
    %162 = arith.mulf %160, %95 : vector<8x128xf32>
    %163 = arith.mulf %159, %158 : vector<8x128xf32>
    %164 = arith.addf %162, %163 : vector<8x128xf32>
    %165 = math.tanh %164 : vector<8x128xf32>
    %166 = arith.mulf %161, %165 : vector<8x128xf32>
    %167 = vector.extract_strided_slice %150 {offsets = [0, 0], sizes = [8, 192], strides = [1, 1]} : vector<8x256xf32> to vector<8x192xf32>
    %168 = arith.negf %167 : vector<8x192xf32>
    %169 = math.exp %168 : vector<8x192xf32>
    %cst_67 = arith.constant 1.000000e+00 : f32
    %170 = vector.broadcast %cst_67 : f32 to vector<8x192xf32>
    %171 = arith.addf %170, %169 : vector<8x192xf32>
    %172 = arith.divf %170, %171 : vector<8x192xf32>
    %173 = vector.extract_strided_slice %150 {offsets = [0, 192], sizes = [8, 64], strides = [1, 1]} : vector<8x256xf32> to vector<8x64xf32>
    %174 = math.tanh %173 : vector<8x64xf32>
    %175 = vector.extract_strided_slice %172 {offsets = [0, 0], sizes = [8, 64], strides = [1, 1]} : vector<8x192xf32> to vector<8x64xf32>
    %176 = vector.extract_strided_slice %172 {offsets = [0, 64], sizes = [8, 64], strides = [1, 1]} : vector<8x192xf32> to vector<8x64xf32>
    %177 = vector.extract_strided_slice %172 {offsets = [0, 128], sizes = [8, 64], strides = [1, 1]} : vector<8x192xf32> to vector<8x64xf32>
    %178 = arith.mulf %176, %101 : vector<8x64xf32>
    %179 = arith.mulf %175, %174 : vector<8x64xf32>
    %180 = arith.addf %178, %179 : vector<8x64xf32>
    %181 = math.tanh %180 : vector<8x64xf32>
    %182 = arith.mulf %177, %181 : vector<8x64xf32>
    %183 = vector.shape_cast %126 : vector<8x1xi1> to vector<8x1xi1>
    %184 = vector.broadcast %183 : vector<8x1xi1> to vector<8x128xi1>
    %185 = arith.select %184, %166, %92 : vector<8x128xi1>, vector<8x128xf32>
    %186 = vector.shape_cast %126 : vector<8x1xi1> to vector<8x1xi1>
    %187 = vector.broadcast %186 : vector<8x1xi1> to vector<8x128xi1>
    %188 = arith.select %187, %164, %95 : vector<8x128xi1>, vector<8x128xf32>
    %189 = vector.shape_cast %130 : vector<8x1xi1> to vector<8x1xi1>
    %190 = vector.broadcast %189 : vector<8x1xi1> to vector<8x64xi1>
    %191 = arith.select %190, %182, %98 : vector<8x64xi1>, vector<8x64xf32>
    %192 = vector.shape_cast %130 : vector<8x1xi1> to vector<8x1xi1>
    %193 = vector.broadcast %192 : vector<8x1xi1> to vector<8x64xi1>
    %194 = arith.select %193, %180, %101 : vector<8x64xi1>, vector<8x64xf32>
    %cst_68 = arith.constant 0.000000e+00 : f32
    %195 = vector.shape_cast %134 : vector<8x1xi1> to vector<8x1xi1>
    %196 = vector.broadcast %195 : vector<8x1xi1> to vector<8x128xi1>
    %197 = vector.broadcast %cst_68 : f32 to vector<8x128xf32>
    %198 = arith.select %196, %185, %197 : vector<8x128xi1>, vector<8x128xf32>
    %199 = arith.truncf %198 : vector<8x128xf32> to vector<8x128xbf16>
    %200 = arith.index_cast %c1_i32_50 : i32 to index
    %c0_69 = arith.constant 0 : index
    %c0_70 = arith.constant 0 : index
    %201 = vector.load %arg18[%200, %c0_69, %c0_70] : memref<8x8x128xbf16, #tpu.memory_space<vmem>>, vector<1x8x128xbf16>
    %202 = vector.shape_cast %201 : vector<1x8x128xbf16> to vector<8x128xbf16>
    %203 = vector.shape_cast %199 : vector<8x128xbf16> to vector<1x8x128xbf16>
    tpu.vector_store %arg18[%200, %c0_69, %c0_70], %203 {strides = array<i32>} : memref<8x8x128xbf16, #tpu.memory_space<vmem>>, vector<1x8x128xbf16>,
    %cst_71 = arith.constant 0.000000e+00 : f32
    %204 = vector.shape_cast %134 : vector<8x1xi1> to vector<8x1xi1>
    %205 = vector.broadcast %204 : vector<8x1xi1> to vector<8x64xi1>
    %206 = vector.broadcast %cst_71 : f32 to vector<8x64xf32>
    %207 = arith.select %205, %191, %206 : vector<8x64xi1>, vector<8x64xf32>
    %208 = arith.truncf %207 : vector<8x64xf32> to vector<8x64xbf16>
    %209 = arith.index_cast %c1_i32_50 : i32 to index
    %c0_72 = arith.constant 0 : index
    %c0_73 = arith.constant 0 : index
    %210 = vector.load %arg19[%209, %c0_72, %c0_73] : memref<8x8x64xbf16, #tpu.memory_space<vmem>>, vector<1x8x64xbf16>
    %211 = vector.shape_cast %210 : vector<1x8x64xbf16> to vector<8x64xbf16>
    %212 = vector.shape_cast %208 : vector<8x64xbf16> to vector<1x8x64xbf16>
    tpu.vector_store %arg19[%209, %c0_72, %c0_73], %212 {strides = array<i32>} : memref<8x8x64xbf16, #tpu.memory_space<vmem>>, vector<1x8x64xbf16>,
    %c2_i32_74 = arith.constant 2 : i32
    %213 = arith.index_cast %c2_i32_74 : i32 to index
    %c0_75 = arith.constant 0 : index
    %c0_76 = arith.constant 0 : index
    %214 = vector.load %arg4[%213, %c0_75, %c0_76] : memref<8x8x1xi32, #tpu.memory_space<vmem>>, vector<1x8x1xi32>
    %215 = vector.shape_cast %214 : vector<1x8x1xi32> to vector<8x1xi32>
    %c1_i32_77 = arith.constant 1 : i32
    %216 = vector.broadcast %c1_i32_77 : i32 to vector<8x1xi32>
    %217 = arith.andi %215, %216 : vector<8x1xi32>
    %c0_i32_78 = arith.constant 0 : i32
    %218 = vector.broadcast %c0_i32_78 : i32 to vector<8x1xi32>
    %219 = arith.cmpi sgt, %217, %218 : vector<8x1xi32>
    %c2_i32_79 = arith.constant 2 : i32
    %220 = vector.broadcast %c2_i32_79 : i32 to vector<8x1xi32>
    %221 = arith.andi %215, %220 : vector<8x1xi32>
    %c0_i32_80 = arith.constant 0 : i32
    %222 = vector.broadcast %c0_i32_80 : i32 to vector<8x1xi32>
    %223 = arith.cmpi sgt, %221, %222 : vector<8x1xi32>
    %c4_i32_81 = arith.constant 4 : i32
    %224 = vector.broadcast %c4_i32_81 : i32 to vector<8x1xi32>
    %225 = arith.andi %215, %224 : vector<8x1xi32>
    %c0_i32_82 = arith.constant 0 : i32
    %226 = vector.broadcast %c0_i32_82 : i32 to vector<8x1xi32>
    %227 = arith.cmpi sgt, %225, %226 : vector<8x1xi32>
    %228 = tpu.concatenate %185, %191 in 1 : vector<8x128xf32>, vector<8x64xf32> -> vector<8x192xf32>
    %229 = arith.truncf %228 : vector<8x192xf32> to vector<8x192xbf16>
    %c0_83 = arith.constant 0 : index
    %c0_84 = arith.constant 0 : index
    %230 = vector.load %arg9[%c0_83, %c0_84] : memref<192x768xbf16, #tpu.memory_space<vmem>>, vector<192x768xbf16>
    %cst_85 = arith.constant dense<0.000000e+00> : vector<8x768xf32>
    %231 = tpu.matmul %229, %230, %cst_85 {dimension_numbers = #tpu.dot_dimension_numbers<[1], [0], [0], [1], [0, 0, 1, 1], [], []>} : vector<8x192xbf16>, vector<192x768xbf16>, vector<8x768xf32> -> vector<8x768xf32>
    %232 = arith.index_cast %c2_i32_74 : i32 to index
    %c0_86 = arith.constant 0 : index
    %c0_87 = arith.constant 0 : index
    %233 = vector.load %arg16[%232, %c0_86, %c0_87] : memref<8x8x512xbf16, #tpu.memory_space<vmem>>, vector<1x8x512xbf16>
    %234 = vector.shape_cast %233 : vector<1x8x512xbf16> to vector<8x512xbf16>
    %235 = arith.extf %234 : vector<8x512xbf16> to vector<8x512xf32>
    %236 = vector.extract_strided_slice %231 {offsets = [0, 0], sizes = [8, 512], strides = [1, 1]} : vector<8x768xf32> to vector<8x512xf32>
    %237 = arith.addf %235, %236 : vector<8x512xf32>
    %238 = arith.index_cast %c2_i32_74 : i32 to index
    %c0_88 = arith.constant 0 : index
    %c0_89 = arith.constant 0 : index
    %239 = vector.load %arg17[%238, %c0_88, %c0_89] : memref<8x8x256xbf16, #tpu.memory_space<vmem>>, vector<1x8x256xbf16>
    %240 = vector.shape_cast %239 : vector<1x8x256xbf16> to vector<8x256xbf16>
    %241 = arith.extf %240 : vector<8x256xbf16> to vector<8x256xf32>
    %242 = vector.extract_strided_slice %231 {offsets = [0, 512], sizes = [8, 256], strides = [1, 1]} : vector<8x768xf32> to vector<8x256xf32>
    %243 = arith.addf %241, %242 : vector<8x256xf32>
    %244 = vector.extract_strided_slice %237 {offsets = [0, 0], sizes = [8, 384], strides = [1, 1]} : vector<8x512xf32> to vector<8x384xf32>
    %245 = arith.negf %244 : vector<8x384xf32>
    %246 = math.exp %245 : vector<8x384xf32>
    %cst_90 = arith.constant 1.000000e+00 : f32
    %247 = vector.broadcast %cst_90 : f32 to vector<8x384xf32>
    %248 = arith.addf %247, %246 : vector<8x384xf32>
    %249 = arith.divf %247, %248 : vector<8x384xf32>
    %250 = vector.extract_strided_slice %237 {offsets = [0, 384], sizes = [8, 128], strides = [1, 1]} : vector<8x512xf32> to vector<8x128xf32>
    %251 = math.tanh %250 : vector<8x128xf32>
    %252 = vector.extract_strided_slice %249 {offsets = [0, 0], sizes = [8, 128], strides = [1, 1]} : vector<8x384xf32> to vector<8x128xf32>
    %253 = vector.extract_strided_slice %249 {offsets = [0, 128], sizes = [8, 128], strides = [1, 1]} : vector<8x384xf32> to vector<8x128xf32>
    %254 = vector.extract_strided_slice %249 {offsets = [0, 256], sizes = [8, 128], strides = [1, 1]} : vector<8x384xf32> to vector<8x128xf32>
    %255 = arith.mulf %253, %188 : vector<8x128xf32>
    %256 = arith.mulf %252, %251 : vector<8x128xf32>
    %257 = arith.addf %255, %256 : vector<8x128xf32>
    %258 = math.tanh %257 : vector<8x128xf32>
    %259 = arith.mulf %254, %258 : vector<8x128xf32>
    %260 = vector.extract_strided_slice %243 {offsets = [0, 0], sizes = [8, 192], strides = [1, 1]} : vector<8x256xf32> to vector<8x192xf32>
    %261 = arith.negf %260 : vector<8x192xf32>
    %262 = math.exp %261 : vector<8x192xf32>
    %cst_91 = arith.constant 1.000000e+00 : f32
    %263 = vector.broadcast %cst_91 : f32 to vector<8x192xf32>
    %264 = arith.addf %263, %262 : vector<8x192xf32>
    %265 = arith.divf %263, %264 : vector<8x192xf32>
    %266 = vector.extract_strided_slice %243 {offsets = [0, 192], sizes = [8, 64], strides = [1, 1]} : vector<8x256xf32> to vector<8x64xf32>
    %267 = math.tanh %266 : vector<8x64xf32>
    %268 = vector.extract_strided_slice %265 {offsets = [0, 0], sizes = [8, 64], strides = [1, 1]} : vector<8x192xf32> to vector<8x64xf32>
    %269 = vector.extract_strided_slice %265 {offsets = [0, 64], sizes = [8, 64], strides = [1, 1]} : vector<8x192xf32> to vector<8x64xf32>
    %270 = vector.extract_strided_slice %265 {offsets = [0, 128], sizes = [8, 64], strides = [1, 1]} : vector<8x192xf32> to vector<8x64xf32>
    %271 = arith.mulf %269, %194 : vector<8x64xf32>
    %272 = arith.mulf %268, %267 : vector<8x64xf32>
    %273 = arith.addf %271, %272 : vector<8x64xf32>
    %274 = math.tanh %273 : vector<8x64xf32>
    %275 = arith.mulf %270, %274 : vector<8x64xf32>
    %276 = vector.shape_cast %219 : vector<8x1xi1> to vector<8x1xi1>
    %277 = vector.broadcast %276 : vector<8x1xi1> to vector<8x128xi1>
    %278 = arith.select %277, %259, %185 : vector<8x128xi1>, vector<8x128xf32>
    %279 = vector.shape_cast %219 : vector<8x1xi1> to vector<8x1xi1>
    %280 = vector.broadcast %279 : vector<8x1xi1> to vector<8x128xi1>
    %281 = arith.select %280, %257, %188 : vector<8x128xi1>, vector<8x128xf32>
    %282 = vector.shape_cast %223 : vector<8x1xi1> to vector<8x1xi1>
    %283 = vector.broadcast %282 : vector<8x1xi1> to vector<8x64xi1>
    %284 = arith.select %283, %275, %191 : vector<8x64xi1>, vector<8x64xf32>
    %285 = vector.shape_cast %223 : vector<8x1xi1> to vector<8x1xi1>
    %286 = vector.broadcast %285 : vector<8x1xi1> to vector<8x64xi1>
    %287 = arith.select %286, %273, %194 : vector<8x64xi1>, vector<8x64xf32>
    %cst_92 = arith.constant 0.000000e+00 : f32
    %288 = vector.shape_cast %227 : vector<8x1xi1> to vector<8x1xi1>
    %289 = vector.broadcast %288 : vector<8x1xi1> to vector<8x128xi1>
    %290 = vector.broadcast %cst_92 : f32 to vector<8x128xf32>
    %291 = arith.select %289, %278, %290 : vector<8x128xi1>, vector<8x128xf32>
    %292 = arith.truncf %291 : vector<8x128xf32> to vector<8x128xbf16>
    %293 = arith.index_cast %c2_i32_74 : i32 to index
    %c0_93 = arith.constant 0 : index
    %c0_94 = arith.constant 0 : index
    %294 = vector.load %arg18[%293, %c0_93, %c0_94] : memref<8x8x128xbf16, #tpu.memory_space<vmem>>, vector<1x8x128xbf16>
    %295 = vector.shape_cast %294 : vector<1x8x128xbf16> to vector<8x128xbf16>
    %296 = vector.shape_cast %292 : vector<8x128xbf16> to vector<1x8x128xbf16>
    tpu.vector_store %arg18[%293, %c0_93, %c0_94], %296 {strides = array<i32>} : memref<8x8x128xbf16, #tpu.memory_space<vmem>>, vector<1x8x128xbf16>,
    %cst_95 = arith.constant 0.000000e+00 : f32
    %297 = vector.shape_cast %227 : vector<8x1xi1> to vector<8x1xi1>
    %298 = vector.broadcast %297 : vector<8x1xi1> to vector<8x64xi1>
    %299 = vector.broadcast %cst_95 : f32 to vector<8x64xf32>
    %300 = arith.select %298, %284, %299 : vector<8x64xi1>, vector<8x64xf32>
    %301 = arith.truncf %300 : vector<8x64xf32> to vector<8x64xbf16>
    %302 = arith.index_cast %c2_i32_74 : i32 to index
    %c0_96 = arith.constant 0 : index
    %c0_97 = arith.constant 0 : index
    %303 = vector.load %arg19[%302, %c0_96, %c0_97] : memref<8x8x64xbf16, #tpu.memory_space<vmem>>, vector<1x8x64xbf16>
    %304 = vector.shape_cast %303 : vector<1x8x64xbf16> to vector<8x64xbf16>
    %305 = vector.shape_cast %301 : vector<8x64xbf16> to vector<1x8x64xbf16>
    tpu.vector_store %arg19[%302, %c0_96, %c0_97], %305 {strides = array<i32>} : memref<8x8x64xbf16, #tpu.memory_space<vmem>>, vector<1x8x64xbf16>,
    %c3_i32 = arith.constant 3 : i32
    %306 = arith.index_cast %c3_i32 : i32 to index
    %c0_98 = arith.constant 0 : index
    %c0_99 = arith.constant 0 : index
    %307 = vector.load %arg4[%306, %c0_98, %c0_99] : memref<8x8x1xi32, #tpu.memory_space<vmem>>, vector<1x8x1xi32>
    %308 = vector.shape_cast %307 : vector<1x8x1xi32> to vector<8x1xi32>
    %c1_i32_100 = arith.constant 1 : i32
    %309 = vector.broadcast %c1_i32_100 : i32 to vector<8x1xi32>
    %310 = arith.andi %308, %309 : vector<8x1xi32>
    %c0_i32_101 = arith.constant 0 : i32
    %311 = vector.broadcast %c0_i32_101 : i32 to vector<8x1xi32>
    %312 = arith.cmpi sgt, %310, %311 : vector<8x1xi32>
    %c2_i32_102 = arith.constant 2 : i32
    %313 = vector.broadcast %c2_i32_102 : i32 to vector<8x1xi32>
    %314 = arith.andi %308, %313 : vector<8x1xi32>
    %c0_i32_103 = arith.constant 0 : i32
    %315 = vector.broadcast %c0_i32_103 : i32 to vector<8x1xi32>
    %316 = arith.cmpi sgt, %314, %315 : vector<8x1xi32>
    %c4_i32_104 = arith.constant 4 : i32
    %317 = vector.broadcast %c4_i32_104 : i32 to vector<8x1xi32>
    %318 = arith.andi %308, %317 : vector<8x1xi32>
    %c0_i32_105 = arith.constant 0 : i32
    %319 = vector.broadcast %c0_i32_105 : i32 to vector<8x1xi32>
    %320 = arith.cmpi sgt, %318, %319 : vector<8x1xi32>
    %321 = tpu.concatenate %278, %284 in 1 : vector<8x128xf32>, vector<8x64xf32> -> vector<8x192xf32>
    %322 = arith.truncf %321 : vector<8x192xf32> to vector<8x192xbf16>
    %c0_106 = arith.constant 0 : index
    %c0_107 = arith.constant 0 : index
    %323 = vector.load %arg9[%c0_106, %c0_107] : memref<192x768xbf16, #tpu.memory_space<vmem>>, vector<192x768xbf16>
    %cst_108 = arith.constant dense<0.000000e+00> : vector<8x768xf32>
    %324 = tpu.matmul %322, %323, %cst_108 {dimension_numbers = #tpu.dot_dimension_numbers<[1], [0], [0], [1], [0, 0, 1, 1], [], []>} : vector<8x192xbf16>, vector<192x768xbf16>, vector<8x768xf32> -> vector<8x768xf32>
    %325 = arith.index_cast %c3_i32 : i32 to index
    %c0_109 = arith.constant 0 : index
    %c0_110 = arith.constant 0 : index
    %326 = vector.load %arg16[%325, %c0_109, %c0_110] : memref<8x8x512xbf16, #tpu.memory_space<vmem>>, vector<1x8x512xbf16>
    %327 = vector.shape_cast %326 : vector<1x8x512xbf16> to vector<8x512xbf16>
    %328 = arith.extf %327 : vector<8x512xbf16> to vector<8x512xf32>
    %329 = vector.extract_strided_slice %324 {offsets = [0, 0], sizes = [8, 512], strides = [1, 1]} : vector<8x768xf32> to vector<8x512xf32>
    %330 = arith.addf %328, %329 : vector<8x512xf32>
    %331 = arith.index_cast %c3_i32 : i32 to index
    %c0_111 = arith.constant 0 : index
    %c0_112 = arith.constant 0 : index
    %332 = vector.load %arg17[%331, %c0_111, %c0_112] : memref<8x8x256xbf16, #tpu.memory_space<vmem>>, vector<1x8x256xbf16>
    %333 = vector.shape_cast %332 : vector<1x8x256xbf16> to vector<8x256xbf16>
    %334 = arith.extf %333 : vector<8x256xbf16> to vector<8x256xf32>
    %335 = vector.extract_strided_slice %324 {offsets = [0, 512], sizes = [8, 256], strides = [1, 1]} : vector<8x768xf32> to vector<8x256xf32>
    %336 = arith.addf %334, %335 : vector<8x256xf32>
    %337 = vector.extract_strided_slice %330 {offsets = [0, 0], sizes = [8, 384], strides = [1, 1]} : vector<8x512xf32> to vector<8x384xf32>
    %338 = arith.negf %337 : vector<8x384xf32>
    %339 = math.exp %338 : vector<8x384xf32>
    %cst_113 = arith.constant 1.000000e+00 : f32
    %340 = vector.broadcast %cst_113 : f32 to vector<8x384xf32>
    %341 = arith.addf %340, %339 : vector<8x384xf32>
    %342 = arith.divf %340, %341 : vector<8x384xf32>
    %343 = vector.extract_strided_slice %330 {offsets = [0, 384], sizes = [8, 128], strides = [1, 1]} : vector<8x512xf32> to vector<8x128xf32>
    %344 = math.tanh %343 : vector<8x128xf32>
    %345 = vector.extract_strided_slice %342 {offsets = [0, 0], sizes = [8, 128], strides = [1, 1]} : vector<8x384xf32> to vector<8x128xf32>
    %346 = vector.extract_strided_slice %342 {offsets = [0, 128], sizes = [8, 128], strides = [1, 1]} : vector<8x384xf32> to vector<8x128xf32>
    %347 = vector.extract_strided_slice %342 {offsets = [0, 256], sizes = [8, 128], strides = [1, 1]} : vector<8x384xf32> to vector<8x128xf32>
    %348 = arith.mulf %346, %281 : vector<8x128xf32>
    %349 = arith.mulf %345, %344 : vector<8x128xf32>
    %350 = arith.addf %348, %349 : vector<8x128xf32>
    %351 = math.tanh %350 : vector<8x128xf32>
    %352 = arith.mulf %347, %351 : vector<8x128xf32>
    %353 = vector.extract_strided_slice %336 {offsets = [0, 0], sizes = [8, 192], strides = [1, 1]} : vector<8x256xf32> to vector<8x192xf32>
    %354 = arith.negf %353 : vector<8x192xf32>
    %355 = math.exp %354 : vector<8x192xf32>
    %cst_114 = arith.constant 1.000000e+00 : f32
    %356 = vector.broadcast %cst_114 : f32 to vector<8x192xf32>
    %357 = arith.addf %356, %355 : vector<8x192xf32>
    %358 = arith.divf %356, %357 : vector<8x192xf32>
    %359 = vector.extract_strided_slice %336 {offsets = [0, 192], sizes = [8, 64], strides = [1, 1]} : vector<8x256xf32> to vector<8x64xf32>
    %360 = math.tanh %359 : vector<8x64xf32>
    %361 = vector.extract_strided_slice %358 {offsets = [0, 0], sizes = [8, 64], strides = [1, 1]} : vector<8x192xf32> to vector<8x64xf32>
    %362 = vector.extract_strided_slice %358 {offsets = [0, 64], sizes = [8, 64], strides = [1, 1]} : vector<8x192xf32> to vector<8x64xf32>
    %363 = vector.extract_strided_slice %358 {offsets = [0, 128], sizes = [8, 64], strides = [1, 1]} : vector<8x192xf32> to vector<8x64xf32>
    %364 = arith.mulf %362, %287 : vector<8x64xf32>
    %365 = arith.mulf %361, %360 : vector<8x64xf32>
    %366 = arith.addf %364, %365 : vector<8x64xf32>
    %367 = math.tanh %366 : vector<8x64xf32>
    %368 = arith.mulf %363, %367 : vector<8x64xf32>
    %369 = vector.shape_cast %312 : vector<8x1xi1> to vector<8x1xi1>
    %370 = vector.broadcast %369 : vector<8x1xi1> to vector<8x128xi1>
    %371 = arith.select %370, %352, %278 : vector<8x128xi1>, vector<8x128xf32>
    %372 = vector.shape_cast %312 : vector<8x1xi1> to vector<8x1xi1>
    %373 = vector.broadcast %372 : vector<8x1xi1> to vector<8x128xi1>
    %374 = arith.select %373, %350, %281 : vector<8x128xi1>, vector<8x128xf32>
    %375 = vector.shape_cast %316 : vector<8x1xi1> to vector<8x1xi1>
    %376 = vector.broadcast %375 : vector<8x1xi1> to vector<8x64xi1>
    %377 = arith.select %376, %368, %284 : vector<8x64xi1>, vector<8x64xf32>
    %378 = vector.shape_cast %316 : vector<8x1xi1> to vector<8x1xi1>
    %379 = vector.broadcast %378 : vector<8x1xi1> to vector<8x64xi1>
    %380 = arith.select %379, %366, %287 : vector<8x64xi1>, vector<8x64xf32>
    %cst_115 = arith.constant 0.000000e+00 : f32
    %381 = vector.shape_cast %320 : vector<8x1xi1> to vector<8x1xi1>
    %382 = vector.broadcast %381 : vector<8x1xi1> to vector<8x128xi1>
    %383 = vector.broadcast %cst_115 : f32 to vector<8x128xf32>
    %384 = arith.select %382, %371, %383 : vector<8x128xi1>, vector<8x128xf32>
    %385 = arith.truncf %384 : vector<8x128xf32> to vector<8x128xbf16>
    %386 = arith.index_cast %c3_i32 : i32 to index
    %c0_116 = arith.constant 0 : index
    %c0_117 = arith.constant 0 : index
    %387 = vector.load %arg18[%386, %c0_116, %c0_117] : memref<8x8x128xbf16, #tpu.memory_space<vmem>>, vector<1x8x128xbf16>
    %388 = vector.shape_cast %387 : vector<1x8x128xbf16> to vector<8x128xbf16>
    %389 = vector.shape_cast %385 : vector<8x128xbf16> to vector<1x8x128xbf16>
    tpu.vector_store %arg18[%386, %c0_116, %c0_117], %389 {strides = array<i32>} : memref<8x8x128xbf16, #tpu.memory_space<vmem>>, vector<1x8x128xbf16>,
    %cst_118 = arith.constant 0.000000e+00 : f32
    %390 = vector.shape_cast %320 : vector<8x1xi1> to vector<8x1xi1>
    %391 = vector.broadcast %390 : vector<8x1xi1> to vector<8x64xi1>
    %392 = vector.broadcast %cst_118 : f32 to vector<8x64xf32>
    %393 = arith.select %391, %377, %392 : vector<8x64xi1>, vector<8x64xf32>
    %394 = arith.truncf %393 : vector<8x64xf32> to vector<8x64xbf16>
    %395 = arith.index_cast %c3_i32 : i32 to index
    %c0_119 = arith.constant 0 : index
    %c0_120 = arith.constant 0 : index
    %396 = vector.load %arg19[%395, %c0_119, %c0_120] : memref<8x8x64xbf16, #tpu.memory_space<vmem>>, vector<1x8x64xbf16>
    %397 = vector.shape_cast %396 : vector<1x8x64xbf16> to vector<8x64xbf16>
    %398 = vector.shape_cast %394 : vector<8x64xbf16> to vector<1x8x64xbf16>
    tpu.vector_store %arg19[%395, %c0_119, %c0_120], %398 {strides = array<i32>} : memref<8x8x64xbf16, #tpu.memory_space<vmem>>, vector<1x8x64xbf16>,
    %c4_i32_121 = arith.constant 4 : i32
    %399 = arith.index_cast %c4_i32_121 : i32 to index
    %c0_122 = arith.constant 0 : index
    %c0_123 = arith.constant 0 : index
    %400 = vector.load %arg4[%399, %c0_122, %c0_123] : memref<8x8x1xi32, #tpu.memory_space<vmem>>, vector<1x8x1xi32>
    %401 = vector.shape_cast %400 : vector<1x8x1xi32> to vector<8x1xi32>
    %c1_i32_124 = arith.constant 1 : i32
    %402 = vector.broadcast %c1_i32_124 : i32 to vector<8x1xi32>
    %403 = arith.andi %401, %402 : vector<8x1xi32>
    %c0_i32_125 = arith.constant 0 : i32
    %404 = vector.broadcast %c0_i32_125 : i32 to vector<8x1xi32>
    %405 = arith.cmpi sgt, %403, %404 : vector<8x1xi32>
    %c2_i32_126 = arith.constant 2 : i32
    %406 = vector.broadcast %c2_i32_126 : i32 to vector<8x1xi32>
    %407 = arith.andi %401, %406 : vector<8x1xi32>
    %c0_i32_127 = arith.constant 0 : i32
    %408 = vector.broadcast %c0_i32_127 : i32 to vector<8x1xi32>
    %409 = arith.cmpi sgt, %407, %408 : vector<8x1xi32>
    %c4_i32_128 = arith.constant 4 : i32
    %410 = vector.broadcast %c4_i32_128 : i32 to vector<8x1xi32>
    %411 = arith.andi %401, %410 : vector<8x1xi32>
    %c0_i32_129 = arith.constant 0 : i32
    %412 = vector.broadcast %c0_i32_129 : i32 to vector<8x1xi32>
    %413 = arith.cmpi sgt, %411, %412 : vector<8x1xi32>
    %414 = tpu.concatenate %371, %377 in 1 : vector<8x128xf32>, vector<8x64xf32> -> vector<8x192xf32>
    %415 = arith.truncf %414 : vector<8x192xf32> to vector<8x192xbf16>
    %c0_130 = arith.constant 0 : index
    %c0_131 = arith.constant 0 : index
    %416 = vector.load %arg9[%c0_130, %c0_131] : memref<192x768xbf16, #tpu.memory_space<vmem>>, vector<192x768xbf16>
    %cst_132 = arith.constant dense<0.000000e+00> : vector<8x768xf32>
    %417 = tpu.matmul %415, %416, %cst_132 {dimension_numbers = #tpu.dot_dimension_numbers<[1], [0], [0], [1], [0, 0, 1, 1], [], []>} : vector<8x192xbf16>, vector<192x768xbf16>, vector<8x768xf32> -> vector<8x768xf32>
    %418 = arith.index_cast %c4_i32_121 : i32 to index
    %c0_133 = arith.constant 0 : index
    %c0_134 = arith.constant 0 : index
    %419 = vector.load %arg16[%418, %c0_133, %c0_134] : memref<8x8x512xbf16, #tpu.memory_space<vmem>>, vector<1x8x512xbf16>
    %420 = vector.shape_cast %419 : vector<1x8x512xbf16> to vector<8x512xbf16>
    %421 = arith.extf %420 : vector<8x512xbf16> to vector<8x512xf32>
    %422 = vector.extract_strided_slice %417 {offsets = [0, 0], sizes = [8, 512], strides = [1, 1]} : vector<8x768xf32> to vector<8x512xf32>
    %423 = arith.addf %421, %422 : vector<8x512xf32>
    %424 = arith.index_cast %c4_i32_121 : i32 to index
    %c0_135 = arith.constant 0 : index
    %c0_136 = arith.constant 0 : index
    %425 = vector.load %arg17[%424, %c0_135, %c0_136] : memref<8x8x256xbf16, #tpu.memory_space<vmem>>, vector<1x8x256xbf16>
    %426 = vector.shape_cast %425 : vector<1x8x256xbf16> to vector<8x256xbf16>
    %427 = arith.extf %426 : vector<8x256xbf16> to vector<8x256xf32>
    %428 = vector.extract_strided_slice %417 {offsets = [0, 512], sizes = [8, 256], strides = [1, 1]} : vector<8x768xf32> to vector<8x256xf32>
    %429 = arith.addf %427, %428 : vector<8x256xf32>
    %430 = vector.extract_strided_slice %423 {offsets = [0, 0], sizes = [8, 384], strides = [1, 1]} : vector<8x512xf32> to vector<8x384xf32>
    %431 = arith.negf %430 : vector<8x384xf32>
    %432 = math.exp %431 : vector<8x384xf32>
    %cst_137 = arith.constant 1.000000e+00 : f32
    %433 = vector.broadcast %cst_137 : f32 to vector<8x384xf32>
    %434 = arith.addf %433, %432 : vector<8x384xf32>
    %435 = arith.divf %433, %434 : vector<8x384xf32>
    %436 = vector.extract_strided_slice %423 {offsets = [0, 384], sizes = [8, 128], strides = [1, 1]} : vector<8x512xf32> to vector<8x128xf32>
    %437 = math.tanh %436 : vector<8x128xf32>
    %438 = vector.extract_strided_slice %435 {offsets = [0, 0], sizes = [8, 128], strides = [1, 1]} : vector<8x384xf32> to vector<8x128xf32>
    %439 = vector.extract_strided_slice %435 {offsets = [0, 128], sizes = [8, 128], strides = [1, 1]} : vector<8x384xf32> to vector<8x128xf32>
    %440 = vector.extract_strided_slice %435 {offsets = [0, 256], sizes = [8, 128], strides = [1, 1]} : vector<8x384xf32> to vector<8x128xf32>
    %441 = arith.mulf %439, %374 : vector<8x128xf32>
    %442 = arith.mulf %438, %437 : vector<8x128xf32>
    %443 = arith.addf %441, %442 : vector<8x128xf32>
    %444 = math.tanh %443 : vector<8x128xf32>
    %445 = arith.mulf %440, %444 : vector<8x128xf32>
    %446 = vector.extract_strided_slice %429 {offsets = [0, 0], sizes = [8, 192], strides = [1, 1]} : vector<8x256xf32> to vector<8x192xf32>
    %447 = arith.negf %446 : vector<8x192xf32>
    %448 = math.exp %447 : vector<8x192xf32>
    %cst_138 = arith.constant 1.000000e+00 : f32
    %449 = vector.broadcast %cst_138 : f32 to vector<8x192xf32>
    %450 = arith.addf %449, %448 : vector<8x192xf32>
    %451 = arith.divf %449, %450 : vector<8x192xf32>
    %452 = vector.extract_strided_slice %429 {offsets = [0, 192], sizes = [8, 64], strides = [1, 1]} : vector<8x256xf32> to vector<8x64xf32>
    %453 = math.tanh %452 : vector<8x64xf32>
    %454 = vector.extract_strided_slice %451 {offsets = [0, 0], sizes = [8, 64], strides = [1, 1]} : vector<8x192xf32> to vector<8x64xf32>
    %455 = vector.extract_strided_slice %451 {offsets = [0, 64], sizes = [8, 64], strides = [1, 1]} : vector<8x192xf32> to vector<8x64xf32>
    %456 = vector.extract_strided_slice %451 {offsets = [0, 128], sizes = [8, 64], strides = [1, 1]} : vector<8x192xf32> to vector<8x64xf32>
    %457 = arith.mulf %455, %380 : vector<8x64xf32>
    %458 = arith.mulf %454, %453 : vector<8x64xf32>
    %459 = arith.addf %457, %458 : vector<8x64xf32>
    %460 = math.tanh %459 : vector<8x64xf32>
    %461 = arith.mulf %456, %460 : vector<8x64xf32>
    %462 = vector.shape_cast %405 : vector<8x1xi1> to vector<8x1xi1>
    %463 = vector.broadcast %462 : vector<8x1xi1> to vector<8x128xi1>
    %464 = arith.select %463, %445, %371 : vector<8x128xi1>, vector<8x128xf32>
    %465 = vector.shape_cast %405 : vector<8x1xi1> to vector<8x1xi1>
    %466 = vector.broadcast %465 : vector<8x1xi1> to vector<8x128xi1>
    %467 = arith.select %466, %443, %374 : vector<8x128xi1>, vector<8x128xf32>
    %468 = vector.shape_cast %409 : vector<8x1xi1> to vector<8x1xi1>
    %469 = vector.broadcast %468 : vector<8x1xi1> to vector<8x64xi1>
    %470 = arith.select %469, %461, %377 : vector<8x64xi1>, vector<8x64xf32>
    %471 = vector.shape_cast %409 : vector<8x1xi1> to vector<8x1xi1>
    %472 = vector.broadcast %471 : vector<8x1xi1> to vector<8x64xi1>
    %473 = arith.select %472, %459, %380 : vector<8x64xi1>, vector<8x64xf32>
    %cst_139 = arith.constant 0.000000e+00 : f32
    %474 = vector.shape_cast %413 : vector<8x1xi1> to vector<8x1xi1>
    %475 = vector.broadcast %474 : vector<8x1xi1> to vector<8x128xi1>
    %476 = vector.broadcast %cst_139 : f32 to vector<8x128xf32>
    %477 = arith.select %475, %464, %476 : vector<8x128xi1>, vector<8x128xf32>
    %478 = arith.truncf %477 : vector<8x128xf32> to vector<8x128xbf16>
    %479 = arith.index_cast %c4_i32_121 : i32 to index
    %c0_140 = arith.constant 0 : index
    %c0_141 = arith.constant 0 : index
    %480 = vector.load %arg18[%479, %c0_140, %c0_141] : memref<8x8x128xbf16, #tpu.memory_space<vmem>>, vector<1x8x128xbf16>
    %481 = vector.shape_cast %480 : vector<1x8x128xbf16> to vector<8x128xbf16>
    %482 = vector.shape_cast %478 : vector<8x128xbf16> to vector<1x8x128xbf16>
    tpu.vector_store %arg18[%479, %c0_140, %c0_141], %482 {strides = array<i32>} : memref<8x8x128xbf16, #tpu.memory_space<vmem>>, vector<1x8x128xbf16>,
    %cst_142 = arith.constant 0.000000e+00 : f32
    %483 = vector.shape_cast %413 : vector<8x1xi1> to vector<8x1xi1>
    %484 = vector.broadcast %483 : vector<8x1xi1> to vector<8x64xi1>
    %485 = vector.broadcast %cst_142 : f32 to vector<8x64xf32>
    %486 = arith.select %484, %470, %485 : vector<8x64xi1>, vector<8x64xf32>
    %487 = arith.truncf %486 : vector<8x64xf32> to vector<8x64xbf16>
    %488 = arith.index_cast %c4_i32_121 : i32 to index
    %c0_143 = arith.constant 0 : index
    %c0_144 = arith.constant 0 : index
    %489 = vector.load %arg19[%488, %c0_143, %c0_144] : memref<8x8x64xbf16, #tpu.memory_space<vmem>>, vector<1x8x64xbf16>
    %490 = vector.shape_cast %489 : vector<1x8x64xbf16> to vector<8x64xbf16>
    %491 = vector.shape_cast %487 : vector<8x64xbf16> to vector<1x8x64xbf16>
    tpu.vector_store %arg19[%488, %c0_143, %c0_144], %491 {strides = array<i32>} : memref<8x8x64xbf16, #tpu.memory_space<vmem>>, vector<1x8x64xbf16>,
    %c5_i32 = arith.constant 5 : i32
    %492 = arith.index_cast %c5_i32 : i32 to index
    %c0_145 = arith.constant 0 : index
    %c0_146 = arith.constant 0 : index
    %493 = vector.load %arg4[%492, %c0_145, %c0_146] : memref<8x8x1xi32, #tpu.memory_space<vmem>>, vector<1x8x1xi32>
    %494 = vector.shape_cast %493 : vector<1x8x1xi32> to vector<8x1xi32>
    %c1_i32_147 = arith.constant 1 : i32
    %495 = vector.broadcast %c1_i32_147 : i32 to vector<8x1xi32>
    %496 = arith.andi %494, %495 : vector<8x1xi32>
    %c0_i32_148 = arith.constant 0 : i32
    %497 = vector.broadcast %c0_i32_148 : i32 to vector<8x1xi32>
    %498 = arith.cmpi sgt, %496, %497 : vector<8x1xi32>
    %c2_i32_149 = arith.constant 2 : i32
    %499 = vector.broadcast %c2_i32_149 : i32 to vector<8x1xi32>
    %500 = arith.andi %494, %499 : vector<8x1xi32>
    %c0_i32_150 = arith.constant 0 : i32
    %501 = vector.broadcast %c0_i32_150 : i32 to vector<8x1xi32>
    %502 = arith.cmpi sgt, %500, %501 : vector<8x1xi32>
    %c4_i32_151 = arith.constant 4 : i32
    %503 = vector.broadcast %c4_i32_151 : i32 to vector<8x1xi32>
    %504 = arith.andi %494, %503 : vector<8x1xi32>
    %c0_i32_152 = arith.constant 0 : i32
    %505 = vector.broadcast %c0_i32_152 : i32 to vector<8x1xi32>
    %506 = arith.cmpi sgt, %504, %505 : vector<8x1xi32>
    %507 = tpu.concatenate %464, %470 in 1 : vector<8x128xf32>, vector<8x64xf32> -> vector<8x192xf32>
    %508 = arith.truncf %507 : vector<8x192xf32> to vector<8x192xbf16>
    %c0_153 = arith.constant 0 : index
    %c0_154 = arith.constant 0 : index
    %509 = vector.load %arg9[%c0_153, %c0_154] : memref<192x768xbf16, #tpu.memory_space<vmem>>, vector<192x768xbf16>
    %cst_155 = arith.constant dense<0.000000e+00> : vector<8x768xf32>
    %510 = tpu.matmul %508, %509, %cst_155 {dimension_numbers = #tpu.dot_dimension_numbers<[1], [0], [0], [1], [0, 0, 1, 1], [], []>} : vector<8x192xbf16>, vector<192x768xbf16>, vector<8x768xf32> -> vector<8x768xf32>
    %511 = arith.index_cast %c5_i32 : i32 to index
    %c0_156 = arith.constant 0 : index
    %c0_157 = arith.constant 0 : index
    %512 = vector.load %arg16[%511, %c0_156, %c0_157] : memref<8x8x512xbf16, #tpu.memory_space<vmem>>, vector<1x8x512xbf16>
    %513 = vector.shape_cast %512 : vector<1x8x512xbf16> to vector<8x512xbf16>
    %514 = arith.extf %513 : vector<8x512xbf16> to vector<8x512xf32>
    %515 = vector.extract_strided_slice %510 {offsets = [0, 0], sizes = [8, 512], strides = [1, 1]} : vector<8x768xf32> to vector<8x512xf32>
    %516 = arith.addf %514, %515 : vector<8x512xf32>
    %517 = arith.index_cast %c5_i32 : i32 to index
    %c0_158 = arith.constant 0 : index
    %c0_159 = arith.constant 0 : index
    %518 = vector.load %arg17[%517, %c0_158, %c0_159] : memref<8x8x256xbf16, #tpu.memory_space<vmem>>, vector<1x8x256xbf16>
    %519 = vector.shape_cast %518 : vector<1x8x256xbf16> to vector<8x256xbf16>
    %520 = arith.extf %519 : vector<8x256xbf16> to vector<8x256xf32>
    %521 = vector.extract_strided_slice %510 {offsets = [0, 512], sizes = [8, 256], strides = [1, 1]} : vector<8x768xf32> to vector<8x256xf32>
    %522 = arith.addf %520, %521 : vector<8x256xf32>
    %523 = vector.extract_strided_slice %516 {offsets = [0, 0], sizes = [8, 384], strides = [1, 1]} : vector<8x512xf32> to vector<8x384xf32>
    %524 = arith.negf %523 : vector<8x384xf32>
    %525 = math.exp %524 : vector<8x384xf32>
    %cst_160 = arith.constant 1.000000e+00 : f32
    %526 = vector.broadcast %cst_160 : f32 to vector<8x384xf32>
    %527 = arith.addf %526, %525 : vector<8x384xf32>
    %528 = arith.divf %526, %527 : vector<8x384xf32>
    %529 = vector.extract_strided_slice %516 {offsets = [0, 384], sizes = [8, 128], strides = [1, 1]} : vector<8x512xf32> to vector<8x128xf32>
    %530 = math.tanh %529 : vector<8x128xf32>
    %531 = vector.extract_strided_slice %528 {offsets = [0, 0], sizes = [8, 128], strides = [1, 1]} : vector<8x384xf32> to vector<8x128xf32>
    %532 = vector.extract_strided_slice %528 {offsets = [0, 128], sizes = [8, 128], strides = [1, 1]} : vector<8x384xf32> to vector<8x128xf32>
    %533 = vector.extract_strided_slice %528 {offsets = [0, 256], sizes = [8, 128], strides = [1, 1]} : vector<8x384xf32> to vector<8x128xf32>
    %534 = arith.mulf %532, %467 : vector<8x128xf32>
    %535 = arith.mulf %531, %530 : vector<8x128xf32>
    %536 = arith.addf %534, %535 : vector<8x128xf32>
    %537 = math.tanh %536 : vector<8x128xf32>
    %538 = arith.mulf %533, %537 : vector<8x128xf32>
    %539 = vector.extract_strided_slice %522 {offsets = [0, 0], sizes = [8, 192], strides = [1, 1]} : vector<8x256xf32> to vector<8x192xf32>
    %540 = arith.negf %539 : vector<8x192xf32>
    %541 = math.exp %540 : vector<8x192xf32>
    %cst_161 = arith.constant 1.000000e+00 : f32
    %542 = vector.broadcast %cst_161 : f32 to vector<8x192xf32>
    %543 = arith.addf %542, %541 : vector<8x192xf32>
    %544 = arith.divf %542, %543 : vector<8x192xf32>
    %545 = vector.extract_strided_slice %522 {offsets = [0, 192], sizes = [8, 64], strides = [1, 1]} : vector<8x256xf32> to vector<8x64xf32>
    %546 = math.tanh %545 : vector<8x64xf32>
    %547 = vector.extract_strided_slice %544 {offsets = [0, 0], sizes = [8, 64], strides = [1, 1]} : vector<8x192xf32> to vector<8x64xf32>
    %548 = vector.extract_strided_slice %544 {offsets = [0, 64], sizes = [8, 64], strides = [1, 1]} : vector<8x192xf32> to vector<8x64xf32>
    %549 = vector.extract_strided_slice %544 {offsets = [0, 128], sizes = [8, 64], strides = [1, 1]} : vector<8x192xf32> to vector<8x64xf32>
    %550 = arith.mulf %548, %473 : vector<8x64xf32>
    %551 = arith.mulf %547, %546 : vector<8x64xf32>
    %552 = arith.addf %550, %551 : vector<8x64xf32>
    %553 = math.tanh %552 : vector<8x64xf32>
    %554 = arith.mulf %549, %553 : vector<8x64xf32>
    %555 = vector.shape_cast %498 : vector<8x1xi1> to vector<8x1xi1>
    %556 = vector.broadcast %555 : vector<8x1xi1> to vector<8x128xi1>
    %557 = arith.select %556, %538, %464 : vector<8x128xi1>, vector<8x128xf32>
    %558 = vector.shape_cast %498 : vector<8x1xi1> to vector<8x1xi1>
    %559 = vector.broadcast %558 : vector<8x1xi1> to vector<8x128xi1>
    %560 = arith.select %559, %536, %467 : vector<8x128xi1>, vector<8x128xf32>
    %561 = vector.shape_cast %502 : vector<8x1xi1> to vector<8x1xi1>
    %562 = vector.broadcast %561 : vector<8x1xi1> to vector<8x64xi1>
    %563 = arith.select %562, %554, %470 : vector<8x64xi1>, vector<8x64xf32>
    %564 = vector.shape_cast %502 : vector<8x1xi1> to vector<8x1xi1>
    %565 = vector.broadcast %564 : vector<8x1xi1> to vector<8x64xi1>
    %566 = arith.select %565, %552, %473 : vector<8x64xi1>, vector<8x64xf32>
    %cst_162 = arith.constant 0.000000e+00 : f32
    %567 = vector.shape_cast %506 : vector<8x1xi1> to vector<8x1xi1>
    %568 = vector.broadcast %567 : vector<8x1xi1> to vector<8x128xi1>
    %569 = vector.broadcast %cst_162 : f32 to vector<8x128xf32>
    %570 = arith.select %568, %557, %569 : vector<8x128xi1>, vector<8x128xf32>
    %571 = arith.truncf %570 : vector<8x128xf32> to vector<8x128xbf16>
    %572 = arith.index_cast %c5_i32 : i32 to index
    %c0_163 = arith.constant 0 : index
    %c0_164 = arith.constant 0 : index
    %573 = vector.load %arg18[%572, %c0_163, %c0_164] : memref<8x8x128xbf16, #tpu.memory_space<vmem>>, vector<1x8x128xbf16>
    %574 = vector.shape_cast %573 : vector<1x8x128xbf16> to vector<8x128xbf16>
    %575 = vector.shape_cast %571 : vector<8x128xbf16> to vector<1x8x128xbf16>
    tpu.vector_store %arg18[%572, %c0_163, %c0_164], %575 {strides = array<i32>} : memref<8x8x128xbf16, #tpu.memory_space<vmem>>, vector<1x8x128xbf16>,
    %cst_165 = arith.constant 0.000000e+00 : f32
    %576 = vector.shape_cast %506 : vector<8x1xi1> to vector<8x1xi1>
    %577 = vector.broadcast %576 : vector<8x1xi1> to vector<8x64xi1>
    %578 = vector.broadcast %cst_165 : f32 to vector<8x64xf32>
    %579 = arith.select %577, %563, %578 : vector<8x64xi1>, vector<8x64xf32>
    %580 = arith.truncf %579 : vector<8x64xf32> to vector<8x64xbf16>
    %581 = arith.index_cast %c5_i32 : i32 to index
    %c0_166 = arith.constant 0 : index
    %c0_167 = arith.constant 0 : index
    %582 = vector.load %arg19[%581, %c0_166, %c0_167] : memref<8x8x64xbf16, #tpu.memory_space<vmem>>, vector<1x8x64xbf16>
    %583 = vector.shape_cast %582 : vector<1x8x64xbf16> to vector<8x64xbf16>
    %584 = vector.shape_cast %580 : vector<8x64xbf16> to vector<1x8x64xbf16>
    tpu.vector_store %arg19[%581, %c0_166, %c0_167], %584 {strides = array<i32>} : memref<8x8x64xbf16, #tpu.memory_space<vmem>>, vector<1x8x64xbf16>,
    %c6_i32 = arith.constant 6 : i32
    %585 = arith.index_cast %c6_i32 : i32 to index
    %c0_168 = arith.constant 0 : index
    %c0_169 = arith.constant 0 : index
    %586 = vector.load %arg4[%585, %c0_168, %c0_169] : memref<8x8x1xi32, #tpu.memory_space<vmem>>, vector<1x8x1xi32>
    %587 = vector.shape_cast %586 : vector<1x8x1xi32> to vector<8x1xi32>
    %c1_i32_170 = arith.constant 1 : i32
    %588 = vector.broadcast %c1_i32_170 : i32 to vector<8x1xi32>
    %589 = arith.andi %587, %588 : vector<8x1xi32>
    %c0_i32_171 = arith.constant 0 : i32
    %590 = vector.broadcast %c0_i32_171 : i32 to vector<8x1xi32>
    %591 = arith.cmpi sgt, %589, %590 : vector<8x1xi32>
    %c2_i32_172 = arith.constant 2 : i32
    %592 = vector.broadcast %c2_i32_172 : i32 to vector<8x1xi32>
    %593 = arith.andi %587, %592 : vector<8x1xi32>
    %c0_i32_173 = arith.constant 0 : i32
    %594 = vector.broadcast %c0_i32_173 : i32 to vector<8x1xi32>
    %595 = arith.cmpi sgt, %593, %594 : vector<8x1xi32>
    %c4_i32_174 = arith.constant 4 : i32
    %596 = vector.broadcast %c4_i32_174 : i32 to vector<8x1xi32>
    %597 = arith.andi %587, %596 : vector<8x1xi32>
    %c0_i32_175 = arith.constant 0 : i32
    %598 = vector.broadcast %c0_i32_175 : i32 to vector<8x1xi32>
    %599 = arith.cmpi sgt, %597, %598 : vector<8x1xi32>
    %600 = tpu.concatenate %557, %563 in 1 : vector<8x128xf32>, vector<8x64xf32> -> vector<8x192xf32>
    %601 = arith.truncf %600 : vector<8x192xf32> to vector<8x192xbf16>
    %c0_176 = arith.constant 0 : index
    %c0_177 = arith.constant 0 : index
    %602 = vector.load %arg9[%c0_176, %c0_177] : memref<192x768xbf16, #tpu.memory_space<vmem>>, vector<192x768xbf16>
    %cst_178 = arith.constant dense<0.000000e+00> : vector<8x768xf32>
    %603 = tpu.matmul %601, %602, %cst_178 {dimension_numbers = #tpu.dot_dimension_numbers<[1], [0], [0], [1], [0, 0, 1, 1], [], []>} : vector<8x192xbf16>, vector<192x768xbf16>, vector<8x768xf32> -> vector<8x768xf32>
    %604 = arith.index_cast %c6_i32 : i32 to index
    %c0_179 = arith.constant 0 : index
    %c0_180 = arith.constant 0 : index
    %605 = vector.load %arg16[%604, %c0_179, %c0_180] : memref<8x8x512xbf16, #tpu.memory_space<vmem>>, vector<1x8x512xbf16>
    %606 = vector.shape_cast %605 : vector<1x8x512xbf16> to vector<8x512xbf16>
    %607 = arith.extf %606 : vector<8x512xbf16> to vector<8x512xf32>
    %608 = vector.extract_strided_slice %603 {offsets = [0, 0], sizes = [8, 512], strides = [1, 1]} : vector<8x768xf32> to vector<8x512xf32>
    %609 = arith.addf %607, %608 : vector<8x512xf32>
    %610 = arith.index_cast %c6_i32 : i32 to index
    %c0_181 = arith.constant 0 : index
    %c0_182 = arith.constant 0 : index
    %611 = vector.load %arg17[%610, %c0_181, %c0_182] : memref<8x8x256xbf16, #tpu.memory_space<vmem>>, vector<1x8x256xbf16>
    %612 = vector.shape_cast %611 : vector<1x8x256xbf16> to vector<8x256xbf16>
    %613 = arith.extf %612 : vector<8x256xbf16> to vector<8x256xf32>
    %614 = vector.extract_strided_slice %603 {offsets = [0, 512], sizes = [8, 256], strides = [1, 1]} : vector<8x768xf32> to vector<8x256xf32>
    %615 = arith.addf %613, %614 : vector<8x256xf32>
    %616 = vector.extract_strided_slice %609 {offsets = [0, 0], sizes = [8, 384], strides = [1, 1]} : vector<8x512xf32> to vector<8x384xf32>
    %617 = arith.negf %616 : vector<8x384xf32>
    %618 = math.exp %617 : vector<8x384xf32>
    %cst_183 = arith.constant 1.000000e+00 : f32
    %619 = vector.broadcast %cst_183 : f32 to vector<8x384xf32>
    %620 = arith.addf %619, %618 : vector<8x384xf32>
    %621 = arith.divf %619, %620 : vector<8x384xf32>
    %622 = vector.extract_strided_slice %609 {offsets = [0, 384], sizes = [8, 128], strides = [1, 1]} : vector<8x512xf32> to vector<8x128xf32>
    %623 = math.tanh %622 : vector<8x128xf32>
    %624 = vector.extract_strided_slice %621 {offsets = [0, 0], sizes = [8, 128], strides = [1, 1]} : vector<8x384xf32> to vector<8x128xf32>
    %625 = vector.extract_strided_slice %621 {offsets = [0, 128], sizes = [8, 128], strides = [1, 1]} : vector<8x384xf32> to vector<8x128xf32>
    %626 = vector.extract_strided_slice %621 {offsets = [0, 256], sizes = [8, 128], strides = [1, 1]} : vector<8x384xf32> to vector<8x128xf32>
    %627 = arith.mulf %625, %560 : vector<8x128xf32>
    %628 = arith.mulf %624, %623 : vector<8x128xf32>
    %629 = arith.addf %627, %628 : vector<8x128xf32>
    %630 = math.tanh %629 : vector<8x128xf32>
    %631 = arith.mulf %626, %630 : vector<8x128xf32>
    %632 = vector.extract_strided_slice %615 {offsets = [0, 0], sizes = [8, 192], strides = [1, 1]} : vector<8x256xf32> to vector<8x192xf32>
    %633 = arith.negf %632 : vector<8x192xf32>
    %634 = math.exp %633 : vector<8x192xf32>
    %cst_184 = arith.constant 1.000000e+00 : f32
    %635 = vector.broadcast %cst_184 : f32 to vector<8x192xf32>
    %636 = arith.addf %635, %634 : vector<8x192xf32>
    %637 = arith.divf %635, %636 : vector<8x192xf32>
    %638 = vector.extract_strided_slice %615 {offsets = [0, 192], sizes = [8, 64], strides = [1, 1]} : vector<8x256xf32> to vector<8x64xf32>
    %639 = math.tanh %638 : vector<8x64xf32>
    %640 = vector.extract_strided_slice %637 {offsets = [0, 0], sizes = [8, 64], strides = [1, 1]} : vector<8x192xf32> to vector<8x64xf32>
    %641 = vector.extract_strided_slice %637 {offsets = [0, 64], sizes = [8, 64], strides = [1, 1]} : vector<8x192xf32> to vector<8x64xf32>
    %642 = vector.extract_strided_slice %637 {offsets = [0, 128], sizes = [8, 64], strides = [1, 1]} : vector<8x192xf32> to vector<8x64xf32>
    %643 = arith.mulf %641, %566 : vector<8x64xf32>
    %644 = arith.mulf %640, %639 : vector<8x64xf32>
    %645 = arith.addf %643, %644 : vector<8x64xf32>
    %646 = math.tanh %645 : vector<8x64xf32>
    %647 = arith.mulf %642, %646 : vector<8x64xf32>
    %648 = vector.shape_cast %591 : vector<8x1xi1> to vector<8x1xi1>
    %649 = vector.broadcast %648 : vector<8x1xi1> to vector<8x128xi1>
    %650 = arith.select %649, %631, %557 : vector<8x128xi1>, vector<8x128xf32>
    %651 = vector.shape_cast %591 : vector<8x1xi1> to vector<8x1xi1>
    %652 = vector.broadcast %651 : vector<8x1xi1> to vector<8x128xi1>
    %653 = arith.select %652, %629, %560 : vector<8x128xi1>, vector<8x128xf32>
    %654 = vector.shape_cast %595 : vector<8x1xi1> to vector<8x1xi1>
    %655 = vector.broadcast %654 : vector<8x1xi1> to vector<8x64xi1>
    %656 = arith.select %655, %647, %563 : vector<8x64xi1>, vector<8x64xf32>
    %657 = vector.shape_cast %595 : vector<8x1xi1> to vector<8x1xi1>
    %658 = vector.broadcast %657 : vector<8x1xi1> to vector<8x64xi1>
    %659 = arith.select %658, %645, %566 : vector<8x64xi1>, vector<8x64xf32>
    %cst_185 = arith.constant 0.000000e+00 : f32
    %660 = vector.shape_cast %599 : vector<8x1xi1> to vector<8x1xi1>
    %661 = vector.broadcast %660 : vector<8x1xi1> to vector<8x128xi1>
    %662 = vector.broadcast %cst_185 : f32 to vector<8x128xf32>
    %663 = arith.select %661, %650, %662 : vector<8x128xi1>, vector<8x128xf32>
    %664 = arith.truncf %663 : vector<8x128xf32> to vector<8x128xbf16>
    %665 = arith.index_cast %c6_i32 : i32 to index
    %c0_186 = arith.constant 0 : index
    %c0_187 = arith.constant 0 : index
    %666 = vector.load %arg18[%665, %c0_186, %c0_187] : memref<8x8x128xbf16, #tpu.memory_space<vmem>>, vector<1x8x128xbf16>
    %667 = vector.shape_cast %666 : vector<1x8x128xbf16> to vector<8x128xbf16>
    %668 = vector.shape_cast %664 : vector<8x128xbf16> to vector<1x8x128xbf16>
    tpu.vector_store %arg18[%665, %c0_186, %c0_187], %668 {strides = array<i32>} : memref<8x8x128xbf16, #tpu.memory_space<vmem>>, vector<1x8x128xbf16>,
    %cst_188 = arith.constant 0.000000e+00 : f32
    %669 = vector.shape_cast %599 : vector<8x1xi1> to vector<8x1xi1>
    %670 = vector.broadcast %669 : vector<8x1xi1> to vector<8x64xi1>
    %671 = vector.broadcast %cst_188 : f32 to vector<8x64xf32>
    %672 = arith.select %670, %656, %671 : vector<8x64xi1>, vector<8x64xf32>
    %673 = arith.truncf %672 : vector<8x64xf32> to vector<8x64xbf16>
    %674 = arith.index_cast %c6_i32 : i32 to index
    %c0_189 = arith.constant 0 : index
    %c0_190 = arith.constant 0 : index
    %675 = vector.load %arg19[%674, %c0_189, %c0_190] : memref<8x8x64xbf16, #tpu.memory_space<vmem>>, vector<1x8x64xbf16>
    %676 = vector.shape_cast %675 : vector<1x8x64xbf16> to vector<8x64xbf16>
    %677 = vector.shape_cast %673 : vector<8x64xbf16> to vector<1x8x64xbf16>
    tpu.vector_store %arg19[%674, %c0_189, %c0_190], %677 {strides = array<i32>} : memref<8x8x64xbf16, #tpu.memory_space<vmem>>, vector<1x8x64xbf16>,
    %c7_i32 = arith.constant 7 : i32
    %678 = arith.index_cast %c7_i32 : i32 to index
    %c0_191 = arith.constant 0 : index
    %c0_192 = arith.constant 0 : index
    %679 = vector.load %arg4[%678, %c0_191, %c0_192] : memref<8x8x1xi32, #tpu.memory_space<vmem>>, vector<1x8x1xi32>
    %680 = vector.shape_cast %679 : vector<1x8x1xi32> to vector<8x1xi32>
    %c1_i32_193 = arith.constant 1 : i32
    %681 = vector.broadcast %c1_i32_193 : i32 to vector<8x1xi32>
    %682 = arith.andi %680, %681 : vector<8x1xi32>
    %c0_i32_194 = arith.constant 0 : i32
    %683 = vector.broadcast %c0_i32_194 : i32 to vector<8x1xi32>
    %684 = arith.cmpi sgt, %682, %683 : vector<8x1xi32>
    %c2_i32_195 = arith.constant 2 : i32
    %685 = vector.broadcast %c2_i32_195 : i32 to vector<8x1xi32>
    %686 = arith.andi %680, %685 : vector<8x1xi32>
    %c0_i32_196 = arith.constant 0 : i32
    %687 = vector.broadcast %c0_i32_196 : i32 to vector<8x1xi32>
    %688 = arith.cmpi sgt, %686, %687 : vector<8x1xi32>
    %c4_i32_197 = arith.constant 4 : i32
    %689 = vector.broadcast %c4_i32_197 : i32 to vector<8x1xi32>
    %690 = arith.andi %680, %689 : vector<8x1xi32>
    %c0_i32_198 = arith.constant 0 : i32
    %691 = vector.broadcast %c0_i32_198 : i32 to vector<8x1xi32>
    %692 = arith.cmpi sgt, %690, %691 : vector<8x1xi32>
    %693 = tpu.concatenate %650, %656 in 1 : vector<8x128xf32>, vector<8x64xf32> -> vector<8x192xf32>
    %694 = arith.truncf %693 : vector<8x192xf32> to vector<8x192xbf16>
    %c0_199 = arith.constant 0 : index
    %c0_200 = arith.constant 0 : index
    %695 = vector.load %arg9[%c0_199, %c0_200] : memref<192x768xbf16, #tpu.memory_space<vmem>>, vector<192x768xbf16>
    %cst_201 = arith.constant dense<0.000000e+00> : vector<8x768xf32>
    %696 = tpu.matmul %694, %695, %cst_201 {dimension_numbers = #tpu.dot_dimension_numbers<[1], [0], [0], [1], [0, 0, 1, 1], [], []>} : vector<8x192xbf16>, vector<192x768xbf16>, vector<8x768xf32> -> vector<8x768xf32>
    %697 = arith.index_cast %c7_i32 : i32 to index
    %c0_202 = arith.constant 0 : index
    %c0_203 = arith.constant 0 : index
    %698 = vector.load %arg16[%697, %c0_202, %c0_203] : memref<8x8x512xbf16, #tpu.memory_space<vmem>>, vector<1x8x512xbf16>
    %699 = vector.shape_cast %698 : vector<1x8x512xbf16> to vector<8x512xbf16>
    %700 = arith.extf %699 : vector<8x512xbf16> to vector<8x512xf32>
    %701 = vector.extract_strided_slice %696 {offsets = [0, 0], sizes = [8, 512], strides = [1, 1]} : vector<8x768xf32> to vector<8x512xf32>
    %702 = arith.addf %700, %701 : vector<8x512xf32>
    %703 = arith.index_cast %c7_i32 : i32 to index
    %c0_204 = arith.constant 0 : index
    %c0_205 = arith.constant 0 : index
    %704 = vector.load %arg17[%703, %c0_204, %c0_205] : memref<8x8x256xbf16, #tpu.memory_space<vmem>>, vector<1x8x256xbf16>
    %705 = vector.shape_cast %704 : vector<1x8x256xbf16> to vector<8x256xbf16>
    %706 = arith.extf %705 : vector<8x256xbf16> to vector<8x256xf32>
    %707 = vector.extract_strided_slice %696 {offsets = [0, 512], sizes = [8, 256], strides = [1, 1]} : vector<8x768xf32> to vector<8x256xf32>
    %708 = arith.addf %706, %707 : vector<8x256xf32>
    %709 = vector.extract_strided_slice %702 {offsets = [0, 0], sizes = [8, 384], strides = [1, 1]} : vector<8x512xf32> to vector<8x384xf32>
    %710 = arith.negf %709 : vector<8x384xf32>
    %711 = math.exp %710 : vector<8x384xf32>
    %cst_206 = arith.constant 1.000000e+00 : f32
    %712 = vector.broadcast %cst_206 : f32 to vector<8x384xf32>
    %713 = arith.addf %712, %711 : vector<8x384xf32>
    %714 = arith.divf %712, %713 : vector<8x384xf32>
    %715 = vector.extract_strided_slice %702 {offsets = [0, 384], sizes = [8, 128], strides = [1, 1]} : vector<8x512xf32> to vector<8x128xf32>
    %716 = math.tanh %715 : vector<8x128xf32>
    %717 = vector.extract_strided_slice %714 {offsets = [0, 0], sizes = [8, 128], strides = [1, 1]} : vector<8x384xf32> to vector<8x128xf32>
    %718 = vector.extract_strided_slice %714 {offsets = [0, 128], sizes = [8, 128], strides = [1, 1]} : vector<8x384xf32> to vector<8x128xf32>
    %719 = vector.extract_strided_slice %714 {offsets = [0, 256], sizes = [8, 128], strides = [1, 1]} : vector<8x384xf32> to vector<8x128xf32>
    %720 = arith.mulf %718, %653 : vector<8x128xf32>
    %721 = arith.mulf %717, %716 : vector<8x128xf32>
    %722 = arith.addf %720, %721 : vector<8x128xf32>
    %723 = math.tanh %722 : vector<8x128xf32>
    %724 = arith.mulf %719, %723 : vector<8x128xf32>
    %725 = vector.extract_strided_slice %708 {offsets = [0, 0], sizes = [8, 192], strides = [1, 1]} : vector<8x256xf32> to vector<8x192xf32>
    %726 = arith.negf %725 : vector<8x192xf32>
    %727 = math.exp %726 : vector<8x192xf32>
    %cst_207 = arith.constant 1.000000e+00 : f32
    %728 = vector.broadcast %cst_207 : f32 to vector<8x192xf32>
    %729 = arith.addf %728, %727 : vector<8x192xf32>
    %730 = arith.divf %728, %729 : vector<8x192xf32>
    %731 = vector.extract_strided_slice %708 {offsets = [0, 192], sizes = [8, 64], strides = [1, 1]} : vector<8x256xf32> to vector<8x64xf32>
    %732 = math.tanh %731 : vector<8x64xf32>
    %733 = vector.extract_strided_slice %730 {offsets = [0, 0], sizes = [8, 64], strides = [1, 1]} : vector<8x192xf32> to vector<8x64xf32>
    %734 = vector.extract_strided_slice %730 {offsets = [0, 64], sizes = [8, 64], strides = [1, 1]} : vector<8x192xf32> to vector<8x64xf32>
    %735 = vector.extract_strided_slice %730 {offsets = [0, 128], sizes = [8, 64], strides = [1, 1]} : vector<8x192xf32> to vector<8x64xf32>
    %736 = arith.mulf %734, %659 : vector<8x64xf32>
    %737 = arith.mulf %733, %732 : vector<8x64xf32>
    %738 = arith.addf %736, %737 : vector<8x64xf32>
    %739 = math.tanh %738 : vector<8x64xf32>
    %740 = arith.mulf %735, %739 : vector<8x64xf32>
    %741 = vector.shape_cast %684 : vector<8x1xi1> to vector<8x1xi1>
    %742 = vector.broadcast %741 : vector<8x1xi1> to vector<8x128xi1>
    %743 = arith.select %742, %724, %650 : vector<8x128xi1>, vector<8x128xf32>
    %744 = vector.shape_cast %684 : vector<8x1xi1> to vector<8x1xi1>
    %745 = vector.broadcast %744 : vector<8x1xi1> to vector<8x128xi1>
    %746 = arith.select %745, %722, %653 : vector<8x128xi1>, vector<8x128xf32>
    %747 = vector.shape_cast %688 : vector<8x1xi1> to vector<8x1xi1>
    %748 = vector.broadcast %747 : vector<8x1xi1> to vector<8x64xi1>
    %749 = arith.select %748, %740, %656 : vector<8x64xi1>, vector<8x64xf32>
    %750 = vector.shape_cast %688 : vector<8x1xi1> to vector<8x1xi1>
    %751 = vector.broadcast %750 : vector<8x1xi1> to vector<8x64xi1>
    %752 = arith.select %751, %738, %659 : vector<8x64xi1>, vector<8x64xf32>
    %cst_208 = arith.constant 0.000000e+00 : f32
    %753 = vector.shape_cast %692 : vector<8x1xi1> to vector<8x1xi1>
    %754 = vector.broadcast %753 : vector<8x1xi1> to vector<8x128xi1>
    %755 = vector.broadcast %cst_208 : f32 to vector<8x128xf32>
    %756 = arith.select %754, %743, %755 : vector<8x128xi1>, vector<8x128xf32>
    %757 = arith.truncf %756 : vector<8x128xf32> to vector<8x128xbf16>
    %758 = arith.index_cast %c7_i32 : i32 to index
    %c0_209 = arith.constant 0 : index
    %c0_210 = arith.constant 0 : index
    %759 = vector.load %arg18[%758, %c0_209, %c0_210] : memref<8x8x128xbf16, #tpu.memory_space<vmem>>, vector<1x8x128xbf16>
    %760 = vector.shape_cast %759 : vector<1x8x128xbf16> to vector<8x128xbf16>
    %761 = vector.shape_cast %757 : vector<8x128xbf16> to vector<1x8x128xbf16>
    tpu.vector_store %arg18[%758, %c0_209, %c0_210], %761 {strides = array<i32>} : memref<8x8x128xbf16, #tpu.memory_space<vmem>>, vector<1x8x128xbf16>,
    %cst_211 = arith.constant 0.000000e+00 : f32
    %762 = vector.shape_cast %692 : vector<8x1xi1> to vector<8x1xi1>
    %763 = vector.broadcast %762 : vector<8x1xi1> to vector<8x64xi1>
    %764 = vector.broadcast %cst_211 : f32 to vector<8x64xf32>
    %765 = arith.select %763, %749, %764 : vector<8x64xi1>, vector<8x64xf32>
    %766 = arith.truncf %765 : vector<8x64xf32> to vector<8x64xbf16>
    %767 = arith.index_cast %c7_i32 : i32 to index
    %c0_212 = arith.constant 0 : index
    %c0_213 = arith.constant 0 : index
    %768 = vector.load %arg19[%767, %c0_212, %c0_213] : memref<8x8x64xbf16, #tpu.memory_space<vmem>>, vector<1x8x64xbf16>
    %769 = vector.shape_cast %768 : vector<1x8x64xbf16> to vector<8x64xbf16>
    %770 = vector.shape_cast %766 : vector<8x64xbf16> to vector<1x8x64xbf16>
    tpu.vector_store %arg19[%767, %c0_212, %c0_213], %770 {strides = array<i32>} : memref<8x8x64xbf16, #tpu.memory_space<vmem>>, vector<1x8x64xbf16>,
    %c8_i32 = arith.constant 8 : i32
    %c0_214 = arith.constant 0 : index
    %c0_215 = arith.constant 0 : index
    %771 = vector.load %arg20[%c0_214, %c0_215] : memref<8x128xf32, #tpu.memory_space<vmem>>, vector<8x128xf32>
    tpu.vector_store %arg20[%c0_214, %c0_215], %743 {strides = array<i32>} : memref<8x128xf32, #tpu.memory_space<vmem>>, vector<8x128xf32>,
    %c0_216 = arith.constant 0 : index
    %c0_217 = arith.constant 0 : index
    %772 = vector.load %arg21[%c0_216, %c0_217] : memref<8x128xf32, #tpu.memory_space<vmem>>, vector<8x128xf32>
    tpu.vector_store %arg21[%c0_216, %c0_217], %746 {strides = array<i32>} : memref<8x128xf32, #tpu.memory_space<vmem>>, vector<8x128xf32>,
    %c0_218 = arith.constant 0 : index
    %c0_219 = arith.constant 0 : index
    %773 = vector.load %arg22[%c0_218, %c0_219] : memref<8x64xf32, #tpu.memory_space<vmem>>, vector<8x64xf32>
    tpu.vector_store %arg22[%c0_218, %c0_219], %749 {strides = array<i32>} : memref<8x64xf32, #tpu.memory_space<vmem>>, vector<8x64xf32>,
    %c0_220 = arith.constant 0 : index
    %c0_221 = arith.constant 0 : index
    %774 = vector.load %arg23[%c0_220, %c0_221] : memref<8x64xf32, #tpu.memory_space<vmem>>, vector<8x64xf32>
    tpu.vector_store %arg23[%c0_220, %c0_221], %752 {strides = array<i32>} : memref<8x64xf32, #tpu.memory_space<vmem>>, vector<8x64xf32>,
    %c0_222 = arith.constant 0 : index
    %c0_223 = arith.constant 0 : index
    %c0_224 = arith.constant 0 : index
    %775 = vector.load %arg18[%c0_222, %c0_223, %c0_224] : memref<8x8x128xbf16, #tpu.memory_space<vmem>>, vector<8x8x128xbf16>
    %776 = vector.shape_cast %775 : vector<8x8x128xbf16> to vector<64x128xbf16>
    %c0_225 = arith.constant 0 : index
    %c0_226 = arith.constant 0 : index
    %c0_227 = arith.constant 0 : index
    %777 = vector.load %arg19[%c0_225, %c0_226, %c0_227] : memref<8x8x64xbf16, #tpu.memory_space<vmem>>, vector<8x8x64xbf16>
    %778 = vector.shape_cast %777 : vector<8x8x64xbf16> to vector<64x64xbf16>
    %c0_228 = arith.constant 0 : index
    %c0_229 = arith.constant 0 : index
    %779 = vector.load %arg10[%c0_228, %c0_229] : memref<128x64xbf16, #tpu.memory_space<vmem>>, vector<128x64xbf16>
    %cst_230 = arith.constant dense<0.000000e+00> : vector<64x64xf32>
    %780 = tpu.matmul %776, %779, %cst_230 {dimension_numbers = #tpu.dot_dimension_numbers<[1], [0], [0], [1], [0, 0, 1, 1], [], []>} : vector<64x128xbf16>, vector<128x64xbf16>, vector<64x64xf32> -> vector<64x64xf32>
    %c0_231 = arith.constant 0 : index
    %c0_232 = arith.constant 0 : index
    %781 = vector.load %arg11[%c0_231, %c0_232] : memref<64x64xbf16, #tpu.memory_space<vmem>>, vector<64x64xbf16>
    %cst_233 = arith.constant dense<0.000000e+00> : vector<64x64xf32>
    %782 = tpu.matmul %778, %781, %cst_233 {dimension_numbers = #tpu.dot_dimension_numbers<[1], [0], [0], [1], [0, 0, 1, 1], [], []>} : vector<64x64xbf16>, vector<64x64xbf16>, vector<64x64xf32> -> vector<64x64xf32>
    %783 = arith.addf %780, %782 : vector<64x64xf32>
    %c0_234 = arith.constant 0 : index
    %c0_235 = arith.constant 0 : index
    %784 = vector.load %arg12[%c0_234, %c0_235] : memref<1x64xf32, #tpu.memory_space<vmem>>, vector<1x64xf32>
    %785 = vector.broadcast %784 : vector<1x64xf32> to vector<64x64xf32>
    %786 = arith.addf %783, %785 : vector<64x64xf32>
    %787 = vector.shape_cast %786 : vector<64x64xf32> to vector<8x8x64xf32>
    %c0_236 = arith.constant 0 : index
    %c0_237 = arith.constant 0 : index
    %788 = vector.load %arg13[%c0_236, %c0_237] : memref<1x64xf32, #tpu.memory_space<vmem>>, vector<1x64xf32>
    %789 = vector.shape_cast %788 : vector<1x64xf32> to vector<1x1x64xf32>
    %790 = vector.broadcast %789 : vector<1x1x64xf32> to vector<8x8x64xf32>
    %791 = arith.mulf %787, %790 : vector<8x8x64xf32>
    %cst_238 = arith.constant dense<0.000000e+00> : vector<8x8xf32>
    %792 = vector.multi_reduction <add>, %791, %cst_238 [2] : vector<8x8x64xf32> to vector<8x8xf32>
    %c0_239 = arith.constant 0 : index
    %c0_240 = arith.constant 0 : index
    %793 = vector.load %arg14[%c0_239, %c0_240] : memref<1x1xf32, #tpu.memory_space<vmem>>, vector<1x1xf32>
    %794 = vector.broadcast %793 : vector<1x1xf32> to vector<8x8xf32>
    %795 = arith.addf %792, %794 : vector<8x8xf32>
    %c0_241 = arith.constant 0 : index
    %c0_242 = arith.constant 0 : index
    %796 = vector.load %arg15[%c0_241, %c0_242] : memref<8x8xf32, #tpu.memory_space<vmem>>, vector<8x8xf32>
    tpu.vector_store %arg15[%c0_241, %c0_242], %795 {strides = array<i32>} : memref<8x8xf32, #tpu.memory_space<vmem>>, vector<8x8xf32>,
    return
  }
  func.func @transform_0(%arg0: i32, %arg1: i32) -> (i32, i32, i32) {
    %c0_i32 = arith.constant 0 : i32
    %c0_i32_0 = arith.constant 0 : i32
    return %arg1, %arg0, %c0_i32 : i32, i32, i32
  }
  func.func @transform_1(%arg0: i32, %arg1: i32) -> (i32, i32, i32) {
    %c0_i32 = arith.constant 0 : i32
    %c0_i32_0 = arith.constant 0 : i32
    return %arg1, %arg0, %c0_i32 : i32, i32, i32
  }
  func.func @transform_2(%arg0: i32, %arg1: i32) -> (i32, i32, i32) {
    %c0_i32 = arith.constant 0 : i32
    %c0_i32_0 = arith.constant 0 : i32
    return %arg1, %arg0, %c0_i32 : i32, i32, i32
  }
  func.func @transform_3(%arg0: i32, %arg1: i32) -> (i32, i32) {
    %c0_i32 = arith.constant 0 : i32
    %c0_i32_0 = arith.constant 0 : i32
    %c0_i32_1 = arith.constant 0 : i32
    return %c0_i32, %c0_i32_0 : i32, i32
  }
  func.func @transform_4(%arg0: i32, %arg1: i32) -> (i32, i32) {
    %c0_i32 = arith.constant 0 : i32
    %c0_i32_0 = arith.constant 0 : i32
    %c0_i32_1 = arith.constant 0 : i32
    return %c0_i32, %c0_i32_0 : i32, i32
  }
  func.func @transform_5(%arg0: i32, %arg1: i32) -> (i32, i32) {
    %c0_i32 = arith.constant 0 : i32
    %c0_i32_0 = arith.constant 0 : i32
    %c0_i32_1 = arith.constant 0 : i32
    return %c0_i32, %c0_i32_0 : i32, i32
  }
  func.func @transform_6(%arg0: i32, %arg1: i32) -> (i32, i32) {
    %c0_i32 = arith.constant 0 : i32
    %c0_i32_0 = arith.constant 0 : i32
    %c0_i32_1 = arith.constant 0 : i32
    return %c0_i32, %c0_i32_0 : i32, i32
  }
  func.func @transform_7(%arg0: i32, %arg1: i32) -> (i32, i32) {
    %c0_i32 = arith.constant 0 : i32
    %c0_i32_0 = arith.constant 0 : i32
    %c0_i32_1 = arith.constant 0 : i32
    return %c0_i32, %c0_i32_0 : i32, i32
  }
  func.func @transform_8(%arg0: i32, %arg1: i32) -> (i32, i32) {
    %c0_i32 = arith.constant 0 : i32
    %c0_i32_0 = arith.constant 0 : i32
    %c0_i32_1 = arith.constant 0 : i32
    return %c0_i32, %c0_i32_0 : i32, i32
  }
  func.func @transform_9(%arg0: i32, %arg1: i32) -> (i32, i32) {
    %c0_i32 = arith.constant 0 : i32
    %c0_i32_0 = arith.constant 0 : i32
    %c0_i32_1 = arith.constant 0 : i32
    return %c0_i32, %c0_i32_0 : i32, i32
  }
  func.func @transform_10(%arg0: i32, %arg1: i32) -> (i32, i32) {
    %c0_i32 = arith.constant 0 : i32
    %c0_i32_0 = arith.constant 0 : i32
    %c0_i32_1 = arith.constant 0 : i32
    return %c0_i32, %c0_i32_0 : i32, i32
  }
  func.func @transform_11(%arg0: i32, %arg1: i32) -> (i32, i32) {
    %c0_i32 = arith.constant 0 : i32
    %c0_i32_0 = arith.constant 0 : i32
    %c0_i32_1 = arith.constant 0 : i32
    return %c0_i32, %c0_i32_0 : i32, i32
  }
  func.func @transform_12(%arg0: i32, %arg1: i32) -> (i32, i32) {
    %c0_i32 = arith.constant 0 : i32
    %c0_i32_0 = arith.constant 0 : i32
    %c0_i32_1 = arith.constant 0 : i32
    return %c0_i32, %c0_i32_0 : i32, i32
  }
  func.func @transform_13(%arg0: i32, %arg1: i32) -> (i32, i32) {
    %c0_i32 = arith.constant 0 : i32
    return %arg1, %arg0 : i32, i32
  }
}

</mosaic_0001>

<bundles_post_ra>
// kernel: tpu_custom_call.1
= control target key start
LH: loop header
LB: loop body
LE: loop exit
PB: predicated region body
PF: predicated region fallthrough
CT: control target
= control target key end

     0   :  { %s10461_s0 = inlined_call_operand.hbm [shape: bf16[8,8,32], index: 0, kind: input, shape index: {}]   ;;  %s10462_s1 = inlined_call_operand.hbm [shape: bf16[8,8,16], index: 1, kind: input, shape index: {}]   ;;  %s10463_s2 = inlined_call_operand.hbm [shape: s32[8,8,1], index: 2, kind: input, shape index: {}]   ;;  %s10464_s3 = inlined_call_operand.hbm [shape: bf16[32,512], index: 3, kind: input, shape index: {}]   ;;  %s10465_s4 = inlined_call_operand.hbm [shape: f32[1,512], index: 4, kind: input, shape index: {}]   ;;  %s10466_s5 = inlined_call_operand.hbm [shape: bf16[16,256], index: 5, kind: input, shape index: {}]   ;;  %s10467_s6 = inlined_call_operand.hbm [shape: f32[1,256], index: 6, kind: input, shape index: {}]   ;;  %s10468_s7 = inlined_call_operand.hbm [shape: bf16[192,768], index: 7, kind: input, shape index: {}]   ;;  %s10469_s8 = inlined_call_operand.hbm [shape: bf16[128,64], index: 8, kind: input, shape index: {}]   ;;  %s10470_s9 = inlined_call_operand.hbm [shape: bf16[64,64], index: 9, kind: input, shape index: {}]   ;;  %s10471_s10 = inlined_call_operand.hbm [shape: f32[1,64], index: 10, kind: input, shape index: {}]   ;;  %s10472_s11 = inlined_call_operand.hbm [shape: f32[1,64], index: 11, kind: input, shape index: {}]   ;;  %s10473_s12 = inlined_call_operand.<no memory space> [shape: f32[1,1], index: 12, kind: input, shape index: {}]   ;;  %s10474_s13 = inlined_call_operand.hbm [shape: f32[8,8], index: 13, kind: output, shape index: {}]  }
   0x1   :  { %v18_v0 = vstv %s10473_s12 }
   0x2   :  { %19 = vst [vmem:[#allocation10] sm:$0x1] %v18_v0 }
   0x3   :  { %20 = vsyncpa [#allocation12], 0 }
   0x4   :  { %21 = vsyncpa [#allocation15], 0 }
   0x5   :  { %22 = vsyncpa [#allocation18], 0 }
   0x6   :  { %23 = vsyncpa [#allocation21], 0 }
   0x7   :  { %24 = vsyncpa [#allocation24], 0 }
   0x8   :  { %25 = vsyncpa [#allocation27], 0 }
   0x9   :  { %26 = vsyncpa [#allocation30], 0 }
   0xa   :  { %27 = vsyncpa [#allocation13], 0  ;;  %s8455_s27 = smov [#allocation14]   ;;  %s8456_s29 = smov [#allocation17]  }
   0xb   :  { %s45_s28 = sshll.u32 %s8455_s27, 4  ;;  %s69_s30 = sshll.u32 %s8456_s29, 4  ;;  %s46_s28 = int_to_ptr.vmem [resolvable:$true] %s45_s28  ;;  %s8552_s30 = int_to_ptr.vmem [resolvable:$true] %s69_s30 }
   0xc   :  { %s8153_s12 = scalar_lea.hbm %s10462_s1, 512 }
   0xd   :  { %p8154_p0 = scmp.ne.s32.totalorder %s10462_s1, %s8153_s12  ;;  %p8157_p1 = scmp.lt.u32.totalorder %s8153_s12, %s10462_s1 }
   0xf   :  { %p8159_p2 = pnand %p8157_p1, %p8154_p0 }
  0x11   :  { %8162 = shalt.err (!%p8159_p2)
}
  0x12   :  { %s8163_s20 = scalar_lea.vmem %s46_s28, 512  ;;  %p8168_p4 = scmp.lt.s32.totalorder %s46_s28, %s46_s28 }
  0x13   :  { %p8164_p3 = scmp.ne.s32.totalorder %s46_s28, %s8163_s20  ;;  %p8169_p5 = scmp.lt.s32.totalorder %s8163_s20, %s8163_s20 }
  0x15   :  { %p8170_p6 = por %p8169_p5, %p8168_p4 }
  0x17   :  { %p8171_p7 = pnand %p8170_p6, %p8164_p3 }
  0x19   :  { %8174 = shalt.err (!%p8171_p7)
}
  0x1a   :  { %s8457_s21 = smov 64   ;;  %s8458_s22 = smov 4  }
  0x1b   :  { %51 = dma.hbm_to_vmem [thread:$0]  %s10462_s1, 512, %s46_s28, [#allocation15], %s8457_s21, %s8457_s21, %s8458_s22  }
  0x1c   :  { %s8175_s27 = scalar_lea.hbm %s10464_s3, 1024 }
  0x1d   :  { %p8176_p8 = scmp.ne.s32.totalorder %s10464_s3, %s8175_s27  ;;  %p8179_p9 = scmp.lt.u32.totalorder %s8175_s27, %s10464_s3 }
  0x1f   :  { %p8181_p10 = pnand %p8179_p9, %p8176_p8 }
  0x21   :  { %8184 = shalt.err (!%p8181_p10)
}
  0x22   :  { %s8185_s16 = scalar_lea.vmem %s8552_s30, 1024  ;;  %p8190_p12 = scmp.lt.s32.totalorder %s8552_s30, %s8552_s30 }
  0x23   :  { %p8186_p11 = scmp.ne.s32.totalorder %s8552_s30, %s8185_s16  ;;  %p8191_p13 = scmp.lt.s32.totalorder %s8185_s16, %s8185_s16 }
  0x25   :  { %p8192_p0 = por %p8191_p13, %p8190_p12 }
  0x27   :  { %p8193_p1 = pnand %p8192_p0, %p8186_p11 }
  0x29   :  { %8196 = shalt.err (!%p8193_p1)
}
  0x2a   :  { %s8459_s1 = smov 256   ;;  %s8460_s28 = smov 16  }
  0x2b   :  { %75 = dma.hbm_to_vmem [thread:$0]  %s10464_s3, 1024, %s8552_s30, [#allocation18], %s8459_s1, %s8459_s1, %s8460_s28  }
  0x2c   :  { %s8461_s19 = smov [#allocation20]   ;;  %s8462_s23 = smov [#allocation23]  }
  0x2d   :  { %s91_s20 = sshll.u32 %s8461_s19, 4  ;;  %s113_s24 = sshll.u32 %s8462_s23, 4  ;;  %s92_s20 = int_to_ptr.vmem [resolvable:$true] %s91_s20  ;;  %s8586_s24 = int_to_ptr.vmem [resolvable:$true] %s113_s24 }
  0x2e   :  { %s8197_s27 = scalar_lea.hbm %s10466_s5, 256 }
  0x2f   :  { %p8198_p2 = scmp.ne.s32.totalorder %s10466_s5, %s8197_s27  ;;  %p8201_p3 = scmp.lt.u32.totalorder %s8197_s27, %s10466_s5 }
  0x31   :  { %p8203_p4 = pnand %p8201_p3, %p8198_p2 }
  0x33   :  { %8206 = shalt.err (!%p8203_p4)
}
  0x34   :  { %s8207_s3 = scalar_lea.vmem %s92_s20, 256  ;;  %p8212_p6 = scmp.lt.s32.totalorder %s92_s20, %s92_s20 }
  0x35   :  { %p8208_p5 = scmp.ne.s32.totalorder %s92_s20, %s8207_s3  ;;  %p8213_p7 = scmp.lt.s32.totalorder %s8207_s3, %s8207_s3 }
  0x37   :  { %p8214_p8 = por %p8213_p7, %p8212_p6 }
  0x39   :  { %p8215_p9 = pnand %p8214_p8, %p8208_p5 }
  0x3b   :  { %8218 = shalt.err (!%p8215_p9)
}
  0x3c   :  { %s8463_s30 = smov 128   ;;  %s8464_s16 = smov 8  }
  0x3d   :  { %97 = dma.hbm_to_vmem [thread:$0]  %s10466_s5, 256, %s92_s20, [#allocation21], %s8463_s30, %s8463_s30, %s8464_s16  }
  0x3e   :  { %s8219_s19 = scalar_lea.hbm %s10468_s7, 9216 }
  0x3f   :  { %p8220_p10 = scmp.ne.s32.totalorder %s10468_s7, %s8219_s19  ;;  %p8223_p11 = scmp.lt.u32.totalorder %s8219_s19, %s10468_s7 }
  0x41   :  { %p8225_p12 = pnand %p8223_p11, %p8220_p10 }
  0x43   :  { %8228 = shalt.err (!%p8225_p12)
}
  0x44   :  { %s8229_s29 = scalar_lea.vmem %s8586_s24, 9216  ;;  %p8234_p0 = scmp.lt.s32.totalorder %s8586_s24, %s8586_s24 }
  0x45   :  { %p8230_p13 = scmp.ne.s32.totalorder %s8586_s24, %s8229_s29  ;;  %p8235_p1 = scmp.lt.s32.totalorder %s8229_s29, %s8229_s29 }
  0x47   :  { %p8236_p2 = por %p8235_p1, %p8234_p0 }
  0x49   :  { %p8237_p3 = pnand %p8236_p2, %p8230_p13 }
  0x4b   :  { %8240 = shalt.err (!%p8237_p3)
}
  0x4c   :  { %s8465_s5 = smov 384   ;;  %s8466_s20 = smov 24  }
  0x4d   :  { %119 = dma.hbm_to_vmem [thread:$0]  %s10468_s7, 9216, %s8586_s24, [#allocation24], %s8465_s5, %s8465_s5, %s8466_s20  }
  0x4e   :  { %s8467_s12 = smov [#allocation26]   ;;  %s8468_s1 = smov [#allocation11]  }
  0x4f   :  { %s137_s3 = sshll.u32 %s8467_s12, 4  ;;  %s33_s28 = sshll.u32 %s8468_s1, 4  ;;  %s138_s3 = int_to_ptr.vmem [resolvable:$true] %s137_s3  ;;  %s8620_s28 = int_to_ptr.vmem [resolvable:$true] %s33_s28 }
  0x50   :  { %s8241_s19 = scalar_lea.hbm %s10470_s9, 512 }
  0x51   :  { %p8242_p4 = scmp.ne.s32.totalorder %s10470_s9, %s8241_s19  ;;  %p8245_p5 = scmp.lt.u32.totalorder %s8241_s19, %s10470_s9 }
  0x53   :  { %p8247_p6 = pnand %p8245_p5, %p8242_p4 }
  0x55   :  { %8250 = shalt.err (!%p8247_p6)
}
  0x56   :  { %s8251_s7 = scalar_lea.vmem %s138_s3, 512  ;;  %p8256_p8 = scmp.lt.s32.totalorder %s138_s3, %s138_s3 }
  0x57   :  { %p8252_p7 = scmp.ne.s32.totalorder %s138_s3, %s8251_s7  ;;  %p8257_p9 = scmp.lt.s32.totalorder %s8251_s7, %s8251_s7 }
  0x59   :  { %p8258_p10 = por %p8257_p9, %p8256_p8 }
  0x5b   :  { %p8259_p11 = pnand %p8258_p10, %p8252_p7 }
  0x5d   :  { %8262 = shalt.err (!%p8259_p11)
}
  0x5e   :  { %143 = dma.hbm_to_vmem [thread:$0]  %s10470_s9, 512, %s138_s3, [#allocation27], %s8457_s21, %s8457_s21, %s8458_s22  }
  0x5f   :  { %s8263_s14 = scalar_lea.hbm %s10461_s0, 512 }
  0x60   :  { %p8264_p12 = scmp.ne.s32.totalorder %s10461_s0, %s8263_s14  ;;  %p8267_p13 = scmp.lt.u32.totalorder %s8263_s14, %s10461_s0 }
  0x62   :  { %p8269_p0 = pnand %p8267_p13, %p8264_p12 }
  0x64   :  { %8272 = shalt.err (!%p8269_p0)
}
  0x65   :  { %s8273_s18 = scalar_lea.vmem %s8620_s28, 512  ;;  %p8278_p2 = scmp.lt.s32.totalorder %s8620_s28, %s8620_s28 }
  0x66   :  { %p8274_p1 = scmp.ne.s32.totalorder %s8620_s28, %s8273_s18  ;;  %p8279_p3 = scmp.lt.s32.totalorder %s8273_s18, %s8273_s18 }
  0x68   :  { %p8280_p4 = por %p8279_p3, %p8278_p2 }
  0x6a   :  { %p8281_p5 = pnand %p8280_p4, %p8274_p1 }
  0x6c   :  { %8284 = shalt.err (!%p8281_p5)
}
  0x6d   :  { %39 = dma.hbm_to_vmem [thread:$0]  %s10461_s0, 512, %s8620_s28, [#allocation12], %s8457_s21, %s8457_s21, %s8458_s22  }
  0x6e   :  { %s8469_s19 = smov [#allocation16]   ;;  %s8470_s25 = smov [#allocation19]  }
  0x6f   :  { %s57_s23 = sshll.u32 %s8469_s19, 4  ;;  %s82_s26 = sshll.u32 %s8470_s25, 4  ;;  %s58_s23 = int_to_ptr.vmem [resolvable:$true] %s57_s23  ;;  %s83_s26 = int_to_ptr.vmem [resolvable:$true] %s82_s26 }
  0x70   :  { %s8285_s24 = scalar_lea.hbm %s10463_s2, 1024 }
  0x71   :  { %p8286_p6 = scmp.ne.s32.totalorder %s10463_s2, %s8285_s24  ;;  %p8289_p7 = scmp.lt.u32.totalorder %s8285_s24, %s10463_s2 }
  0x73   :  { %p8291_p8 = pnand %p8289_p7, %p8286_p6 }
  0x75   :  { %8294 = shalt.err (!%p8291_p8)
}
  0x76   :  { %s8295_s0 = scalar_lea.vmem %s58_s23, 1024  ;;  %p8300_p10 = scmp.lt.s32.totalorder %s58_s23, %s58_s23 }
  0x77   :  { %p8296_p9 = scmp.ne.s32.totalorder %s58_s23, %s8295_s0  ;;  %p8301_p11 = scmp.lt.s32.totalorder %s8295_s0, %s8295_s0 }
  0x79   :  { %p8302_p12 = por %p8301_p11, %p8300_p10 }
  0x7b   :  { %p8303_p13 = pnand %p8302_p12, %p8296_p9 }
  0x7d   :  { %8306 = shalt.err (!%p8303_p13)
}
  0x7e   :  { %63 = dma.hbm_to_vmem [thread:$0]  %s10463_s2, 1024, %s58_s23, [#allocation15], %s8463_s30, %s8463_s30, %s8464_s16  }
  0x7f   :  { %s8307_s17 = scalar_lea.hbm %s10465_s4, 64 }
  0x80   :  { %p8308_p0 = scmp.ne.s32.totalorder %s10465_s4, %s8307_s17  ;;  %p8311_p1 = scmp.lt.u32.totalorder %s8307_s17, %s10465_s4 }
  0x82   :  { %p8313_p2 = pnand %p8311_p1, %p8308_p0 }
  0x84   :  { %8316 = shalt.err (!%p8313_p2)
}
  0x85   :  { %s8317_s25 = scalar_lea.vmem %s83_s26, 64  ;;  %p8322_p4 = scmp.lt.s32.totalorder %s83_s26, %s83_s26 }
  0x86   :  { %p8318_p3 = scmp.ne.s32.totalorder %s83_s26, %s8317_s25  ;;  %p8323_p5 = scmp.lt.s32.totalorder %s8317_s25, %s8317_s25 }
  0x88   :  { %p8324_p6 = por %p8323_p5, %p8322_p4 }
  0x8a   :  { %p8325_p7 = pnand %p8324_p6, %p8318_p3 }
  0x8c   :  { %8328 = shalt.err (!%p8325_p7)
}
  0x8d   :  { %85 = dma.hbm_to_vmem [thread:$0]  %s10465_s4, 64, %s83_s26, [#allocation18]  }
  0x8e   :  { %s8471_s16 = smov [#allocation22]   ;;  %s8472_s27 = smov [#allocation25]  }
  0x8f   :  { %s104_s23 = sshll.u32 %s8471_s16, 4  ;;  %s125_s7 = sshll.u32 %s8472_s27, 4  ;;  %s105_s23 = int_to_ptr.vmem [resolvable:$true] %s104_s23  ;;  %s8684_s7 = int_to_ptr.vmem [resolvable:$true] %s125_s7 }
  0x90   :  { %s8329_s5 = scalar_lea.hbm %s10467_s6, 32 }
  0x91   :  { %p8330_p8 = scmp.ne.s32.totalorder %s10467_s6, %s8329_s5  ;;  %p8333_p9 = scmp.lt.u32.totalorder %s8329_s5, %s10467_s6 }
  0x93   :  { %p8335_p10 = pnand %p8333_p9, %p8330_p8 }
  0x95   :  { %8338 = shalt.err (!%p8335_p10)
}
  0x96   :  { %s8339_s4 = scalar_lea.vmem %s105_s23, 32  ;;  %p8344_p12 = scmp.lt.s32.totalorder %s105_s23, %s105_s23 }
  0x97   :  { %p8340_p11 = scmp.ne.s32.totalorder %s105_s23, %s8339_s4  ;;  %p8345_p13 = scmp.lt.s32.totalorder %s8339_s4, %s8339_s4 }
  0x99   :  { %p8346_p0 = por %p8345_p13, %p8344_p12 }
  0x9b   :  { %p8347_p1 = pnand %p8346_p0, %p8340_p11 }
  0x9d   :  { %8350 = shalt.err (!%p8347_p1)
}
  0x9e   :  { %107 = dma.hbm_to_vmem [thread:$0]  %s10467_s6, 32, %s105_s23, [#allocation21]  }
  0x9f   :  { %s8351_s17 = scalar_lea.hbm %s10469_s8, 1024 }
  0xa0   :  { %p8352_p2 = scmp.ne.s32.totalorder %s10469_s8, %s8351_s17  ;;  %p8355_p3 = scmp.lt.u32.totalorder %s8351_s17, %s10469_s8 }
  0xa2   :  { %p8357_p4 = pnand %p8355_p3, %p8352_p2 }
  0xa4   :  { %8360 = shalt.err (!%p8357_p4)
}
  0xa5   :  { %s8361_s25 = scalar_lea.vmem %s8684_s7, 1024  ;;  %p8366_p6 = scmp.lt.s32.totalorder %s8684_s7, %s8684_s7 }
  0xa6   :  { %p8362_p5 = scmp.ne.s32.totalorder %s8684_s7, %s8361_s25  ;;  %p8367_p7 = scmp.lt.s32.totalorder %s8361_s25, %s8361_s25 }
  0xa8   :  { %p8368_p8 = por %p8367_p7, %p8366_p6 }
  0xaa   :  { %p8369_p9 = pnand %p8368_p8, %p8362_p5 }
  0xac   :  { %8372 = shalt.err (!%p8369_p9)
}
  0xad   :  { %131 = dma.hbm_to_vmem [thread:$0]  %s10469_s8, 1024, %s8684_s7, [#allocation24], %s8457_s21, %s8457_s21, %s8458_s22  }
  0xae   :  { %s8473_s30 = smov [#allocation28]   ;;  %s8474_s23 = smov [#allocation29]  }
  0xaf   :  { %s150_s16 = sshll.u32 %s8473_s30, 4  ;;  %s160_s27 = sshll.u32 %s8474_s23, 4  ;;  %s151_s16 = int_to_ptr.vmem [resolvable:$true] %s150_s16  ;;  %s161_s27 = int_to_ptr.vmem [resolvable:$true] %s160_s27 }
  0xb0   :  { %s8373_s5 = scalar_lea.hbm %s10471_s10, 16 }
  0xb1   :  { %p8374_p10 = scmp.ne.s32.totalorder %s10471_s10, %s8373_s5  ;;  %p8377_p11 = scmp.lt.u32.totalorder %s8373_s5, %s10471_s10 }
  0xb3   :  { %p8379_p12 = pnand %p8377_p11, %p8374_p10 }
  0xb5   :  { %8382 = shalt.err (!%p8379_p12)
}
  0xb6   :  { %s8383_s8 = scalar_lea.vmem %s151_s16, 16  ;;  %s8387_s22 = scalar_lea.vmem %s151_s16, 32 }
  0xb7   :  { %p8384_p13 = scmp.ne.s32.totalorder %s151_s16, %s8383_s8  ;;  %p8388_p0 = scmp.lt.s32.totalorder %s151_s16, %s151_s16 }
  0xb8   :  { %p8389_p1 = scmp.lt.s32.totalorder %s8387_s22, %s8383_s8 }
  0xba   :  { %p8390_p2 = por %p8389_p1, %p8388_p0 }
  0xbc   :  { %p8391_p3 = pnand %p8390_p2, %p8384_p13 }
  0xbe   :  { %8394 = shalt.err (!%p8391_p3)
}
  0xbf   :  { %153 = dma.hbm_to_vmem [thread:$0]  %s10471_s10, 16, %s151_s16, [#allocation27]  }
  0xc0   :  { %s8395_s12 = scalar_lea.hbm %s10472_s11, 16 }
  0xc1   :  { %p8396_p4 = scmp.ne.s32.totalorder %s10472_s11, %s8395_s12  ;;  %p8399_p5 = scmp.lt.u32.totalorder %s8395_s12, %s10472_s11 }
  0xc3   :  { %p8401_p6 = pnand %p8399_p5, %p8396_p4 }
  0xc5   :  { %8404 = shalt.err (!%p8401_p6)
}
  0xc6   :  { %s8405_s3 = scalar_lea.vmem %s161_s27, 16  ;;  %s8409_s19 = scalar_lea.vmem %s161_s27, 32 }
  0xc7   :  { %p8406_p7 = scmp.ne.s32.totalorder %s161_s27, %s8405_s3  ;;  %p8410_p8 = scmp.lt.s32.totalorder %s161_s27, %s161_s27 }
  0xc8   :  { %p8411_p9 = scmp.lt.s32.totalorder %s8409_s19, %s8405_s3 }
  0xca   :  { %p8412_p10 = por %p8411_p9, %p8410_p8 }
  0xcc   :  { %p8413_p11 = pnand %p8412_p10, %p8406_p7 }
  0xce   :  { %8416 = shalt.err (!%p8413_p11)
}
  0xcf   :  { %163 = dma.hbm_to_vmem [thread:$0]  %s10472_s11, 16, %s161_s27, [#allocation30]  }
  0xd0   :  { %8439 = dma.done.wait [#allocation12], 512  }
  0xd1   :  { %8440 = vsyncadd [#allocation12], 4294966784 }
  0xd2   :  { %8441 = dma.done.wait [#allocation15], 1536  }
  0xd3   :  { %8442 = vsyncadd [#allocation15], 4294965760 }
  0xd4   :  { %8443 = dma.done.wait [#allocation18], 1088  }
  0xd5   :  { %8444 = vsyncadd [#allocation18], 4294966208 }
  0xd6   :  { %8445 = dma.done.wait [#allocation21], 288  }
  0xd7   :  { %8446 = vsyncadd [#allocation21], 4294967008 }
  0xd8   :  { %8447 = dma.done.wait [#allocation24], 10240  }
  0xd9   :  { %8448 = vsyncadd [#allocation24], 4294957056 }
  0xda   :  { %8449 = dma.done.wait [#allocation27], 528  }
  0xdb   :  { %8450 = vsyncadd [#allocation27], 4294966768 }
  0xdc   :  { %8451 = dma.done.wait [#allocation30], 16  }
  0xdd   :  { %8452 = vsyncadd [#allocation30], 4294967280  ;;  %vm209_vm0 = vcmask 523264   ;;  %v10476_v1 = vmov 0   ;;  %v8476_v2 = vmov 0.0   ;;  %v7426_v11 = vld [vmem:[#allocation11] sm:$0xff]  }
  0xde   :  { %355 = vmatprep.mubr.bf16.mxu0 %v10476_v1  ;;  %428 = vmatprep.mubr.bf16.mxu1 %v10476_v1  ;;  %210 = vst.msk [vmem:[#allocation8] sm:$0xff] %vm209_vm0, %v8476_v2  ;;  %211 = vst.msk [vmem:[#allocation9] sm:$0xff] %vm209_vm0, %v8476_v2  ;;  %v7414_v3 = vld [vmem:[#allocation17 + $0x4] ss:$16 sps:$4 sm:$0xff]   ;;  %v7416_v4 = vld [vmem:[#allocation17 + $0xc] ss:$16 sps:$4 sm:$0xff]  }
  0xdf   :  { %7413 = vset.pattern.permute.xlu0 %v10476_v1  ;;  %7412 = vset.pattern.permute.xlu1 %v10476_v1  ;;  %v7418_v5 = vld [vmem:[#allocation17] ss:$16 sps:$4 sm:$0xff]   ;;  %v7419_v6 = vld [vmem:[#allocation17 + $0x8] ss:$16 sps:$4 sm:$0xff]   ;;  %v7420_v7 = vld [vmem:[#allocation17 + $0x24] ss:$16 sps:$4 sm:$0xff]  }
  0xe0   :  { %323 = vmatprep.subr.bf16.mxu0 %v7414_v3  ;;  %396 = vmatprep.subr.bf16.mxu1 %v7416_v4  ;;  %v7422_v8 = vld [vmem:[#allocation17 + $0x2c] ss:$16 sps:$4 sm:$0xff]   ;;  %v7424_v9 = vld [vmem:[#allocation17 + $0x20] ss:$16 sps:$4 sm:$0xff]   ;;  %v7425_v10 = vld [vmem:[#allocation17 + $0x28] ss:$16 sps:$4 sm:$0xff]  }
  0xe1   :  { %324 = vmatpush1.bf16.msra.mxu0 %v7418_v5  ;;  %397 = vmatpush1.bf16.msra.mxu1 %v7419_v6  ;;  %v8748_v12 = vld [vmem:[#allocation23 + $0x4] ss:$24 sps:$4 sm:$0xff]   ;;  %vm310_vm1 = vcmask 261120   ;;  %v8750_v13 = vld [vmem:[#allocation23] ss:$24 sps:$4 sm:$0xff]   ;;  %v7460_v38 = vld [vmem:[#allocation14] sm:$0xff]  }
  0xe2   :  { %325 = vmatprep.subr.bf16.mxu0 %v7420_v7  ;;  %398 = vmatprep.subr.bf16.mxu1 %v7422_v8  ;;  %v8753_v14 = vld [vmem:[#allocation23 + $0x34] ss:$24 sps:$4 sm:$0xff]   ;;  %v8758_v15 = vld [vmem:[#allocation23 + $0x30] ss:$24 sps:$4 sm:$0xff]   ;;  %v8762_v16 = vld [vmem:[#allocation23 + $0x64] ss:$24 sps:$4 sm:$0xff]  }
  0xe3   :  { %v7433_v17 = vld [vmem:[#allocation11 + $0x8] sm:$0xff]   ;;  %v8778_v23 = vld [vmem:[#allocation23 + $0xc4] ss:$24 sps:$4 sm:$0xff]   ;;  %v8800_v37 = vld [vmem:[#allocation23 + $0x8] ss:$24 sps:$4 sm:$0xff]   ;;  %vm633_vm2 = vcmask 130048  }
  0xe4   :  { %v8766_v18 = vld [vmem:[#allocation23 + $0x60] ss:$24 sps:$4 sm:$0xff]   ;;  %v8769_v19 = vld [vmem:[#allocation23 + $0x94] ss:$24 sps:$4 sm:$0xff]   ;;  %v8774_v22 = vld [vmem:[#allocation23 + $0x90] ss:$24 sps:$4 sm:$0xff]  }
  0xe5   :  { %326 = vmatpush1.bf16.msra.mxu0 %v7424_v9  ;;  %399 = vmatpush1.bf16.msra.mxu1 %v7425_v10  ;;  %v7451_v20 = vld [vmem:[#allocation20] ss:$8 sps:$4 sm:$0xff]   ;;  %v7453_v21 = vld [vmem:[#allocation20 + $0x4] ss:$8 sps:$4 sm:$0xff]   ;;  %v7447_v30 = vld [vmem:[#allocation11 + $0x18] sm:$0xff]   ;;  %v8477_v60 = vmov 0.0|0.0  }
  0xe6   :  { %1224 = vmatprep.subr.bf16.mxu1 %v8748_v12  ;;  %646 = vmatprep.subr.bf16.mxu0 %v7453_v21  ;;  %v8781_v24 = vld [vmem:[#allocation23 + $0xc] ss:$24 sps:$4 sm:$0xff]   ;;  %v7440_v25 = vld [vmem:[#allocation11 + $0x10] sm:$0xff]   ;;  %v7444_v28 = vld [vmem:[#allocation23 + $0xf0] ss:$24 sps:$4 sm:$0xff]   ;;  %s8478_s11 = smov [#allocation31]  }
  0xe7   :  { %v8784_v26 = vld [vmem:[#allocation23 + $0xc0] ss:$24 sps:$4 sm:$0xff]   ;;  %v7446_v27 = vld [vmem:[#allocation23 + $0xf4] ss:$24 sps:$4 sm:$0xff]   ;;  %v7450_v29 = vld [vmem:[#allocation23 + $0x124] ss:$24 sps:$4 sm:$0xff]  }
  0xe8   :  { %6578 = vmatmul.mubr.msk.bf16.vlgmr.msra.gmra.mrb[0].mxu0 %vm310_vm1, %v7426_v11  ;;  %6582 = vmatmul.mubr.msk.bf16.vlgmr.msra.gmra.mrb[0].mxu1 %vm310_vm1, %v7426_v11  ;;  %v7448_v31 = vld [vmem:[#allocation23 + $0x120] ss:$24 sps:$4 sm:$0xff]   ;;  %v7456_v32 = vld [vmem:[#allocation23 + $0x154] ss:$24 sps:$4 sm:$0xff]   ;;  %v7454_v35 = vld [vmem:[#allocation23 + $0x150] ss:$24 sps:$4 sm:$0xff]  }
  0xe9   :  { %1225 = vmatpush1.bf16.msra.mxu1 %v8750_v13  ;;  %365 = vmatprep.mubr.bf16.mxu0 %v10476_v1  ;;  %v777_v33 = vld [vmem:[#allocation8] sm:$0xff]  ;;  %v7469_v41 = vld [vmem:[#allocation23 + $0x1b4] ss:$24 sps:$4 sm:$0xff]   ;;  %v7467_v43 = vld [vmem:[#allocation23 + $0x1b0] ss:$24 sps:$4 sm:$0xff]  }
  0xea   :  { %1226 = vmatprep.subr.bf16.mxu1 %v8753_v14  ;;  %438 = vmatprep.mubr.bf16.mxu1 %v10476_v1  ;;  %v8793_v34 = vpack.c.bf16 %v777_v33, %v777_v33  ;;  %v7463_v36 = vld [vmem:[#allocation23 + $0x184] ss:$24 sps:$4 sm:$0xff]   ;;  %v7461_v39 = vld [vmem:[#allocation23 + $0x180] ss:$24 sps:$4 sm:$0xff]   ;;  %v7481_v50 = vld [vmem:[#allocation23 + $0x214] ss:$24 sps:$4 sm:$0xff]  }
  0xeb   :  { %647 = vmatpush1.bf16.msra.mxu0 %v7451_v20  ;;  %v8802_v40 = vld [vmem:[#allocation23 + $0x3c] ss:$24 sps:$4 sm:$0xff]   ;;  %v8805_v42 = vld [vmem:[#allocation23 + $0x38] ss:$24 sps:$4 sm:$0xff]   ;;  %v8808_v44 = vld [vmem:[#allocation23 + $0x6c] ss:$24 sps:$4 sm:$0xff]  }
  0xec   :  { %1265 = vmatprep.subr.bf16.mxu0 %v8781_v24  ;;  %v7475_v45 = vld [vmem:[#allocation23 + $0x1e4] ss:$24 sps:$4 sm:$0xff]   ;;  %v7494_v46 = vld [vmem:[#allocation14 + $0x8] sm:$0xff]   ;;  %v8813_v47 = vld [vmem:[#allocation23 + $0x68] ss:$24 sps:$4 sm:$0xff]  }
  0xed   :  { %1227 = vmatpush1.bf16.msra.mxu1 %v8758_v15  ;;  %v7473_v48 = vld [vmem:[#allocation23 + $0x1e0] ss:$24 sps:$4 sm:$0xff]   ;;  %v8816_v49 = vld [vmem:[#allocation23 + $0x9c] ss:$24 sps:$4 sm:$0xff]   ;;  %v7479_v52 = vld [vmem:[#allocation23 + $0x210] ss:$24 sps:$4 sm:$0xff]  }
  0xee   :  { %1228 = vmatprep.subr.bf16.mxu1 %v8762_v16  ;;  %v8818_v51 = vld [vmem:[#allocation23 + $0x98] ss:$24 sps:$4 sm:$0xff]   ;;  %v8823_v53 = vld [vmem:[#allocation23 + $0xcc] ss:$24 sps:$4 sm:$0xff]   ;;  %v8825_v55 = vld [vmem:[#allocation23 + $0xc8] ss:$24 sps:$4 sm:$0xff]  }
  0xef   :  { %v7487_v54 = vld [vmem:[#allocation23 + $0x14] ss:$24 sps:$4 sm:$0xff]   ;;  %v7507_v56 = vld [vmem:[#allocation14 + $0x10] sm:$0xff]   ;;  %v7485_v57 = vld [vmem:[#allocation23 + $0x10] ss:$24 sps:$4 sm:$0xff]  }
  0xf0   :  { %6579 = vmatmul.mubr.msk.bf16.gmra.mrb[4].mxu0 %vm310_vm1, %v7433_v17  ;;  %6583 = vmatmul.mubr.msk.bf16.gmra.mrb[4].mxu1 %vm310_vm1, %v7433_v17  ;;  %v8830_v58 = vld [vmem:[#allocation23 + $0xfc] ss:$24 sps:$4 sm:$0xff]   ;;  %v8833_v61 = vld [vmem:[#allocation23 + $0xf8] ss:$24 sps:$4 sm:$0xff]   ;;  %v8838_v63 = vld [vmem:[#allocation23 + $0x12c] ss:$24 sps:$4 sm:$0xff]  }
  0xf1   :  { %1229 = vmatpush1.bf16.msra.mxu1 %v8766_v18  ;;  %375 = vmatprep.mubr.bf16.mxu0 %v10476_v1  ;;  %v7493_v59 = vld [vmem:[#allocation23 + $0x44] ss:$24 sps:$4 sm:$0xff]   ;;  %v7491_v62 = vld [vmem:[#allocation23 + $0x40] ss:$24 sps:$4 sm:$0xff]   ;;  %v7500_v0 = vld [vmem:[#allocation23 + $0x74] ss:$24 sps:$4 sm:$0xff]  }
  0xf2   :  { %1230 = vmatprep.subr.bf16.mxu1 %v8769_v19  ;;  %448 = vmatprep.mubr.bf16.mxu1 %v10476_v1  ;;  %v8840_v2 = vld [vmem:[#allocation23 + $0x128] ss:$24 sps:$4 sm:$0xff]   ;;  %v8845_v4 = vld [vmem:[#allocation23 + $0x15c] ss:$24 sps:$4 sm:$0xff]   ;;  %v8849_v7 = vld [vmem:[#allocation23 + $0x158] ss:$24 sps:$4 sm:$0xff]  }
  0xf3   :  { %v7498_v3 = vld [vmem:[#allocation23 + $0x70] ss:$24 sps:$4 sm:$0xff]   ;;  %v7506_v5 = vld [vmem:[#allocation23 + $0xa4] ss:$24 sps:$4 sm:$0xff]   ;;  %v7504_v8 = vld [vmem:[#allocation23 + $0xa0] ss:$24 sps:$4 sm:$0xff]  }
  0xf4   :  { %v7520_v6 = vld [vmem:[#allocation14 + $0x18] sm:$0xff]   ;;  %v7513_v10 = vld [vmem:[#allocation23 + $0xd4] ss:$24 sps:$4 sm:$0xff]  }
  0xf5   :  { %1231 = vmatpush1.bf16.msra.mxu1 %v8774_v22  ;;  %v8851_v9 = vld [vmem:[#allocation23 + $0x18c] ss:$24 sps:$4 sm:$0xff]   ;;  %v8856_v11 = vld [vmem:[#allocation23 + $0x188] ss:$24 sps:$4 sm:$0xff]   ;;  %v8860_v20 = vld [vmem:[#allocation23 + $0x1bc] ss:$24 sps:$4 sm:$0xff]  }
  0xf6   :  { %1232 = vmatprep.subr.bf16.mxu1 %v8778_v23  ;;  %v7511_v17 = vld [vmem:[#allocation23 + $0xd0] ss:$24 sps:$4 sm:$0xff]   ;;  %v7519_v21 = vld [vmem:[#allocation23 + $0x104] ss:$24 sps:$4 sm:$0xff]  }
  0xf7   :  { %v7532_v33 = vld [vmem:[#allocation23 + $0x164] ss:$24 sps:$4 sm:$0xff]  }
  0xf8   :  { %6580 = vmatmul.mubr.msk.bf16.gmra.mrb[8].mxu0 %vm310_vm1, %v7440_v25  ;;  %6584 = vmatmul.mubr.msk.bf16.gmra.mrb[8].mxu1 %vm310_vm1, %v7440_v25  ;;  %v8864_v25 = vld [vmem:[#allocation23 + $0x1b8] ss:$24 sps:$4 sm:$0xff]  }
  0xf9   :  { %1233 = vmatpush1.bf16.msra.mxu1 %v8784_v26  ;;  %385 = vmatprep.mubr.bf16.mxu0 %v10476_v1 }
  0xfa   :  { %1234 = vmatprep.subr.bf16.mxu1 %v7446_v27  ;;  %458 = vmatprep.mubr.bf16.mxu1 %v10476_v1  ;;  %v7517_v27 = vld [vmem:[#allocation23 + $0x100] ss:$24 sps:$4 sm:$0xff]  }
  0xfd   :  { %1235 = vmatpush1.bf16.msra.mxu1 %v7444_v28  ;;  %v8866_v28 = vld [vmem:[#allocation23 + $0x1ec] ss:$24 sps:$4 sm:$0xff]  }
  0xfe   :  { %1236 = vmatprep.subr.bf16.mxu1 %v7450_v29  ;;  %v7526_v29 = vld [vmem:[#allocation23 + $0x134] ss:$24 sps:$4 sm:$0xff]  }
 0x100   :  { %6581 = vmatmul.mubr.msk.bf16.gmra.mrb[12].mxu0 %vm310_vm1, %v7447_v30  ;;  %6585 = vmatmul.mubr.msk.bf16.gmra.mrb[12].mxu1 %vm310_vm1, %v7447_v30  ;;  %v8870_v30 = vld [vmem:[#allocation23 + $0x1e8] ss:$24 sps:$4 sm:$0xff]  }
 0x101   :  { %1237 = vmatpush1.bf16.msra.mxu1 %v7448_v31  ;;  %678 = vmatprep.mubr.bf16.mxu0 %v10476_v1  ;;  %v7524_v31 = vld [vmem:[#allocation23 + $0x130] ss:$24 sps:$4 sm:$0xff]  }
 0x102   :  { %1238 = vmatprep.subr.bf16.mxu1 %v7456_v32  ;;  %6692 = vmatprep.mubr.msk.bf16.mxu1 %vm209_vm0, %v8793_v34  ;;  %v8872_v32 = vld [vmem:[#allocation23 + $0x21c] ss:$24 sps:$4 sm:$0xff]  }
 0x105   :  { %1239 = vmatpush1.bf16.msra.mxu1 %v7454_v35  ;;  %v7530_v35 = vld [vmem:[#allocation23 + $0x160] ss:$24 sps:$4 sm:$0xff]  }
 0x106   :  { %1240 = vmatprep.subr.bf16.mxu1 %v7463_v36  ;;  %v7535_v36 = vld [vmem:[#allocation23 + $0x194] ss:$24 sps:$4 sm:$0xff]  }
 0x108   :  { %6608 = vmatmul.mubr.msk.bf16.vlgmr.msra.gmra.mrb[16].mxu0 %vm633_vm2, %v7460_v38  ;;  %v8878_v38 = vld [vmem:[#allocation23 + $0x190] ss:$24 sps:$4 sm:$0xff]  }
 0x109   :  { %1266 = vmatpush1.bf16.msra.mxu0 %v8800_v37  ;;  %1241 = vmatpush1.bf16.msra.mxu1 %v7461_v39  ;;  %v8880_v39 = vld [vmem:[#allocation23 + $0x1c4] ss:$24 sps:$4 sm:$0xff]  }
 0x10a   :  { %1267 = vmatprep.subr.bf16.mxu0 %v8802_v40  ;;  %1242 = vmatprep.subr.bf16.mxu1 %v7469_v41  ;;  %v8883_v41 = vld [vmem:[#allocation23 + $0x1c0] ss:$24 sps:$4 sm:$0xff]  }
 0x10b   :  { %688 = vmatprep.mubr.bf16.mxu0 %v10476_v1 }
 0x10d   :  { %1268 = vmatpush1.bf16.msra.mxu0 %v8805_v42  ;;  %1243 = vmatpush1.bf16.msra.mxu1 %v7467_v43  ;;  %v8886_v43 = vld [vmem:[#allocation23 + $0x1f4] ss:$24 sps:$4 sm:$0xff]  }
 0x10e   :  { %1269 = vmatprep.subr.bf16.mxu0 %v8808_v44  ;;  %1244 = vmatprep.subr.bf16.mxu1 %v7475_v45  ;;  %v8892_v45 = vld [vmem:[#allocation23 + $0x1f0] ss:$24 sps:$4 sm:$0xff]  }
 0x110   :  { %6609 = vmatmul.mubr.msk.bf16.gmra.mrb[20].mxu0 %vm633_vm2, %v7494_v46  ;;  %v8894_v46 = vld [vmem:[#allocation23 + $0x224] ss:$24 sps:$4 sm:$0xff]  }
 0x111   :  { %1270 = vmatpush1.bf16.msra.mxu0 %v8813_v47  ;;  %1245 = vmatpush1.bf16.msra.mxu1 %v7473_v48 }
 0x112   :  { %1271 = vmatprep.subr.bf16.mxu0 %v8816_v49  ;;  %1246 = vmatprep.subr.bf16.mxu1 %v7481_v50 }
 0x113   :  { %698 = vmatprep.mubr.bf16.mxu0 %v10476_v1 }
 0x115   :  { %1272 = vmatpush1.bf16.msra.mxu0 %v8818_v51  ;;  %1247 = vmatpush1.bf16.msra.mxu1 %v7479_v52 }
 0x116   :  { %1273 = vmatprep.subr.bf16.mxu0 %v8823_v53  ;;  %1306 = vmatprep.subr.bf16.mxu1 %v7487_v54 }
 0x118   :  { %1257 = vmatmul.mubr.bf16.vlgmr.msra.gmra.mrb[16].mxu1 %v8477_v60  ;;  %6610 = vmatmul.mubr.msk.bf16.gmra.mrb[24].mxu0 %vm633_vm2, %v7507_v56 }
 0x119   :  { %1274 = vmatpush1.bf16.msra.mxu0 %v8825_v55  ;;  %1307 = vmatpush1.bf16.msra.mxu1 %v7485_v57 }
 0x11a   :  { %1275 = vmatprep.subr.bf16.mxu0 %v8830_v58  ;;  %1308 = vmatprep.subr.bf16.mxu1 %v7493_v59 }
 0x11b   :  { %708 = vmatprep.mubr.bf16.mxu0 %v10476_v1  ;;  %6694 = vmatprep.mubr.msk.bf16.mxu1 %vm209_vm0, %v8793_v34 }
 0x11d   :  { %1276 = vmatpush1.bf16.msra.mxu0 %v8833_v61  ;;  %1309 = vmatpush1.bf16.msra.mxu1 %v7491_v62 }
 0x11e   :  { %1277 = vmatprep.subr.bf16.mxu0 %v8838_v63  ;;  %1310 = vmatprep.subr.bf16.mxu1 %v7500_v0 }
 0x120   :  { %6611 = vmatmul.mubr.msk.bf16.gmra.mrb[28].mxu0 %vm633_vm2, %v7520_v6 }
 0x121   :  { %1278 = vmatpush1.bf16.msra.mxu0 %v8840_v2  ;;  %1311 = vmatpush1.bf16.msra.mxu1 %v7498_v3 }
 0x122   :  { %1279 = vmatprep.subr.bf16.mxu0 %v8845_v4  ;;  %1312 = vmatprep.subr.bf16.mxu1 %v7506_v5 }
 0x123   :  { %6693 = vmatprep.mubr.msk.bf16.mxu0 %vm209_vm0, %v8793_v34  ;;  %v7527_v34 = vld [vmem:[#allocation23 + $0x218] ss:$24 sps:$4 sm:$0xff]  }
 0x125   :  { %1280 = vmatpush1.bf16.msra.mxu0 %v8849_v7  ;;  %1313 = vmatpush1.bf16.msra.mxu1 %v7504_v8 }
 0x126   :  { %1281 = vmatprep.subr.bf16.mxu0 %v8851_v9  ;;  %1314 = vmatprep.subr.bf16.mxu1 %v7513_v10 }
 0x129   :  { %1282 = vmatpush1.bf16.msra.mxu0 %v8856_v11  ;;  %1315 = vmatpush1.bf16.msra.mxu1 %v7511_v17 }
 0x12a   :  { %1283 = vmatprep.subr.bf16.mxu0 %v8860_v20  ;;  %1316 = vmatprep.subr.bf16.mxu1 %v7519_v21 }
 0x12d   :  { %1284 = vmatpush1.bf16.msra.mxu0 %v8864_v25  ;;  %1317 = vmatpush1.bf16.msra.mxu1 %v7517_v27 }
 0x12e   :  { %1285 = vmatprep.subr.bf16.mxu0 %v8866_v28  ;;  %1318 = vmatprep.subr.bf16.mxu1 %v7526_v29 }
 0x131   :  { %1286 = vmatpush1.bf16.msra.mxu0 %v8870_v30  ;;  %1319 = vmatpush1.bf16.msra.mxu1 %v7524_v31 }
 0x132   :  { %1287 = vmatprep.subr.bf16.mxu0 %v8872_v32  ;;  %1320 = vmatprep.subr.bf16.mxu1 %v7532_v33 }
 0x135   :  { %1288 = vmatpush1.bf16.msra.mxu0 %v7527_v34  ;;  %1321 = vmatpush1.bf16.msra.mxu1 %v7530_v35 }
 0x136   :  { %1322 = vmatprep.subr.bf16.mxu1 %v7535_v36  ;;  %1891 = vmatprep.subr.bf16.mxu0 %v8748_v12  ;;  %v8900_v12 = vld [vmem:[#allocation23 + $0x220] ss:$24 sps:$4 sm:$0xff]  }
 0x138   :  { %1298 = vmatmul.mubr.bf16.vlgmr.msra.gmra.mrb[32].mxu0 %v8477_v60 }
 0x139   :  { %1323 = vmatpush1.bf16.msra.mxu1 %v8878_v38  ;;  %1892 = vmatpush1.bf16.msra.mxu0 %v8750_v13  ;;  %v10475_v13 = vlaneseq }
 0x13a   :  { %1324 = vmatprep.subr.bf16.mxu1 %v8880_v39  ;;  %1893 = vmatprep.subr.bf16.mxu0 %v8753_v14 }
 0x13b   :  { %v8935_v14 = vshrl.u32 %v10475_v13, 7  ;;  %v9241_v13 = vld [vmem:[#allocation23 + $0x1b4] ss:$24 sps:$4 sm:$0xff]  }
 0x13d   :  { %1325 = vmatpush1.bf16.msra.mxu1 %v8883_v41  ;;  %1894 = vmatpush1.bf16.msra.mxu0 %v8758_v15  ;;  %10513 = vst [vmem:[#allocation40_spill] sm:$0xff] %v8935_v14  ;;  %v240_v15 = vsub.s32 2, %v8935_v14 }
 0x13e   :  { %1326 = vmatprep.subr.bf16.mxu1 %v8886_v43  ;;  %1895 = vmatprep.subr.bf16.mxu0 %v8762_v16  ;;  %v232_v16 = vsub.s32 0, %v8935_v14 }
 0x141   :  { %1327 = vmatpush1.bf16.msra.mxu1 %v8892_v45  ;;  %1896 = vmatpush1.bf16.msra.mxu0 %v8766_v18  ;;  %v228_v18 = vld [vmem:[#allocation19] sm:$0xf] }
 0x142   :  { %1328 = vmatprep.subr.bf16.mxu1 %v8894_v46  ;;  %1897 = vmatprep.subr.bf16.mxu0 %v8769_v19  ;;  %v244_v19 = vsub.s32 3, %v8935_v14 }
 0x145   :  { %1329 = vmatpush1.bf16.msra.mxu1 %v8900_v12  ;;  %1898 = vmatpush1.bf16.msra.mxu0 %v8774_v22  ;;  %v236_v22 = vsub.s32 1, %v8935_v14  ;;  %v9253_v14 = vld [vmem:[#allocation23 + $0x1e4] ss:$24 sps:$4 sm:$0xff]  }
 0x146   :  { %1932 = vmatprep.subr.bf16.mxu1 %v8781_v24  ;;  %1899 = vmatprep.subr.bf16.mxu0 %v8778_v23  ;;  %v8941_v23 = vrot.slane %v228_v18, %v240_v15  ;;  %v8945_v24 = vrot.slane %v228_v18, %v232_v16 }
 0x148   :  { %1339 = vmatmul.mubr.bf16.vlgmr.msra.gmra.mrb[20].mxu1 %v8477_v60 }
 0x149   :  { %1933 = vmatpush1.bf16.msra.mxu1 %v8800_v37  ;;  %1900 = vmatpush1.bf16.msra.mxu0 %v8784_v26  ;;  %v8947_v26 = vrot.slane %v228_v18, %v244_v19  ;;  %v8951_v37 = vrot.slane %v228_v18, %v236_v22 }
 0x14a   :  { %1934 = vmatprep.subr.bf16.mxu1 %v8802_v40 }
 0x14d   :  { %1935 = vmatpush1.bf16.msra.mxu1 %v8805_v42 }
 0x14e   :  { %1936 = vmatprep.subr.bf16.mxu1 %v8808_v44 }
 0x151   :  { %1937 = vmatpush1.bf16.msra.mxu1 %v8813_v47 }
 0x152   :  { %1938 = vmatprep.subr.bf16.mxu1 %v8816_v49 }
 0x155   :  { %1939 = vmatpush1.bf16.msra.mxu1 %v8818_v51 }
 0x156   :  { %1940 = vmatprep.subr.bf16.mxu1 %v8823_v53 }
 0x159   :  { %1941 = vmatpush1.bf16.msra.mxu1 %v8825_v55 }
 0x15a   :  { %1942 = vmatprep.subr.bf16.mxu1 %v8830_v58 }
 0x15d   :  { %1943 = vmatpush1.bf16.msra.mxu1 %v8833_v61 }
 0x15e   :  { %1944 = vmatprep.subr.bf16.mxu1 %v8838_v63 }
 0x161   :  { %1945 = vmatpush1.bf16.msra.mxu1 %v8840_v2 }
 0x162   :  { %1946 = vmatprep.subr.bf16.mxu1 %v8845_v4 }
 0x165   :  { %1947 = vmatpush1.bf16.msra.mxu1 %v8849_v7 }
 0x166   :  { %1948 = vmatprep.subr.bf16.mxu1 %v8851_v9 }
 0x169   :  { %1949 = vmatpush1.bf16.msra.mxu1 %v8856_v11 }
 0x16a   :  { %1950 = vmatprep.subr.bf16.mxu1 %v8860_v20 }
 0x16d   :  { %1951 = vmatpush1.bf16.msra.mxu1 %v8864_v25 }
 0x16e   :  { %1952 = vmatprep.subr.bf16.mxu1 %v8866_v28 }
 0x171   :  { %1953 = vmatpush1.bf16.msra.mxu1 %v8870_v30 }
 0x172   :  { %1954 = vmatprep.subr.bf16.mxu1 %v8872_v32 }
 0x175   :  { %1955 = vmatpush1.bf16.msra.mxu1 %v7527_v34 }
 0x1bb   :  { %v430_v40 = vpop.f32.mrb[0].mxu1  ;;  %v357_v42 = vpop.f32.mrb[0].mxu0 }
 0x1bc   :  { %v431_v44 = vadd.f32 %v430_v40, %v8941_v23  ;;  %v432_v47 = vpop.f32.mrb[1].mxu1  ;;  %v358_v48 = vadd.f32 %v357_v42, %v8945_v24  ;;  %v359_v49 = vpop.f32.mrb[1].mxu0 }
 0x1bd   :  { %v433_v50 = vadd.f32 %v432_v47, %v8947_v26  ;;  %v434_v51 = vpop.f32.mrb[2].mxu1  ;;  %v360_v52 = vadd.f32 %v359_v49, %v8951_v37  ;;  %v361_v53 = vpop.f32.mrb[2].mxu0 }
 0x1be   :  { %v435_v54 = vadd.f32 %v434_v51, %v8941_v23  ;;  %v436_v55 = vpop.f32.mrb[3].mxu1  ;;  %v362_v56 = vadd.f32 %v361_v53, %v8945_v24  ;;  %v363_v57 = vpop.f32.mrb[3].mxu0 }
 0x1bf   :  { %v8959_v58 = vpack.c.bf16 %v433_v50, %v431_v44  ;;  %v437_v59 = vadd.f32 %v436_v55, %v8947_v26  ;;  %v8962_v60 = vpack.c.bf16 %v360_v52, %v358_v48  ;;  %v364_v61 = vadd.f32 %v363_v57, %v8951_v37 }
 0x1c1   :  { %v8965_v62 = vpack.c.bf16 %v437_v59, %v435_v54  ;;  %v8967_v63 = vpack.c.bf16 %v364_v61, %v362_v56 }
 0x1c3   :  { %v440_v0 = vpop.f32.mrb[4].mxu1  ;;  %v367_v2 = vpop.f32.mrb[4].mxu0 }
 0x1c4   :  { %v441_v3 = vadd.f32 %v440_v0, %v8941_v23  ;;  %v442_v4 = vpop.f32.mrb[5].mxu1  ;;  %v368_v5 = vadd.f32 %v367_v2, %v8945_v24  ;;  %v369_v6 = vpop.f32.mrb[5].mxu0 }
 0x1c5   :  { %v443_v7 = vadd.f32 %v442_v4, %v8947_v26  ;;  %v444_v8 = vpop.f32.mrb[6].mxu1  ;;  %v370_v9 = vadd.f32 %v369_v6, %v8951_v37  ;;  %v371_v10 = vpop.f32.mrb[6].mxu0 }
 0x1c6   :  { %v445_v11 = vadd.f32 %v444_v8, %v8941_v23  ;;  %v446_v17 = vpop.f32.mrb[7].mxu1  ;;  %v372_v20 = vadd.f32 %v371_v10, %v8945_v24  ;;  %v373_v21 = vpop.f32.mrb[7].mxu0 }
 0x1c7   :  { %v8975_v25 = vpack.c.bf16 %v443_v7, %v441_v3  ;;  %v447_v27 = vadd.f32 %v446_v17, %v8947_v26  ;;  %v8978_v28 = vpack.c.bf16 %v370_v9, %v368_v5  ;;  %v374_v29 = vadd.f32 %v373_v21, %v8951_v37  ;;  %v591_v7 = vld [vmem:[#allocation22] sm:$0x3] }
 0x1c9   :  { %v8981_v30 = vpack.c.bf16 %v447_v27, %v445_v11  ;;  %v8983_v31 = vpack.c.bf16 %v374_v29, %v372_v20  ;;  %v596_v29 = vrot.slane %v591_v7, %v232_v16 }
 0x1cb   :  { %10514 = vst [vmem:[#allocation41_spill] sm:$0xff] %v8981_v30  ;;  %10515 = vst [vmem:[#allocation42_spill] sm:$0xff] %v8983_v31  ;;  %v450_v32 = vpop.f32.mrb[8].mxu1  ;;  %v377_v33 = vpop.f32.mrb[8].mxu0 }
 0x1cc   :  { %v451_v34 = vadd.f32 %v450_v32, %v8941_v23  ;;  %v452_v35 = vpop.f32.mrb[9].mxu1  ;;  %v378_v36 = vadd.f32 %v377_v33, %v8945_v24  ;;  %v379_v15 = vpop.f32.mrb[9].mxu0 }
 0x1cd   :  { %v453_v18 = vadd.f32 %v452_v35, %v8947_v26  ;;  %v454_v19 = vpop.f32.mrb[10].mxu1  ;;  %v380_v40 = vadd.f32 %v379_v15, %v8951_v37  ;;  %v381_v42 = vpop.f32.mrb[10].mxu0 }
 0x1ce   :  { %v455_v44 = vadd.f32 %v454_v19, %v8941_v23  ;;  %v456_v47 = vpop.f32.mrb[11].mxu1  ;;  %v382_v48 = vadd.f32 %v381_v42, %v8945_v24  ;;  %v383_v49 = vpop.f32.mrb[11].mxu0 }
 0x1cf   :  { %v8991_v50 = vpack.c.bf16 %v453_v18, %v451_v34  ;;  %v457_v51 = vadd.f32 %v456_v47, %v8947_v26  ;;  %v8994_v52 = vpack.c.bf16 %v380_v40, %v378_v36  ;;  %v384_v53 = vadd.f32 %v383_v49, %v8951_v37 }
 0x1d1   :  { %10516 = vst [vmem:[#allocation43_spill] sm:$0xff] %v8991_v50  ;;  %10517 = vst [vmem:[#allocation44_spill] sm:$0xff] %v8994_v52  ;;  %v8997_v54 = vpack.c.bf16 %v457_v51, %v455_v44  ;;  %v8999_v55 = vpack.c.bf16 %v384_v53, %v382_v48  ;;  %v9285_v50 = vld [vmem:[#allocation23 + $0x218] ss:$24 sps:$4 sm:$0xff]  }
 0x1d3   :  { %10518 = vst [vmem:[#allocation45_spill] sm:$0xff] %v8997_v54  ;;  %10519 = vst [vmem:[#allocation46_spill] sm:$0xff] %v8999_v55  ;;  %v460_v56 = vpop.f32.mrb[12].mxu1  ;;  %v387_v57 = vpop.f32.mrb[12].mxu0  ;;  %v9280_v55 = vld [vmem:[#allocation23 + $0x210] ss:$24 sps:$4 sm:$0xff]  }
 0x1d4   :  { %v461_v59 = vadd.f32 %v460_v56, %v8941_v23  ;;  %v462_v61 = vpop.f32.mrb[13].mxu1  ;;  %v388_v0 = vadd.f32 %v387_v57, %v8945_v24  ;;  %v389_v2 = vpop.f32.mrb[13].mxu0  ;;  %v1349_v56 = vunpack.c.l.bf16 %v8962_v60  ;;  %v1350_v57 = vunpack.c.h.bf16 %v8962_v60 }
 0x1d5   :  { %v463_v3 = vadd.f32 %v462_v61, %v8947_v26  ;;  %v464_v4 = vpop.f32.mrb[14].mxu1  ;;  %v390_v5 = vadd.f32 %v389_v2, %v8951_v37  ;;  %v391_v6 = vpop.f32.mrb[14].mxu0 }
 0x1d6   :  { %v465_v8 = vadd.f32 %v464_v4, %v8941_v23  ;;  %v466_v9 = vpop.f32.mrb[15].mxu1  ;;  %v392_v10 = vadd.f32 %v391_v6, %v8945_v24  ;;  %v393_v11 = vpop.f32.mrb[15].mxu0  ;;  %v600_v23 = vrot.slane %v591_v7, %v236_v22 }
 0x1d7   :  { %v9007_v17 = vpack.c.bf16 %v463_v3, %v461_v59  ;;  %v467_v20 = vadd.f32 %v466_v9, %v8947_v26  ;;  %v9010_v21 = vpack.c.bf16 %v390_v5, %v388_v0  ;;  %v394_v27 = vadd.f32 %v393_v11, %v8951_v37 }
 0x1d9   :  { %10520 = vst [vmem:[#allocation47_spill] sm:$0xff] %v9007_v17  ;;  %10521 = vst [vmem:[#allocation48_spill] sm:$0xff] %v9010_v21  ;;  %v9015_v32 = vpack.c.bf16 %v467_v20, %v465_v8  ;;  %v9017_v33 = vpack.c.bf16 %v394_v27, %v392_v10 }
 0x1db   :  { %10522 = vst [vmem:[#allocation49_spill] sm:$0xff] %v9015_v32  ;;  %10523 = vst [vmem:[#allocation50_spill] sm:$0xff] %v9017_v33  ;;  %v680_v24 = vpop.f32.mrb[16].mxu0  ;;  %v9259_v32 = vld [vmem:[#allocation23 + $0x1e0] ss:$24 sps:$4 sm:$0xff]  }
 0x1dc   :  { %v681_v34 = vadd.f32 %v680_v24, %v596_v29  ;;  %v682_v35 = vpop.f32.mrb[17].mxu0  ;;  %v9263_v33 = vld [vmem:[#allocation23 + $0x1e8] ss:$24 sps:$4 sm:$0xff]  }
 0x1dd   :  { %v683_v36 = vadd.f32 %v682_v35, %v600_v23  ;;  %v684_v15 = vpop.f32.mrb[18].mxu0 }
 0x1de   :  { %v685_v26 = vadd.f32 %v684_v15, %v596_v29  ;;  %v686_v18 = vpop.f32.mrb[19].mxu0 }
 0x1df   :  { %v9021_v19 = vpack.c.bf16 %v683_v36, %v681_v34  ;;  %v687_v37 = vadd.f32 %v686_v18, %v600_v23 }
 0x1e1   :  { %v9023_v40 = vpack.c.bf16 %v687_v37, %v685_v26 }
 0x1e3   :  { %v690_v16 = vpop.f32.mrb[20].mxu0 }
 0x1e4   :  { %v691_v42 = vadd.f32 %v690_v16, %v596_v29  ;;  %v692_v44 = vpop.f32.mrb[21].mxu0 }
 0x1e5   :  { %v693_v47 = vadd.f32 %v692_v44, %v600_v23  ;;  %v694_v48 = vpop.f32.mrb[22].mxu0 }
 0x1e6   :  { %v695_v49 = vadd.f32 %v694_v48, %v596_v29  ;;  %v696_v51 = vpop.f32.mrb[23].mxu0 }
 0x1e7   :  { %v9025_v22 = vpack.c.bf16 %v693_v47, %v691_v42  ;;  %v697_v53 = vadd.f32 %v696_v51, %v600_v23 }
 0x1e9   :  { %v9029_v59 = vpack.c.bf16 %v697_v53, %v695_v49 }
 0x1eb   :  { %10524 = vst [vmem:[#allocation51_spill] sm:$0xff] %v9029_v59  ;;  %v1258_v61 = vpop.f32.mrb[16].mxu1  ;;  %v700_v0 = vpop.f32.mrb[24].mxu0 }
 0x1ec   :  { %v1353_v2 = vadd.f32 %v1349_v56, %v1258_v61  ;;  %v1260_v3 = vpop.f32.mrb[17].mxu1  ;;  %v701_v4 = vadd.f32 %v700_v0, %v596_v29  ;;  %v702_v5 = vpop.f32.mrb[25].mxu0  ;;  %v1352_v0 = vunpack.c.h.bf16 %v8959_v58 }
 0x1ed   :  { %v1354_v6 = vadd.f32 %v1350_v57, %v1260_v3  ;;  %v1262_v7 = vpop.f32.mrb[18].mxu1  ;;  %v703_v8 = vadd.f32 %v702_v5, %v600_v23  ;;  %v704_v9 = vpop.f32.mrb[26].mxu0  ;;  %v1351_v57 = vunpack.c.l.bf16 %v8959_v58 }
 0x1ee   :  { %v1263_v10 = vpop.f32.mrb[19].mxu1  ;;  %v705_v11 = vadd.f32 %v704_v9, %v596_v29  ;;  %v706_v20 = vpop.f32.mrb[27].mxu0  ;;  %v6695_v47 = vmul.f32 -1.442695, %v1353_v2  ;;  %v1358_v7 = vunpack.c.l.bf16 %v9021_v19  ;;  %v1359_v9 = vunpack.c.h.bf16 %v9021_v19 }
 0x1ef   :  { %v9031_v27 = vpack.c.bf16 %v703_v8, %v701_v4  ;;  %v707_v24 = vadd.f32 %v706_v20, %v600_v23  ;;  %v6696_v44 = vmul.f32 -1.442695, %v1354_v6 }
 0x1f1   :  { %10525 = vst [vmem:[#allocation52_spill] sm:$0xff] %v9031_v27  ;;  %v9033_v34 = vpack.c.bf16 %v707_v24, %v705_v11  ;;  %7898 = vpow2.f32 %v6696_v44  ;;  %v9282_v27 = vld [vmem:[#allocation23 + $0x21c] ss:$24 sps:$4 sm:$0xff]  }
 0x1f2   :  { %7900 = vpow2.f32 %v6695_v47 }
 0x1f3   :  { %10526 = vst [vmem:[#allocation53_spill] sm:$0xff] %v9033_v34  ;;  %v710_v60 = vpop.f32.mrb[28].mxu0  ;;  %v9276_v34 = vld [vmem:[#allocation23 + $0x214] ss:$24 sps:$4 sm:$0xff]  }
 0x1f4   :  { %v711_v35 = vadd.f32 %v710_v60, %v596_v29  ;;  %v712_v36 = vpop.f32.mrb[29].mxu0 }
 0x1f5   :  { %v713_v15 = vadd.f32 %v712_v36, %v600_v23  ;;  %v714_v26 = vpop.f32.mrb[30].mxu0 }
 0x1f6   :  { %v715_v18 = vadd.f32 %v714_v26, %v596_v29  ;;  %v716_v37 = vpop.f32.mrb[31].mxu0  ;;  %v779_v26 = vld [vmem:[#allocation16] sm:$0xff] }
 0x1f7   :  { %v9035_v16 = vpack.c.bf16 %v713_v15, %v711_v35  ;;  %v717_v42 = vadd.f32 %v716_v37, %v600_v23 }
 0x1f9   :  { %10527 = vst [vmem:[#allocation54_spill] sm:$0xff] %v9035_v16  ;;  %v9037_v48 = vpack.c.bf16 %v717_v42, %v715_v18  ;;  %v780_v18 = vand.u32 1, %v779_v26  ;;  %v778_v42 = vld [vmem:[#allocation9] sm:$0xff] }
 0x1fb   :  { %10528 = vst [vmem:[#allocation55_spill] sm:$0xff] %v9037_v48  ;;  %v7899_v49 = vpop.eup %7898  ;;  %vm781_vm3 = vcmp.gt.s32.totalorder %v780_v18, 0  ;;  %v9256_v48 = vld [vmem:[#allocation23 + $0x1ec] ss:$24 sps:$4 sm:$0xff]  }
 0x1fc   :  { %v7901_v51 = vpop.eup %7900  ;;  %v1372_v53 = vadd.f32 1.0, %v7899_v49  ;;  %v1420_v19 = vsel %vm781_vm3, 1, %v10476_v1 }
 0x1fd   :  { %v1371_v56 = vadd.f32 1.0, %v7901_v51  ;;  %v782_v51 = vand.u32 2, %v779_v26 }
 0x1fe   :  { %7902 = vrcp.f32 %v1372_v53 }
 0x1ff   :  { %7904 = vrcp.f32 %v1371_v56  ;;  %vm783_vm4 = vcmp.gt.s32.totalorder %v782_v51, 0 }
 0x208   :  { %v7903_v5 = vpop.eup %7902 }
 0x209   :  { %v7905_v6 = vpop.eup %7904  ;;  %v1381_v10 = vmul.f32 0.0, %v7903_v5  ;;  %v9069_v5 = vld [vmem:[#allocation23 + $0x150] ss:$24 sps:$4 sm:$0xff]  }
 0x20b   :  { %v1299_v61 = vpop.f32.mrb[32].mxu0 }
 0x20c   :  { %v9041_v29 = vadd.f32 %v1351_v57, %v1299_v61  ;;  %v1301_v3 = vpop.f32.mrb[33].mxu0  ;;  %v1427_v61 = vsel %vm783_vm4, 1, %v10476_v1 }
 0x20d   :  { %v1356_v23 = vadd.f32 %v1352_v0, %v1301_v3  ;;  %v1303_v4 = vpop.f32.mrb[34].mxu0  ;;  %v9055_v0 = vld [vmem:[#allocation23 + $0xf0] ss:$24 sps:$4 sm:$0xff]   ;;  %v9057_v3 = vld [vmem:[#allocation23 + $0xf4] ss:$24 sps:$4 sm:$0xff]  }
 0x20e   :  { %v1304_v2 = vpop.f32.mrb[35].mxu0  ;;  %1901 = vmatprep.subr.bf16.mxu0 %v9057_v3  ;;  %v9063_v4 = vld [vmem:[#allocation23 + $0x120] ss:$24 sps:$4 sm:$0xff]  }
 0x20f   :  { %7906 = vtanh.f32 %v1356_v23  ;;  %v9059_v23 = vld [vmem:[#allocation23 + $0x124] ss:$24 sps:$4 sm:$0xff]   ;;  %1902 = vmatpush1.bf16.msra.mxu0 %v9055_v0  ;;  %v9066_v2 = vld [vmem:[#allocation23 + $0x154] ss:$24 sps:$4 sm:$0xff]  }
 0x210   :  { %1903 = vmatprep.subr.bf16.mxu0 %v9059_v23 }
 0x213   :  { %1904 = vmatpush1.bf16.msra.mxu0 %v9063_v4 }
 0x214   :  { %1905 = vmatprep.subr.bf16.mxu0 %v9066_v2 }
 0x217   :  { %1906 = vmatpush1.bf16.msra.mxu0 %v9069_v5 }
 0x219   :  { %v7907_v8 = vpop.eup %7906 }
 0x21a   :  { %v1382_v11 = vmul.f32 %v7907_v8, %v7905_v6  ;;  %v8122_v6 = vld [vmem:[#allocation23 + $0x184] ss:$24 sps:$4 sm:$0xff]   ;;  %v8124_v8 = vld [vmem:[#allocation23 + $0x1b4] ss:$24 sps:$4 sm:$0xff]  }
 0x21b   :  { %v1340_v20 = vpop.f32.mrb[20].mxu1  ;;  %1907 = vmatprep.subr.bf16.mxu0 %v8122_v6 }
 0x21c   :  { %v1360_v58 = vadd.f32 %v1358_v7, %v1340_v20  ;;  %v1342_v24 = vpop.f32.mrb[21].mxu1  ;;  %v9045_v60 = vadd.f32 %v1382_v11, %v1381_v10  ;;  %v8123_v7 = vld [vmem:[#allocation23 + $0x180] ss:$24 sps:$4 sm:$0xff]   ;;  %v8126_v10 = vld [vmem:[#allocation23 + $0x1e4] ss:$24 sps:$4 sm:$0xff]  }
 0x21d   :  { %v9047_v35 = vadd.f32 %v1359_v9, %v1342_v24  ;;  %v1344_v36 = vpop.f32.mrb[22].mxu1  ;;  %1908 = vmatpush1.bf16.msra.mxu0 %v8123_v7  ;;  %v8125_v9 = vld [vmem:[#allocation23 + $0x1b0] ss:$24 sps:$4 sm:$0xff]   ;;  %v8127_v11 = vld [vmem:[#allocation23 + $0x1e0] ss:$24 sps:$4 sm:$0xff]  }
 0x21e   :  { %v1345_v15 = vpop.f32.mrb[23].mxu1  ;;  %v6698_v44 = vmul.f32 -1.442695, %v1360_v58  ;;  %1909 = vmatprep.subr.bf16.mxu0 %v8124_v8  ;;  %v8128_v20 = vld [vmem:[#allocation23 + $0x214] ss:$24 sps:$4 sm:$0xff]   ;;  %v8131_v8 = vld [vmem:[#allocation8] sm:$0xff] }
 0x21f   :  { %7908 = vtanh.f32 %v9047_v35  ;;  %v8129_v58 = vld [vmem:[#allocation23 + $0x210] ss:$24 sps:$4 sm:$0xff]   ;;  %v8130_v24 = vld [vmem:[#allocation23 + $0x14] ss:$24 sps:$4 sm:$0xff]  }
 0x220   :  { %7910 = vpow2.f32 %v6698_v44 }
 0x221   :  { %1910 = vmatpush1.bf16.msra.mxu0 %v8125_v9 }
 0x222   :  { %1911 = vmatprep.subr.bf16.mxu0 %v8126_v10 }
 0x225   :  { %1912 = vmatpush1.bf16.msra.mxu0 %v8127_v11 }
 0x226   :  { %1913 = vmatprep.subr.bf16.mxu0 %v8128_v20 }
 0x229   :  { %v7909_v37 = vpop.eup %7908  ;;  %1914 = vmatpush1.bf16.msra.mxu0 %v8129_v58  ;;  %v8132_v58 = vld [vmem:[#allocation23 + $0x10] ss:$24 sps:$4 sm:$0xff]  }
 0x22a   :  { %1405 = vrot.lane.b32.xlu0 %v7909_v37, %s8457_s21  ;;  %v7911_v47 = vpop.eup %7910  ;;  %1973 = vmatprep.subr.bf16.mxu0 %v8130_v24  ;;  %v8133_v24 = vld [vmem:[#allocation23 + $0x44] ss:$24 sps:$4 sm:$0xff]  }
 0x22b   :  { %v1392_v49 = vadd.f32 1.0, %v7911_v47 }
 0x22d   :  { %7912 = vrcp.f32 %v1392_v49 }
 0x22e   :  { %1400 = vrot.lane.b32.xlu0 %v778_v42, %s8457_s21  ;;  %v6697_v42 = vmul.f32 -1.442695, %v9041_v29 }
 0x232   :  { %1422 = vperm.xlu0 %7413, %v1420_v19   ;;  %v6699_v19 = vmul.f32 -1.442695, %v9047_v35 }
 0x237   :  { %v7913_v53 = vpop.eup %7912 }
 0x29c   :  { %v1406_v56 = vpop.permute.xlu0 %1405 }
 0x29d   :  { %v1408_v57 = vmul.f32 %v7913_v53, %v1406_v56 }
 0x29f   :  { %1410 = vrot.lane.b32.xlu1 %v1408_v57, %s8457_s21 }
 0x2a0   :  { %v9073_v36 = vpop.permute.xlu0 %1400 }
 0x2a1   :  { %v1403_v15 = vmul.f32 %v7913_v53, %v9073_v36 }
 0x2a3   :  { %1429 = vperm.xlu1 %7412, %v1427_v61  }
 0x2b1   :  { %v9085_v6 = vpop.permute.xlu0 %1422 }
 0x2b2   :  { %vm1424_vm6 = vcmp.eq.s32.totalorder %v9085_v6, 1 }
 0x2b3   :  { %vm9098_vm7 = vmpackc.low %vm1424_vm6, %vm1424_vm6 }
 0x311   :  { %v1411_v26 = vpop.permute.xlu1 %1410 }
 0x312   :  { %v9076_v18 = vadd.f32 %v1411_v26, %v1403_v15  ;;  %v8134_v15 = vld [vmem:[#allocation23 + $0x40] ss:$24 sps:$4 sm:$0xff]   ;;  %v8135_v26 = vld [vmem:[#allocation23 + $0x74] ss:$24 sps:$4 sm:$0xff]  }
 0x314   :  { %7914 = vtanh.f32 %v9076_v18 }
 0x315   :  { %7916 = vpow2.f32 %v6697_v42  ;;  %v8137_v42 = vld [vmem:[#allocation23 + $0xa4] ss:$24 sps:$4 sm:$0xff]  }
 0x316   :  { %7918 = vpow2.f32 %v6699_v19  ;;  %v8138_v19 = vld [vmem:[#allocation23 + $0xa0] ss:$24 sps:$4 sm:$0xff]  }
 0x31e   :  { %v7915_v37 = vpop.eup %7914 }
 0x31f   :  { %1416 = vrot.lane.b32.xlu1 %v7915_v37, %s8457_s21  ;;  %v7917_v44 = vpop.eup %7916  ;;  %v8136_v37 = vld [vmem:[#allocation23 + $0x70] ss:$24 sps:$4 sm:$0xff]  }
 0x320   :  { %v7919_v47 = vpop.eup %7918  ;;  %v1373_v49 = vadd.f32 1.0, %v7917_v44  ;;  %v8139_v44 = vld [vmem:[#allocation23 + $0xd4] ss:$24 sps:$4 sm:$0xff]  }
 0x321   :  { %v1393_v51 = vadd.f32 1.0, %v7919_v47  ;;  %v8140_v47 = vld [vmem:[#allocation23 + $0xd0] ss:$24 sps:$4 sm:$0xff]  }
 0x322   :  { %7920 = vrcp.f32 %v1373_v49  ;;  %v9083_v53 = vpop.permute.xlu1 %1429  ;;  %v8141_v49 = vld [vmem:[#allocation23 + $0x104] ss:$24 sps:$4 sm:$0xff]  }
 0x323   :  { %7922 = vtanh.f32 %v9045_v60  ;;  %vm1431_vm5 = vcmp.eq.s32.totalorder %v9083_v53, 1 }
 0x324   :  { %7924 = vrcp.f32 %v1393_v51  ;;  %v8142_v51 = vld [vmem:[#allocation23 + $0x100] ss:$24 sps:$4 sm:$0xff]   ;;  %v9272_v16 = vsel %vm1431_vm5, %v9076_v18, %v9073_v36  ;;  %v9291_v36 = vld [vmem:[#allocation23 + $0x14] ss:$24 sps:$4 sm:$0xff]  }
 0x32c   :  { %v7921_v56 = vpop.eup %7920 }
 0x32d   :  { %v7923_v57 = vpop.eup %7922 }
 0x32e   :  { %v7925_v61 = vpop.eup %7924  ;;  %v9087_v7 = vmul.f32 %v7923_v57, %v7921_v56  ;;  %v8143_v56 = vld [vmem:[#allocation23 + $0x134] ss:$24 sps:$4 sm:$0xff]   ;;  %v8144_v57 = vld [vmem:[#allocation23 + $0x130] ss:$24 sps:$4 sm:$0xff]  }
 0x330   :  { %v7312_v20 = vpack.c.bf16 %v9087_v7, %v9087_v7 }
 0x391   :  { %v1417_v29 = vpop.permute.xlu1 %1416 }
 0x392   :  { %v1419_v35 = vmul.f32 %v7925_v61, %v1417_v29  ;;  %v8145_v61 = vld [vmem:[#allocation23 + $0x164] ss:$24 sps:$4 sm:$0xff]   ;;  %v8146_v29 = vld [vmem:[#allocation23 + $0x160] ss:$24 sps:$4 sm:$0xff]  }
 0x394   :  { %v9093_v9 = vsel %vm1431_vm5, %v1419_v35, %v8131_v8  ;;  %v8147_v35 = vld [vmem:[#allocation23 + $0x194] ss:$24 sps:$4 sm:$0xff]   ;;  %v2017_v8 = vunpack.c.l.bf16 %v8967_v63 }
 0x395   :  { %10529 = vst [vmem:[#allocation56_spill] sm:$0xff] %v9093_v9  ;;  %v1455_v11 = vpack.c.bf16 %v9093_v9, %v9093_v9 }
 0x397   :  { %6772 = vmatprep.mubr.msk.bf16.mxu0 %vm209_vm0, %v1455_v11  ;;  %6773 = vmatprep.mubr.msk.bf16.mxu1 %vm209_vm0, %v1455_v11 }
 0x398   :  { %7313 = vmatmul.mubr.msk.bf16.vlgmr.msra.gmra.mrb[36].mxu0 %vm9098_vm7, %v7312_v20  ;;  %7316 = vmatmul.mubr.msk.bf16.vlgmr.msra.gmra.mrb[24].mxu1 %vm9098_vm7, %v7312_v20 }
 0x399   :  { %1974 = vmatpush1.bf16.msra.mxu0 %v8132_v58  ;;  %6774 = vmatprep.mubr.msk.bf16.mxu0 %vm209_vm0, %v1455_v11  ;;  %v2019_v11 = vunpack.c.l.bf16 %v8965_v62 }
 0x39a   :  { %1975 = vmatprep.subr.bf16.mxu0 %v8133_v24 }
 0x39d   :  { %1976 = vmatpush1.bf16.msra.mxu0 %v8134_v15 }
 0x39e   :  { %1977 = vmatprep.subr.bf16.mxu0 %v8135_v26 }
 0x3a1   :  { %1978 = vmatpush1.bf16.msra.mxu0 %v8136_v37 }
 0x3a2   :  { %1979 = vmatprep.subr.bf16.mxu0 %v8137_v42 }
 0x3a5   :  { %1980 = vmatpush1.bf16.msra.mxu0 %v8138_v19 }
 0x3a6   :  { %1981 = vmatprep.subr.bf16.mxu0 %v8139_v44 }
 0x3a9   :  { %1982 = vmatpush1.bf16.msra.mxu0 %v8140_v47 }
 0x3aa   :  { %1983 = vmatprep.subr.bf16.mxu0 %v8141_v49 }
 0x3ad   :  { %1984 = vmatpush1.bf16.msra.mxu0 %v8142_v51 }
 0x3ae   :  { %1985 = vmatprep.subr.bf16.mxu0 %v8143_v56 }
 0x3b1   :  { %1986 = vmatpush1.bf16.msra.mxu0 %v8144_v57 }
 0x3b2   :  { %1987 = vmatprep.subr.bf16.mxu0 %v8145_v61  ;;  %v9131_v61 = vsel %vm1424_vm6, %v9045_v60, 0.0 }
 0x3b5   :  { %1988 = vmatpush1.bf16.msra.mxu0 %v8146_v29 }
 0x3b6   :  { %1989 = vmatprep.subr.bf16.mxu0 %v8147_v35 }
 0x3b9   :  { %1990 = vmatpush1.bf16.msra.mxu0 %v8878_v38 }
 0x3ba   :  { %1991 = vmatprep.subr.bf16.mxu0 %v8880_v39  ;;  %v2018_v39 = vunpack.c.h.bf16 %v8967_v63 }
 0x3bd   :  { %1992 = vmatpush1.bf16.msra.mxu0 %v8883_v41  ;;  %v2020_v41 = vunpack.c.h.bf16 %v8965_v62 }
 0x3be   :  { %1993 = vmatprep.subr.bf16.mxu0 %v8886_v43 }
 0x3c1   :  { %1994 = vmatpush1.bf16.msra.mxu0 %v8892_v45 }
 0x3c2   :  { %1995 = vmatprep.subr.bf16.mxu0 %v8894_v46 }
 0x3c5   :  { %1996 = vmatpush1.bf16.msra.mxu0 %v8900_v12 }
 0x3c8   :  { %7319 = vmatmul.mubr.msk.bf16.vlgmr.msra.gmra.mrb[40].mxu0 %vm9098_vm7, %v7312_v20 }
 0x46b   :  { %v1925_v38 = vpop.f32.mrb[36].mxu0  ;;  %v1966_v58 = vpop.f32.mrb[24].mxu1 }
 0x46c   :  { %v2021_v43 = vadd.f32 %v2017_v8, %v1925_v38  ;;  %v9126_v24 = vadd.f32 %v2019_v11, %v1966_v58  ;;  %v1927_v45 = vpop.f32.mrb[37].mxu0  ;;  %v1968_v46 = vpop.f32.mrb[25].mxu1  ;;  %v2027_v8 = vunpack.c.l.bf16 %v9023_v40  ;;  %v2028_v38 = vunpack.c.h.bf16 %v9023_v40 }
 0x46d   :  { %v2022_v15 = vadd.f32 %v2018_v39, %v1927_v45  ;;  %v2024_v12 = vadd.f32 %v2020_v41, %v1968_v46  ;;  %v1929_v26 = vpop.f32.mrb[38].mxu0  ;;  %v1970_v10 = vpop.f32.mrb[26].mxu1  ;;  %v1447_v46 = vld [vmem:[#allocation16 + $0x8] sm:$0xff] }
 0x46e   :  { %v6775_v20 = vmul.f32 -1.442695, %v2021_v43  ;;  %v1930_v37 = vpop.f32.mrb[39].mxu0  ;;  %v1971_v42 = vpop.f32.mrb[27].mxu1  ;;  %v1450_v60 = vand.u32 2, %v1447_v46 }
 0x46f   :  { %v6776_v19 = vmul.f32 -1.442695, %v2022_v15 }
 0x470   :  { %7926 = vpow2.f32 %v6775_v20  ;;  %vm1451_vm8 = vcmp.gt.s32.totalorder %v1450_v60, 0  ;;  %v1448_v20 = vand.u32 1, %v1447_v46  ;;  %v9191_v46 = vld [vmem:[#allocation23 + $0x98] ss:$24 sps:$4 sm:$0xff]   ;;  %v9193_v60 = vld [vmem:[#allocation23 + $0xc4] ss:$24 sps:$4 sm:$0xff]  }
 0x471   :  { %7928 = vpow2.f32 %v6776_v19 }
 0x472   :  { %7930 = vtanh.f32 %v2024_v12  ;;  %v2092_v12 = vsel %vm1451_vm8, 1, %v10476_v1  ;;  %vm1449_vm9 = vcmp.gt.s32.totalorder %v1448_v20, 0  ;;  %v9214_v20 = vld [vmem:[#allocation23 + $0x12c] ss:$24 sps:$4 sm:$0xff]  }
 0x47a   :  { %v7927_v44 = vpop.eup %7926 }
 0x47b   :  { %v2040_v47 = vadd.f32 1.0, %v7927_v44  ;;  %v7929_v63 = vpop.eup %7928  ;;  %v2085_v44 = vsel %vm1449_vm9, 1, %v10476_v1  ;;  %v9247_v1 = vld [vmem:[#allocation23 + $0x1b0] ss:$24 sps:$4 sm:$0xff]  }
 0x47c   :  { %v2041_v62 = vadd.f32 1.0, %v7929_v63  ;;  %v7931_v49 = vpop.eup %7930  ;;  %v9150_v63 = vld [vmem:[#allocation23 + $0x4] ss:$24 sps:$4 sm:$0xff]  }
 0x47d   :  { %7932 = vrcp.f32 %v2040_v47  ;;  %v9148_v47 = vld [vmem:[#allocation23] ss:$24 sps:$4 sm:$0xff]   ;;  %2557 = vmatprep.subr.bf16.mxu1 %v9150_v63 }
 0x47e   :  { %7934 = vrcp.f32 %v2041_v62  ;;  %v9152_v62 = vld [vmem:[#allocation23 + $0x8] ss:$24 sps:$4 sm:$0xff]   ;;  %2558 = vmatpush1.bf16.msra.mxu1 %v9148_v47 }
 0x487   :  { %v7933_v51 = vpop.eup %7932 }
 0x488   :  { %v2051_v56 = vmul.f32 %v7933_v51, %v7931_v49  ;;  %v7935_v57 = vpop.eup %7934  ;;  %v9154_v49 = vld [vmem:[#allocation23 + $0xc] ss:$24 sps:$4 sm:$0xff]  }
 0x489   :  { %v2050_v29 = vmul.f32 %v7935_v57, %v9131_v61  ;;  %v9156_v51 = vld [vmem:[#allocation23 + $0x34] ss:$24 sps:$4 sm:$0xff]   ;;  %2598 = vmatprep.subr.bf16.mxu0 %v9154_v49  ;;  %v9163_v57 = vld [vmem:[#allocation23 + $0x30] ss:$24 sps:$4 sm:$0xff]  }
 0x48a   :  { %2599 = vmatpush1.bf16.msra.mxu0 %v9152_v62  ;;  %2559 = vmatprep.subr.bf16.mxu1 %v9156_v51 }
 0x48b   :  { %v9134_v35 = vadd.f32 %v2051_v56, %v2050_v29  ;;  %v9159_v56 = vld [vmem:[#allocation23 + $0x3c] ss:$24 sps:$4 sm:$0xff]   ;;  %v9167_v29 = vld [vmem:[#allocation23 + $0x38] ss:$24 sps:$4 sm:$0xff]   ;;  %2560 = vmatpush1.bf16.msra.mxu1 %v9163_v57 }
 0x48c   :  { %2600 = vmatprep.subr.bf16.mxu0 %v9159_v56 }
 0x48e   :  { %2601 = vmatpush1.bf16.msra.mxu0 %v9167_v29 }
 0x49b   :  { %v2007_v11 = vpop.f32.mrb[40].mxu0 }
 0x49c   :  { %v2029_v58 = vadd.f32 %v2027_v8, %v2007_v11  ;;  %v2009_v39 = vpop.f32.mrb[41].mxu0  ;;  %v9169_v8 = vld [vmem:[#allocation23 + $0x64] ss:$24 sps:$4 sm:$0xff]  }
 0x49d   :  { %v9138_v41 = vadd.f32 %v2028_v38, %v2009_v39  ;;  %v2011_v43 = vpop.f32.mrb[42].mxu0  ;;  %v9172_v11 = vld [vmem:[#allocation23 + $0x6c] ss:$24 sps:$4 sm:$0xff]   ;;  %v9175_v38 = vld [vmem:[#allocation23 + $0x60] ss:$24 sps:$4 sm:$0xff]   ;;  %2561 = vmatprep.subr.bf16.mxu1 %v9169_v8 }
 0x49e   :  { %v2012_v45 = vpop.f32.mrb[43].mxu0  ;;  %v6778_v26 = vmul.f32 -1.442695, %v2029_v58  ;;  %v9179_v58 = vld [vmem:[#allocation23 + $0x68] ss:$24 sps:$4 sm:$0xff]   ;;  %2602 = vmatprep.subr.bf16.mxu0 %v9172_v11  ;;  %2562 = vmatpush1.bf16.msra.mxu1 %v9175_v38 }
 0x49f   :  { %7936 = vtanh.f32 %v9138_v41  ;;  %v9181_v39 = vld [vmem:[#allocation23 + $0x94] ss:$24 sps:$4 sm:$0xff]   ;;  %v9187_v45 = vld [vmem:[#allocation23 + $0x90] ss:$24 sps:$4 sm:$0xff]   ;;  %2603 = vmatpush1.bf16.msra.mxu0 %v9179_v58  ;;  %v6779_v18 = vmul.f32 -1.442695, %v9138_v41 }
 0x4a0   :  { %7938 = vpow2.f32 %v6778_v26  ;;  %v9184_v43 = vld [vmem:[#allocation23 + $0x9c] ss:$24 sps:$4 sm:$0xff]   ;;  %2563 = vmatprep.subr.bf16.mxu1 %v9181_v39  ;;  %v9203_v26 = vld [vmem:[#allocation23 + $0xc8] ss:$24 sps:$4 sm:$0xff]  }
 0x4a1   :  { %2604 = vmatprep.subr.bf16.mxu0 %v9184_v43 }
 0x4a2   :  { %2564 = vmatpush1.bf16.msra.mxu1 %v9187_v45 }
 0x4a3   :  { %2605 = vmatpush1.bf16.msra.mxu0 %v9191_v46  ;;  %2565 = vmatprep.subr.bf16.mxu1 %v9193_v60 }
 0x4a9   :  { %v7937_v15 = vpop.eup %7936 }
 0x4aa   :  { %2070 = vrot.lane.b32.xlu1 %v7937_v15, %s8457_s21  ;;  %v7939_v40 = vpop.eup %7938  ;;  %v9196_v15 = vld [vmem:[#allocation23 + $0xcc] ss:$24 sps:$4 sm:$0xff]  }
 0x4ab   :  { %v2061_v10 = vadd.f32 1.0, %v7939_v40  ;;  %2606 = vmatprep.subr.bf16.mxu0 %v9196_v15  ;;  %v9206_v40 = vld [vmem:[#allocation23 + $0xfc] ss:$24 sps:$4 sm:$0xff]  }
 0x4ac   :  { %2607 = vmatpush1.bf16.msra.mxu0 %v9203_v26 }
 0x4ad   :  { %7940 = vrcp.f32 %v2061_v10  ;;  %v9211_v10 = vld [vmem:[#allocation23 + $0xf8] ss:$24 sps:$4 sm:$0xff]   ;;  %2608 = vmatprep.subr.bf16.mxu0 %v9206_v40 }
 0x4ae   :  { %2094 = vperm.xlu1 %7412, %v2092_v12   ;;  %v9199_v12 = vld [vmem:[#allocation23 + $0xc0] ss:$24 sps:$4 sm:$0xff]  }
 0x4af   :  { %2566 = vmatpush1.bf16.msra.mxu1 %v9199_v12 }
 0x4b0   :  { %2567 = vmatprep.subr.bf16.mxu1 %v9057_v3  ;;  %2609 = vmatpush1.bf16.msra.mxu0 %v9211_v10  ;;  %v9227_v3 = vld [vmem:[#allocation23 + $0x158] ss:$24 sps:$4 sm:$0xff]  }
 0x4b1   :  { %2610 = vmatprep.subr.bf16.mxu0 %v9214_v20 }
 0x4b3   :  { %2568 = vmatpush1.bf16.msra.mxu1 %v9055_v0  ;;  %v9232_v0 = vld [vmem:[#allocation23 + $0x18c] ss:$24 sps:$4 sm:$0xff]  }
 0x4b4   :  { %2569 = vmatprep.subr.bf16.mxu1 %v9059_v23  ;;  %v9235_v23 = vld [vmem:[#allocation23 + $0x180] ss:$24 sps:$4 sm:$0xff]  }
 0x4b7   :  { %v9143_v37 = vpop.eup %7940  ;;  %2570 = vmatpush1.bf16.msra.mxu1 %v9063_v4  ;;  %v9239_v4 = vld [vmem:[#allocation23 + $0x188] ss:$24 sps:$4 sm:$0xff]  }
 0x4b8   :  { %2571 = vmatprep.subr.bf16.mxu1 %v9066_v2  ;;  %v9244_v2 = vld [vmem:[#allocation23 + $0x1bc] ss:$24 sps:$4 sm:$0xff]   ;;  %v2068_v17 = vmul.f32 %v9143_v37, %v9272_v16 }
 0x4bb   :  { %2572 = vmatpush1.bf16.msra.mxu1 %v9069_v5  ;;  %v9251_v5 = vld [vmem:[#allocation23 + $0x1b8] ss:$24 sps:$4 sm:$0xff]  }
 0x51c   :  { %v2071_v42 = vpop.permute.xlu1 %2070 }
 0x51d   :  { %v2073_v19 = vmul.f32 %v9143_v37, %v2071_v42  ;;  %v9219_v42 = vld [vmem:[#allocation23 + $0x128] ss:$24 sps:$4 sm:$0xff]  }
 0x51e   :  { %2611 = vmatpush1.bf16.msra.mxu0 %v9219_v42 }
 0x51f   :  { %2075 = vrot.lane.b32.xlu0 %v2073_v19, %s8457_s21  ;;  %v9222_v19 = vld [vmem:[#allocation23 + $0x15c] ss:$24 sps:$4 sm:$0xff]  }
 0x520   :  { %2612 = vmatprep.subr.bf16.mxu0 %v9222_v19 }
 0x522   :  { %2613 = vmatpush1.bf16.msra.mxu0 %v9227_v3 }
 0x523   :  { %2087 = vperm.xlu0 %7413, %v2085_v44   ;;  %v9229_v44 = vld [vmem:[#allocation23 + $0x184] ss:$24 sps:$4 sm:$0xff]   ;;  %2614 = vmatprep.subr.bf16.mxu0 %v9232_v0 }
 0x524   :  { %2573 = vmatprep.subr.bf16.mxu1 %v9229_v44 }
 0x525   :  { %2574 = vmatpush1.bf16.msra.mxu1 %v9235_v23 }
 0x526   :  { %2615 = vmatpush1.bf16.msra.mxu0 %v9239_v4  ;;  %2575 = vmatprep.subr.bf16.mxu1 %v9241_v13 }
 0x527   :  { %2616 = vmatprep.subr.bf16.mxu0 %v9244_v2 }
 0x529   :  { %2576 = vmatpush1.bf16.msra.mxu1 %v9247_v1 }
 0x52a   :  { %2617 = vmatpush1.bf16.msra.mxu0 %v9251_v5  ;;  %2577 = vmatprep.subr.bf16.mxu1 %v9253_v14 }
 0x52b   :  { %2618 = vmatprep.subr.bf16.mxu0 %v9256_v48 }
 0x52d   :  { %2578 = vmatpush1.bf16.msra.mxu1 %v9259_v32 }
 0x52e   :  { %2619 = vmatpush1.bf16.msra.mxu0 %v9263_v33  ;;  %2579 = vmatprep.subr.bf16.mxu1 %v9276_v34 }
 0x52f   :  { %2620 = vmatprep.subr.bf16.mxu0 %v9282_v27 }
 0x531   :  { %2580 = vmatpush1.bf16.msra.mxu1 %v9280_v55 }
 0x532   :  { %2621 = vmatpush1.bf16.msra.mxu0 %v9285_v50  ;;  %2639 = vmatprep.subr.bf16.mxu1 %v9291_v36 }
 0x533   :  { %3223 = vmatprep.subr.bf16.mxu0 %v9150_v63  ;;  %v9299_v63 = vpop.permute.xlu1 %2094 }
 0x534   :  { %vm2096_vm11 = vcmp.eq.s32.totalorder %v9299_v63, 1 }
 0x591   :  { %v2076_v21 = vpop.permute.xlu0 %2075 }
 0x592   :  { %v9278_v54 = vadd.f32 %v2076_v21, %v2068_v17  ;;  %v6777_v21 = vmul.f32 -1.442695, %v9126_v24 }
 0x594   :  { %7942 = vtanh.f32 %v9278_v54 }
 0x595   :  { %7944 = vpow2.f32 %v6777_v21 }
 0x596   :  { %7946 = vpow2.f32 %v6779_v18  ;;  %v9307_v18 = vsel %vm1424_vm6, %v9087_v7, 0.0  ;;  %v9326_v7 = vld [vmem:[#allocation23 + $0x44] ss:$24 sps:$4 sm:$0xff]  }
 0x597   :  { %7948 = vtanh.f32 %v9134_v35  ;;  %10532 = vst [vmem:[#allocation57_spill] sm:$0xff] %v9307_v18 }
 0x59e   :  { %v7943_v17 = vpop.eup %7942 }
 0x59f   :  { %2081 = vrot.lane.b32.xlu1 %v7943_v17, %s8457_s21  ;;  %v7945_v53 = vpop.eup %7944 }
 0x5a0   :  { %v7947_v37 = vpop.eup %7946  ;;  %v2042_v52 = vadd.f32 1.0, %v7945_v53 }
 0x5a1   :  { %v2062_v59 = vadd.f32 1.0, %v7947_v37  ;;  %v7949_v31 = vpop.eup %7948  ;;  %v9322_v37 = vld [vmem:[#allocation23 + $0x10] ss:$24 sps:$4 sm:$0xff]  }
 0x5a2   :  { %7950 = vrcp.f32 %v2042_v52  ;;  %v9301_v30 = vpop.permute.xlu0 %2087 }
 0x5a3   :  { %7952 = vrcp.f32 %v2062_v59  ;;  %vm2089_vm10 = vcmp.eq.s32.totalorder %v9301_v30, 1 }
 0x5ac   :  { %v7951_v17 = vpop.eup %7950 }
 0x5ad   :  { %v7953_v24 = vpop.eup %7952  ;;  %v2054_v41 = vmul.f32 %v7951_v17, %v7949_v31  ;;  %v9332_v17 = vld [vmem:[#allocation23 + $0x40] ss:$24 sps:$4 sm:$0xff]  }
 0x5af   :  { %v9313_v52 = vsel %vm2089_vm10, %v2054_v41, %v9307_v18  ;;  %v9340_v41 = vld [vmem:[#allocation23 + $0x70] ss:$24 sps:$4 sm:$0xff]   ;;  %v9389_v18 = vld [vmem:[#allocation23 + $0x1c0] ss:$24 sps:$4 sm:$0xff]  }
 0x5b0   :  { %10533 = vst [vmem:[#allocation58_spill] sm:$0xff] %v9313_v52  ;;  %v2120_v6 = vpack.c.bf16 %v9313_v52, %v9313_v52 }
 0x611   :  { %v2082_v21 = vpop.permute.xlu1 %2081 }
 0x612   :  { %v2084_v53 = vmul.f32 %v7953_v24, %v2082_v21  ;;  %v9335_v24 = vld [vmem:[#allocation23 + $0x74] ss:$24 sps:$4 sm:$0xff]   ;;  %v9343_v21 = vld [vmem:[#allocation23 + $0xa4] ss:$24 sps:$4 sm:$0xff]  }
 0x614   :  { %v9318_v59 = vsel %vm2096_vm11, %v2084_v53, %v9093_v9  ;;  %v9348_v53 = vld [vmem:[#allocation23 + $0xa0] ss:$24 sps:$4 sm:$0xff]   ;;  %v9383_v9 = vld [vmem:[#allocation23 + $0x190] ss:$24 sps:$4 sm:$0xff]  }
 0x615   :  { %10534 = vst [vmem:[#allocation59_spill] sm:$0xff] %v9318_v59  ;;  %v2121_v31 = vpack.c.bf16 %v9318_v59, %v9318_v59 }
 0x617   :  { %6852 = vmatprep.mubr.msk.bf16.mxu1 %vm209_vm0, %v2121_v31  ;;  %6853 = vmatprep.mubr.msk.bf16.mxu0 %vm209_vm0, %v2121_v31 }
 0x618   :  { %2590 = vmatmul.mubr.bf16.vlgmr.msra.gmra.mrb[28].mxu1 %v2120_v6  ;;  %2631 = vmatmul.mubr.bf16.vlgmr.msra.gmra.mrb[44].mxu0 %v2120_v6 }
 0x619   :  { %2640 = vmatpush1.bf16.msra.mxu1 %v9322_v37  ;;  %6854 = vmatprep.mubr.msk.bf16.mxu1 %vm209_vm0, %v2121_v31  ;;  %v9374_v31 = vld [vmem:[#allocation23 + $0x164] ss:$24 sps:$4 sm:$0xff]  }
 0x61a   :  { %2641 = vmatprep.subr.bf16.mxu1 %v9326_v7  ;;  %3224 = vmatpush1.bf16.msra.mxu0 %v9148_v47  ;;  %v9351_v47 = vld [vmem:[#allocation23 + $0xd4] ss:$24 sps:$4 sm:$0xff]   ;;  %10536 = vst [vmem:[#allocation61_spill] sm:$0xff] %v9374_v31 }
 0x61b   :  { %3225 = vmatprep.subr.bf16.mxu0 %v9156_v51  ;;  %v9356_v51 = vld [vmem:[#allocation23 + $0xd0] ss:$24 sps:$4 sm:$0xff]  }
 0x61d   :  { %2642 = vmatpush1.bf16.msra.mxu1 %v9332_v17 }
 0x61e   :  { %2643 = vmatprep.subr.bf16.mxu1 %v9335_v24  ;;  %3226 = vmatpush1.bf16.msra.mxu0 %v9163_v57  ;;  %v9359_v57 = vld [vmem:[#allocation23 + $0x104] ss:$24 sps:$4 sm:$0xff]  }
 0x61f   :  { %3227 = vmatprep.subr.bf16.mxu0 %v9169_v8  ;;  %v9364_v8 = vld [vmem:[#allocation23 + $0x100] ss:$24 sps:$4 sm:$0xff]  }
 0x621   :  { %2644 = vmatpush1.bf16.msra.mxu1 %v9340_v41 }
 0x622   :  { %2645 = vmatprep.subr.bf16.mxu1 %v9343_v21  ;;  %3228 = vmatpush1.bf16.msra.mxu0 %v9175_v38  ;;  %v9367_v38 = vld [vmem:[#allocation23 + $0x134] ss:$24 sps:$4 sm:$0xff]  }
 0x623   :  { %3229 = vmatprep.subr.bf16.mxu0 %v9181_v39  ;;  %v9371_v39 = vld [vmem:[#allocation23 + $0x130] ss:$24 sps:$4 sm:$0xff]  }
 0x624   :  { %10535 = vst [vmem:[#allocation60_spill] sm:$0xff] %v9371_v39 }
 0x625   :  { %2646 = vmatpush1.bf16.msra.mxu1 %v9348_v53 }
 0x626   :  { %2647 = vmatprep.subr.bf16.mxu1 %v9351_v47  ;;  %3230 = vmatpush1.bf16.msra.mxu0 %v9187_v45  ;;  %v9377_v45 = vld [vmem:[#allocation23 + $0x160] ss:$24 sps:$4 sm:$0xff]  }
 0x627   :  { %3231 = vmatprep.subr.bf16.mxu0 %v9193_v60  ;;  %10537 = vst [vmem:[#allocation62_spill] sm:$0xff] %v9377_v45  ;;  %v9380_v60 = vld [vmem:[#allocation23 + $0x194] ss:$24 sps:$4 sm:$0xff]  }
 0x628   :  { %10538 = vst [vmem:[#allocation63_spill] sm:$0xff] %v9380_v60 }
 0x629   :  { %2648 = vmatpush1.bf16.msra.mxu1 %v9356_v51 }
 0x62a   :  { %2649 = vmatprep.subr.bf16.mxu1 %v9359_v57  ;;  %3232 = vmatpush1.bf16.msra.mxu0 %v9199_v12  ;;  %v9386_v12 = vld [vmem:[#allocation23 + $0x1c4] ss:$24 sps:$4 sm:$0xff]  }
 0x62d   :  { %2650 = vmatpush1.bf16.msra.mxu1 %v9364_v8 }
 0x62e   :  { %2651 = vmatprep.subr.bf16.mxu1 %v9367_v38 }
 0x631   :  { %2652 = vmatpush1.bf16.msra.mxu1 %v9371_v39  ;;  %v9392_v39 = vld [vmem:[#allocation23 + $0x1f4] ss:$24 sps:$4 sm:$0xff]  }
 0x632   :  { %2653 = vmatprep.subr.bf16.mxu1 %v9374_v31  ;;  %v9395_v31 = vld [vmem:[#allocation23 + $0x1f0] ss:$24 sps:$4 sm:$0xff]  }
 0x635   :  { %2654 = vmatpush1.bf16.msra.mxu1 %v9377_v45  ;;  %v9398_v45 = vld [vmem:[#allocation23 + $0x224] ss:$24 sps:$4 sm:$0xff]  }
 0x636   :  { %2655 = vmatprep.subr.bf16.mxu1 %v9380_v60  ;;  %v9401_v60 = vld [vmem:[#allocation23 + $0x220] ss:$24 sps:$4 sm:$0xff]  }
 0x639   :  { %2656 = vmatpush1.bf16.msra.mxu1 %v9383_v9 }
 0x63a   :  { %2657 = vmatprep.subr.bf16.mxu1 %v9386_v12 }
 0x63d   :  { %2658 = vmatpush1.bf16.msra.mxu1 %v9389_v18 }
 0x63e   :  { %2659 = vmatprep.subr.bf16.mxu1 %v9392_v39 }
 0x641   :  { %2660 = vmatpush1.bf16.msra.mxu1 %v9395_v31 }
 0x642   :  { %2661 = vmatprep.subr.bf16.mxu1 %v9398_v45 }
 0x645   :  { %2662 = vmatpush1.bf16.msra.mxu1 %v9401_v60 }
 0x646   :  { %3264 = vmatprep.subr.bf16.mxu1 %v9154_v49  ;;  %v2685_v49 = vunpack.c.l.bf16 %v8975_v25 }
 0x648   :  { %2672 = vmatmul.mubr.bf16.vlgmr.msra.gmra.mrb[32].mxu1 %v2120_v6  ;;  %v9439_v6 = vsel %vm2089_vm10, %v9134_v35, %v9131_v61  ;;  %v10539_v61 = vmov 0  }
 0x649   :  { %3265 = vmatpush1.bf16.msra.mxu1 %v9152_v62  ;;  %v2683_v62 = vunpack.c.l.bf16 %v8978_v28 }
 0x64a   :  { %3266 = vmatprep.subr.bf16.mxu1 %v9159_v56 }
 0x64d   :  { %3267 = vmatpush1.bf16.msra.mxu1 %v9167_v29 }
 0x64e   :  { %3268 = vmatprep.subr.bf16.mxu1 %v9172_v11  ;;  %v2684_v11 = vunpack.c.h.bf16 %v8978_v28 }
 0x651   :  { %3269 = vmatpush1.bf16.msra.mxu1 %v9179_v58  ;;  %v2686_v58 = vunpack.c.h.bf16 %v8975_v25 }
 0x652   :  { %3270 = vmatprep.subr.bf16.mxu1 %v9184_v43 }
 0x655   :  { %3271 = vmatpush1.bf16.msra.mxu1 %v9191_v46 }
 0x656   :  { %3272 = vmatprep.subr.bf16.mxu1 %v9196_v15 }
 0x659   :  { %3273 = vmatpush1.bf16.msra.mxu1 %v9203_v26 }
 0x65a   :  { %3274 = vmatprep.subr.bf16.mxu1 %v9206_v40 }
 0x65d   :  { %3275 = vmatpush1.bf16.msra.mxu1 %v9211_v10 }
 0x65e   :  { %3276 = vmatprep.subr.bf16.mxu1 %v9214_v20 }
 0x661   :  { %3277 = vmatpush1.bf16.msra.mxu1 %v9219_v42 }
 0x662   :  { %3278 = vmatprep.subr.bf16.mxu1 %v9222_v19 }
 0x665   :  { %3279 = vmatpush1.bf16.msra.mxu1 %v9227_v3 }
 0x666   :  { %3280 = vmatprep.subr.bf16.mxu1 %v9232_v0 }
 0x669   :  { %3281 = vmatpush1.bf16.msra.mxu1 %v9239_v4 }
 0x66a   :  { %3282 = vmatprep.subr.bf16.mxu1 %v9244_v2 }
 0x66d   :  { %3283 = vmatpush1.bf16.msra.mxu1 %v9251_v5 }
 0x66e   :  { %3284 = vmatprep.subr.bf16.mxu1 %v9256_v48 }
 0x671   :  { %3285 = vmatpush1.bf16.msra.mxu1 %v9263_v33 }
 0x672   :  { %3286 = vmatprep.subr.bf16.mxu1 %v9282_v27 }
 0x675   :  { %3287 = vmatpush1.bf16.msra.mxu1 %v9285_v50 }
 0x6eb   :  { %v2591_v56 = vpop.f32.mrb[28].mxu1  ;;  %v2632_v29 = vpop.f32.mrb[44].mxu0 }
 0x6ec   :  { %v2687_v43 = vadd.f32 %v2683_v62, %v2591_v56  ;;  %v9433_v46 = vadd.f32 %v2685_v49, %v2632_v29  ;;  %v2593_v48 = vpop.f32.mrb[29].mxu1  ;;  %v2634_v15 = vpop.f32.mrb[45].mxu0  ;;  %v2693_v56 = vunpack.c.l.bf16 %v9025_v22 }
 0x6ed   :  { %v2688_v33 = vadd.f32 %v2684_v11, %v2593_v48  ;;  %v2690_v26 = vadd.f32 %v2686_v58, %v2634_v15  ;;  %v2595_v27 = vpop.f32.mrb[30].mxu1  ;;  %v2636_v40 = vpop.f32.mrb[46].mxu0  ;;  %v2694_v11 = vunpack.c.h.bf16 %v9025_v22 }
 0x6ee   :  { %v6855_v50 = vmul.f32 -1.442695, %v2687_v43  ;;  %v2596_v10 = vpop.f32.mrb[31].mxu1  ;;  %v2637_v20 = vpop.f32.mrb[47].mxu0 }
 0x6ef   :  { %v6856_v42 = vmul.f32 -1.442695, %v2688_v33 }
 0x6f0   :  { %7954 = vpow2.f32 %v6855_v50 }
 0x6f1   :  { %7956 = vpow2.f32 %v6856_v42 }
 0x6f2   :  { %7958 = vtanh.f32 %v2690_v26  ;;  %v2113_v26 = vld [vmem:[#allocation16 + $0x10] sm:$0xff] }
 0x6f3   :  { %v2116_v27 = vand.u32 2, %v2113_v26  ;;  %v2114_v22 = vand.u32 1, %v2113_v26 }
 0x6f5   :  { %vm2117_vm12 = vcmp.gt.s32.totalorder %v2116_v27, 0  ;;  %vm2115_vm13 = vcmp.gt.s32.totalorder %v2114_v22, 0 }
 0x6f6   :  { %v2758_v35 = vsel %vm2117_vm12, 1, %v10539_v61 }
 0x6fa   :  { %v7955_v19 = vpop.eup %7954 }
 0x6fb   :  { %v2706_v3 = vadd.f32 1.0, %v7955_v19  ;;  %v7957_v28 = vpop.eup %7956 }
 0x6fc   :  { %v2707_v25 = vadd.f32 1.0, %v7957_v28  ;;  %v7959_v0 = vpop.eup %7958  ;;  %v9450_v28 = vld [vmem:[#allocation23 + $0xf0] ss:$24 sps:$4 sm:$0xff]  }
 0x6fd   :  { %7960 = vrcp.f32 %v2706_v3  ;;  %v2751_v3 = vsel %vm2115_vm13, 1, %v10539_v61 }
 0x6fe   :  { %7962 = vrcp.f32 %v2707_v25  ;;  %v9452_v25 = vld [vmem:[#allocation23 + $0xf4] ss:$24 sps:$4 sm:$0xff]  }
 0x6ff   :  { %3233 = vmatprep.subr.bf16.mxu0 %v9452_v25 }
 0x700   :  { %3234 = vmatpush1.bf16.msra.mxu0 %v9450_v28 }
 0x707   :  { %v7961_v4 = vpop.eup %7960 }
 0x708   :  { %v2717_v2 = vmul.f32 %v7961_v4, %v7959_v0  ;;  %v7963_v5 = vpop.eup %7962  ;;  %v9454_v0 = vld [vmem:[#allocation23 + $0x124] ss:$24 sps:$4 sm:$0xff]   ;;  %v9458_v4 = vld [vmem:[#allocation23 + $0x120] ss:$24 sps:$4 sm:$0xff]  }
 0x709   :  { %v2716_v62 = vmul.f32 %v7963_v5, %v9439_v6  ;;  %3235 = vmatprep.subr.bf16.mxu0 %v9454_v0  ;;  %v9464_v5 = vld [vmem:[#allocation23 + $0x150] ss:$24 sps:$4 sm:$0xff]  }
 0x70a   :  { %3236 = vmatpush1.bf16.msra.mxu0 %v9458_v4 }
 0x70b   :  { %v9442_v49 = vadd.f32 %v2717_v2, %v2716_v62  ;;  %v9461_v2 = vld [vmem:[#allocation23 + $0x154] ss:$24 sps:$4 sm:$0xff]  }
 0x70c   :  { %3237 = vmatprep.subr.bf16.mxu0 %v9461_v2 }
 0x70e   :  { %3238 = vmatpush1.bf16.msra.mxu0 %v9464_v5 }
 0x70f   :  { %3239 = vmatprep.subr.bf16.mxu0 %v9229_v44  ;;  %v9481_v44 = vsel %vm2096_vm11, %v9278_v54, %v9272_v16 }
 0x712   :  { %3240 = vmatpush1.bf16.msra.mxu0 %v9235_v23 }
 0x713   :  { %3241 = vmatprep.subr.bf16.mxu0 %v9241_v13 }
 0x716   :  { %3242 = vmatpush1.bf16.msra.mxu0 %v9247_v1 }
 0x717   :  { %3243 = vmatprep.subr.bf16.mxu0 %v9253_v14 }
 0x71a   :  { %3244 = vmatpush1.bf16.msra.mxu0 %v9259_v32 }
 0x71b   :  { %v2673_v29 = vpop.f32.mrb[32].mxu1  ;;  %3245 = vmatprep.subr.bf16.mxu0 %v9276_v34 }
 0x71c   :  { %v2695_v58 = vadd.f32 %v2693_v56, %v2673_v29  ;;  %v2675_v43 = vpop.f32.mrb[33].mxu1 }
 0x71d   :  { %v2696_v48 = vadd.f32 %v2694_v11, %v2675_v43  ;;  %v2677_v15 = vpop.f32.mrb[34].mxu1 }
 0x71e   :  { %v2678_v33 = vpop.f32.mrb[35].mxu1  ;;  %v6858_v40 = vmul.f32 -1.442695, %v2695_v58  ;;  %3246 = vmatpush1.bf16.msra.mxu0 %v9280_v55  ;;  %v6857_v55 = vmul.f32 -1.442695, %v9433_v46 }
 0x71f   :  { %7964 = vtanh.f32 %v2696_v48  ;;  %3305 = vmatprep.subr.bf16.mxu0 %v9291_v36  ;;  %v6859_v32 = vmul.f32 -1.442695, %v2696_v48 }
 0x720   :  { %7966 = vpow2.f32 %v6858_v40 }
 0x729   :  { %v7965_v30 = vpop.eup %7964 }
 0x72a   :  { %2736 = vrot.lane.b32.xlu0 %v7965_v30, %s8457_s21  ;;  %v7967_v50 = vpop.eup %7966 }
 0x72b   :  { %v2727_v10 = vadd.f32 1.0, %v7967_v50 }
 0x72d   :  { %7968 = vrcp.f32 %v2727_v10 }
 0x72e   :  { %2760 = vperm.xlu0 %7413, %v2758_v35  }
 0x737   :  { %v7969_v20 = vpop.eup %7968 }
 0x738   :  { %v2734_v13 = vmul.f32 %v7969_v20, %v9481_v44 }
 0x79c   :  { %v2737_v42 = vpop.permute.xlu0 %2736 }
 0x79d   :  { %v2739_v19 = vmul.f32 %v7969_v20, %v2737_v42 }
 0x79f   :  { %2741 = vrot.lane.b32.xlu1 %v2739_v19, %s8457_s21 }
 0x7a3   :  { %2753 = vperm.xlu1 %7412, %v2751_v3  }
 0x7ad   :  { %v9490_v16 = vpop.permute.xlu0 %2760 }
 0x7ae   :  { %vm2762_vm15 = vcmp.eq.s32.totalorder %v9490_v16, 1 }
 0x811   :  { %v2742_v23 = vpop.permute.xlu1 %2741 }
 0x812   :  { %v9484_v1 = vadd.f32 %v2742_v23, %v2734_v13 }
 0x814   :  { %7970 = vtanh.f32 %v9484_v1 }
 0x815   :  { %7972 = vpow2.f32 %v6857_v55 }
 0x816   :  { %7974 = vpow2.f32 %v6859_v32 }
 0x817   :  { %7976 = vtanh.f32 %v9442_v49 }
 0x81e   :  { %v7971_v14 = vpop.eup %7970 }
 0x81f   :  { %2747 = vrot.lane.b32.xlu0 %v7971_v14, %s8457_s21  ;;  %v7973_v34 = vpop.eup %7972 }
 0x820   :  { %v7975_v36 = vpop.eup %7974  ;;  %v2708_v63 = vadd.f32 1.0, %v7973_v34  ;;  %v10548_v34 = vld [vmem:[#allocation51_spill] sm:$0xff] }
 0x821   :  { %v2728_v54 = vadd.f32 1.0, %v7975_v36  ;;  %v7977_v56 = vpop.eup %7976  ;;  %v3359_v36 = vunpack.c.l.bf16 %v10548_v34 }
 0x822   :  { %7978 = vrcp.f32 %v2708_v63  ;;  %v9492_v62 = vpop.permute.xlu1 %2753 }
 0x823   :  { %7980 = vrcp.f32 %v2728_v54  ;;  %vm2755_vm14 = vcmp.eq.s32.totalorder %v9492_v62, 1  ;;  %v3360_v54 = vunpack.c.h.bf16 %v10548_v34  ;;  %v2779_v62 = vld [vmem:[#allocation16 + $0x18] sm:$0xff]  ;;  %v9656_v34 = vld [vmem:[#allocation23 + $0x1b4] ss:$24 sps:$4 sm:$0xff]  }
 0x824   :  { %v9546_v14 = vsel %vm2755_vm14, %v9442_v49, %v9439_v6  ;;  %v2782_v6 = vand.u32 2, %v2779_v62 }
 0x826   :  { %vm2783_vm1 = vcmp.gt.s32.totalorder %v2782_v6, 0  ;;  %v9691_v6 = vld [vmem:[#allocation23 + $0x214] ss:$24 sps:$4 sm:$0xff]  }
 0x82c   :  { %v7979_v29 = vpop.eup %7978 }
 0x82d   :  { %v7981_v46 = vpop.eup %7980  ;;  %v2720_v11 = vmul.f32 %v7979_v29, %v7977_v56 }
 0x82f   :  { %v9499_v48 = vsel %vm2755_vm14, %v2720_v11, %v9313_v52  ;;  %v9799_v52 = vld [vmem:[#allocation23 + $0x1c0] ss:$24 sps:$4 sm:$0xff]  }
 0x830   :  { %10540 = vst [vmem:[#allocation64_spill] sm:$0xff] %v9499_v48  ;;  %v2786_v26 = vpack.c.bf16 %v9499_v48, %v9499_v48 }
 0x891   :  { %v2748_v58 = vpop.permute.xlu0 %2747 }
 0x892   :  { %v2750_v43 = vmul.f32 %v7981_v46, %v2748_v58 }
 0x894   :  { %v9504_v15 = vsel %vm2762_vm15, %v2750_v43, %v9318_v59  ;;  %v3424_v43 = vsel %vm2783_vm1, 1, %v10539_v61  ;;  %v9793_v59 = vld [vmem:[#allocation23 + $0x190] ss:$24 sps:$4 sm:$0xff]  }
 0x895   :  { %10541 = vst [vmem:[#allocation65_spill] sm:$0xff] %v9504_v15  ;;  %v2787_v33 = vpack.c.bf16 %v9504_v15, %v9504_v15 }
 0x897   :  { %6932 = vmatprep.mubr.msk.bf16.mxu0 %vm209_vm0, %v2787_v33  ;;  %6933 = vmatprep.mubr.msk.bf16.mxu1 %vm209_vm0, %v2787_v33 }
 0x898   :  { %3256 = vmatmul.mubr.bf16.vlgmr.msra.gmra.mrb[48].mxu0 %v2786_v26  ;;  %3297 = vmatmul.mubr.bf16.vlgmr.msra.gmra.mrb[36].mxu1 %v2786_v26 }
 0x899   :  { %3306 = vmatpush1.bf16.msra.mxu0 %v9322_v37  ;;  %6934 = vmatprep.mubr.msk.bf16.mxu0 %vm209_vm0, %v2787_v33  ;;  %v10542_v37 = vld [vmem:[#allocation60_spill] sm:$0xff] }
 0x89a   :  { %3307 = vmatprep.subr.bf16.mxu0 %v9326_v7  ;;  %v10543_v7 = vld [vmem:[#allocation61_spill] sm:$0xff] }
 0x89d   :  { %3308 = vmatpush1.bf16.msra.mxu0 %v9332_v17  ;;  %v10544_v17 = vld [vmem:[#allocation62_spill] sm:$0xff] }
 0x89e   :  { %3309 = vmatprep.subr.bf16.mxu0 %v9335_v24  ;;  %v10545_v24 = vld [vmem:[#allocation63_spill] sm:$0xff] }
 0x8a1   :  { %3310 = vmatpush1.bf16.msra.mxu0 %v9340_v41  ;;  %v10546_v41 = vld [vmem:[#allocation42_spill] sm:$0xff] }
 0x8a2   :  { %3311 = vmatprep.subr.bf16.mxu0 %v9343_v21  ;;  %v3349_v21 = vunpack.c.l.bf16 %v10546_v41 }
 0x8a5   :  { %3312 = vmatpush1.bf16.msra.mxu0 %v9348_v53  ;;  %v10547_v53 = vld [vmem:[#allocation41_spill] sm:$0xff] }
 0x8a6   :  { %3313 = vmatprep.subr.bf16.mxu0 %v9351_v47  ;;  %v3351_v47 = vunpack.c.l.bf16 %v10547_v53 }
 0x8a9   :  { %3314 = vmatpush1.bf16.msra.mxu0 %v9356_v51 }
 0x8aa   :  { %3315 = vmatprep.subr.bf16.mxu0 %v9359_v57 }
 0x8ad   :  { %3316 = vmatpush1.bf16.msra.mxu0 %v9364_v8  ;;  %v3352_v8 = vunpack.c.h.bf16 %v10547_v53  ;;  %v9563_v53 = vld [vmem:[#allocation23] ss:$24 sps:$4 sm:$0xff]  }
 0x8ae   :  { %3317 = vmatprep.subr.bf16.mxu0 %v9367_v38 }
 0x8b1   :  { %3318 = vmatpush1.bf16.msra.mxu0 %v10542_v37 }
 0x8b2   :  { %3319 = vmatprep.subr.bf16.mxu0 %v10543_v7  ;;  %v2780_v7 = vand.u32 1, %v2779_v62 }
 0x8b4   :  { %vm2781_vm2 = vcmp.gt.s32.totalorder %v2780_v7, 0 }
 0x8b5   :  { %3320 = vmatpush1.bf16.msra.mxu0 %v10544_v17 }
 0x8b6   :  { %3321 = vmatprep.subr.bf16.mxu0 %v10545_v24 }
 0x8b9   :  { %3322 = vmatpush1.bf16.msra.mxu0 %v9383_v9  ;;  %v3350_v9 = vunpack.c.h.bf16 %v10546_v41 }
 0x8ba   :  { %3323 = vmatprep.subr.bf16.mxu0 %v9386_v12 }
 0x8bd   :  { %3324 = vmatpush1.bf16.msra.mxu0 %v9389_v18 }
 0x8be   :  { %3325 = vmatprep.subr.bf16.mxu0 %v9392_v39 }
 0x8c1   :  { %3326 = vmatpush1.bf16.msra.mxu0 %v9395_v31 }
 0x8c2   :  { %3327 = vmatprep.subr.bf16.mxu0 %v9398_v45 }
 0x8c5   :  { %3328 = vmatpush1.bf16.msra.mxu0 %v9401_v60 }
 0x8c8   :  { %3338 = vmatmul.mubr.bf16.vlgmr.msra.gmra.mrb[52].mxu0 %v2786_v26 }
 0x96b   :  { %v3257_v51 = vpop.f32.mrb[48].mxu0  ;;  %v3298_v57 = vpop.f32.mrb[36].mxu1 }
 0x96c   :  { %v3353_v18 = vadd.f32 %v3349_v21, %v3257_v51  ;;  %v9540_v38 = vadd.f32 %v3351_v47, %v3298_v57  ;;  %v3259_v39 = vpop.f32.mrb[49].mxu0  ;;  %v3300_v31 = vpop.f32.mrb[37].mxu1  ;;  %v3417_v21 = vsel %vm2781_vm2, 1, %v10539_v61  ;;  %v9565_v47 = vld [vmem:[#allocation23 + $0x4] ss:$24 sps:$4 sm:$0xff]  }
 0x96d   :  { %v3354_v12 = vadd.f32 %v3350_v9, %v3259_v39  ;;  %v3356_v45 = vadd.f32 %v3352_v8, %v3300_v31  ;;  %v3261_v27 = vpop.f32.mrb[50].mxu0  ;;  %v3302_v60 = vpop.f32.mrb[38].mxu1  ;;  %v9567_v51 = vld [vmem:[#allocation23 + $0x8] ss:$24 sps:$4 sm:$0xff]   ;;  %v9569_v57 = vld [vmem:[#allocation23 + $0xc] ss:$24 sps:$4 sm:$0xff]   ;;  %3889 = vmatprep.subr.bf16.mxu1 %v9565_v47 }
 0x96e   :  { %v6935_v30 = vmul.f32 -1.442695, %v3353_v18  ;;  %v3262_v35 = vpop.f32.mrb[51].mxu0  ;;  %v3303_v40 = vpop.f32.mrb[39].mxu1  ;;  %v9571_v9 = vld [vmem:[#allocation23 + $0x34] ss:$24 sps:$4 sm:$0xff]   ;;  %3890 = vmatpush1.bf16.msra.mxu1 %v9563_v53  ;;  %3930 = vmatprep.subr.bf16.mxu0 %v9569_v57 }
 0x96f   :  { %v6936_v50 = vmul.f32 -1.442695, %v3354_v12  ;;  %v9574_v8 = vld [vmem:[#allocation23 + $0x3c] ss:$24 sps:$4 sm:$0xff]   ;;  %v9578_v18 = vld [vmem:[#allocation23 + $0x30] ss:$24 sps:$4 sm:$0xff]   ;;  %3931 = vmatpush1.bf16.msra.mxu0 %v9567_v51  ;;  %3891 = vmatprep.subr.bf16.mxu1 %v9571_v9 }
 0x970   :  { %7982 = vpow2.f32 %v6935_v30  ;;  %v9582_v39 = vld [vmem:[#allocation23 + $0x38] ss:$24 sps:$4 sm:$0xff]   ;;  %v9584_v31 = vld [vmem:[#allocation23 + $0x64] ss:$24 sps:$4 sm:$0xff]   ;;  %3932 = vmatprep.subr.bf16.mxu0 %v9574_v8  ;;  %v9594_v27 = vld [vmem:[#allocation23 + $0x68] ss:$24 sps:$4 sm:$0xff]  }
 0x971   :  { %7984 = vpow2.f32 %v6936_v50  ;;  %v9587_v12 = vld [vmem:[#allocation23 + $0x6c] ss:$24 sps:$4 sm:$0xff]   ;;  %v9599_v30 = vld [vmem:[#allocation23 + $0x9c] ss:$24 sps:$4 sm:$0xff]   ;;  %v9602_v35 = vld [vmem:[#allocation23 + $0x90] ss:$24 sps:$4 sm:$0xff]  }
 0x972   :  { %7986 = vtanh.f32 %v3356_v45  ;;  %3892 = vmatpush1.bf16.msra.mxu1 %v9578_v18  ;;  %v9590_v45 = vld [vmem:[#allocation23 + $0x60] ss:$24 sps:$4 sm:$0xff]   ;;  %v9596_v60 = vld [vmem:[#allocation23 + $0x94] ss:$24 sps:$4 sm:$0xff]   ;;  %v9608_v50 = vld [vmem:[#allocation23 + $0xc4] ss:$24 sps:$4 sm:$0xff]  }
 0x973   :  { %3933 = vmatpush1.bf16.msra.mxu0 %v9582_v39  ;;  %3893 = vmatprep.subr.bf16.mxu1 %v9584_v31  ;;  %v9606_v40 = vld [vmem:[#allocation23 + $0x98] ss:$24 sps:$4 sm:$0xff]   ;;  %v6937_v16 = vmul.f32 -1.442695, %v9540_v38 }
 0x974   :  { %3934 = vmatprep.subr.bf16.mxu0 %v9587_v12 }
 0x976   :  { %3894 = vmatpush1.bf16.msra.mxu1 %v9590_v45 }
 0x977   :  { %3935 = vmatpush1.bf16.msra.mxu0 %v9594_v27  ;;  %3895 = vmatprep.subr.bf16.mxu1 %v9596_v60 }
 0x978   :  { %3936 = vmatprep.subr.bf16.mxu0 %v9599_v30 }
 0x97a   :  { %v7983_v10 = vpop.eup %7982  ;;  %3896 = vmatpush1.bf16.msra.mxu1 %v9602_v35 }
 0x97b   :  { %v3372_v22 = vadd.f32 1.0, %v7983_v10  ;;  %v7985_v20 = vpop.eup %7984  ;;  %v9611_v10 = vld [vmem:[#allocation23 + $0xcc] ss:$24 sps:$4 sm:$0xff]   ;;  %3937 = vmatpush1.bf16.msra.mxu0 %v9606_v40  ;;  %3897 = vmatprep.subr.bf16.mxu1 %v9608_v50 }
 0x97c   :  { %v3373_v42 = vadd.f32 1.0, %v7985_v20  ;;  %v7987_v19 = vpop.eup %7986  ;;  %v9618_v20 = vld [vmem:[#allocation23 + $0xc8] ss:$24 sps:$4 sm:$0xff]   ;;  %3938 = vmatprep.subr.bf16.mxu0 %v9611_v10 }
 0x97d   :  { %7988 = vrcp.f32 %v3372_v22  ;;  %v9614_v22 = vld [vmem:[#allocation23 + $0xc0] ss:$24 sps:$4 sm:$0xff]  }
 0x97e   :  { %7990 = vrcp.f32 %v3373_v42  ;;  %v9621_v42 = vld [vmem:[#allocation23 + $0xfc] ss:$24 sps:$4 sm:$0xff]   ;;  %3898 = vmatpush1.bf16.msra.mxu1 %v9614_v22 }
 0x97f   :  { %3939 = vmatpush1.bf16.msra.mxu0 %v9618_v20  ;;  %3899 = vmatprep.subr.bf16.mxu1 %v9452_v25  ;;  %v9642_v25 = vld [vmem:[#allocation23 + $0x158] ss:$24 sps:$4 sm:$0xff]  }
 0x980   :  { %3940 = vmatprep.subr.bf16.mxu0 %v9621_v42 }
 0x982   :  { %3900 = vmatpush1.bf16.msra.mxu1 %v9450_v28  ;;  %v9647_v28 = vld [vmem:[#allocation23 + $0x18c] ss:$24 sps:$4 sm:$0xff]  }
 0x983   :  { %3901 = vmatprep.subr.bf16.mxu1 %v9454_v0  ;;  %v9650_v0 = vld [vmem:[#allocation23 + $0x180] ss:$24 sps:$4 sm:$0xff]  }
 0x986   :  { %3902 = vmatpush1.bf16.msra.mxu1 %v9458_v4  ;;  %v9654_v4 = vld [vmem:[#allocation23 + $0x188] ss:$24 sps:$4 sm:$0xff]  }
 0x987   :  { %v7989_v3 = vpop.eup %7988  ;;  %3903 = vmatprep.subr.bf16.mxu1 %v9461_v2  ;;  %v9659_v2 = vld [vmem:[#allocation23 + $0x1bc] ss:$24 sps:$4 sm:$0xff]  }
 0x988   :  { %v3383_v13 = vmul.f32 %v7989_v3, %v7987_v19  ;;  %v7991_v23 = vpop.eup %7990  ;;  %v9626_v19 = vld [vmem:[#allocation23 + $0xf8] ss:$24 sps:$4 sm:$0xff]   ;;  %v9629_v3 = vld [vmem:[#allocation23 + $0x12c] ss:$24 sps:$4 sm:$0xff]  }
 0x989   :  { %v3382_v55 = vmul.f32 %v7991_v23, %v9546_v14  ;;  %3941 = vmatpush1.bf16.msra.mxu0 %v9626_v19  ;;  %v9637_v23 = vld [vmem:[#allocation23 + $0x15c] ss:$24 sps:$4 sm:$0xff]  }
 0x98a   :  { %3942 = vmatprep.subr.bf16.mxu0 %v9629_v3  ;;  %3904 = vmatpush1.bf16.msra.mxu1 %v9464_v5  ;;  %v9666_v5 = vld [vmem:[#allocation23 + $0x1b8] ss:$24 sps:$4 sm:$0xff]  }
 0x98b   :  { %v9549_v32 = vadd.f32 %v3383_v13, %v3382_v55  ;;  %v9634_v13 = vld [vmem:[#allocation23 + $0x128] ss:$24 sps:$4 sm:$0xff]   ;;  %v9644_v55 = vld [vmem:[#allocation23 + $0x184] ss:$24 sps:$4 sm:$0xff]  }
 0x98c   :  { %3905 = vmatprep.subr.bf16.mxu1 %v9644_v55 }
 0x98d   :  { %3943 = vmatpush1.bf16.msra.mxu0 %v9634_v13 }
 0x98e   :  { %3944 = vmatprep.subr.bf16.mxu0 %v9637_v23  ;;  %3906 = vmatpush1.bf16.msra.mxu1 %v9650_v0 }
 0x98f   :  { %3907 = vmatprep.subr.bf16.mxu1 %v9656_v34 }
 0x991   :  { %3945 = vmatpush1.bf16.msra.mxu0 %v9642_v25 }
 0x992   :  { %3946 = vmatprep.subr.bf16.mxu0 %v9647_v28 }
 0x995   :  { %3947 = vmatpush1.bf16.msra.mxu0 %v9654_v4 }
 0x996   :  { %3948 = vmatprep.subr.bf16.mxu0 %v9659_v2 }
 0x999   :  { %3949 = vmatpush1.bf16.msra.mxu0 %v9666_v5 }
 0x99b   :  { %v3339_v63 = vpop.f32.mrb[52].mxu0 }
 0x99c   :  { %v3361_v56 = vadd.f32 %v3359_v36, %v3339_v63  ;;  %v3341_v29 = vpop.f32.mrb[53].mxu0  ;;  %v9662_v36 = vld [vmem:[#allocation23 + $0x1b0] ss:$24 sps:$4 sm:$0xff]   ;;  %v9668_v63 = vld [vmem:[#allocation23 + $0x1e4] ss:$24 sps:$4 sm:$0xff]  }
 0x99d   :  { %v9553_v46 = vadd.f32 %v3360_v54, %v3341_v29  ;;  %v3343_v11 = vpop.f32.mrb[54].mxu0  ;;  %v9671_v54 = vld [vmem:[#allocation23 + $0x1ec] ss:$24 sps:$4 sm:$0xff]   ;;  %3908 = vmatpush1.bf16.msra.mxu1 %v9662_v36  ;;  %v9678_v29 = vld [vmem:[#allocation23 + $0x1e8] ss:$24 sps:$4 sm:$0xff]  }
 0x99e   :  { %v3344_v58 = vpop.f32.mrb[55].mxu0  ;;  %v6938_v33 = vmul.f32 -1.442695, %v3361_v56  ;;  %v9674_v56 = vld [vmem:[#allocation23 + $0x1e0] ss:$24 sps:$4 sm:$0xff]   ;;  %3909 = vmatprep.subr.bf16.mxu1 %v9668_v63  ;;  %3950 = vmatprep.subr.bf16.mxu0 %v9671_v54  ;;  %v9687_v11 = vsel %vm2762_vm15, %v9484_v1, %v9481_v44 }
 0x99f   :  { %7992 = vtanh.f32 %v9553_v46  ;;  %3951 = vmatpush1.bf16.msra.mxu0 %v9678_v29  ;;  %v9706_v44 = vld [vmem:[#allocation23 + $0x14] ss:$24 sps:$4 sm:$0xff]  }
 0x9a0   :  { %7994 = vpow2.f32 %v6938_v33  ;;  %v9697_v33 = vld [vmem:[#allocation23 + $0x21c] ss:$24 sps:$4 sm:$0xff]  }
 0x9a1   :  { %3910 = vmatpush1.bf16.msra.mxu1 %v9674_v56  ;;  %3952 = vmatprep.subr.bf16.mxu0 %v9697_v33 }
 0x9a2   :  { %3911 = vmatprep.subr.bf16.mxu1 %v9691_v6 }
 0x9a9   :  { %v7993_v49 = vpop.eup %7992 }
 0x9aa   :  { %3402 = vrot.lane.b32.xlu1 %v7993_v49, %s8457_s21  ;;  %v7995_v26 = vpop.eup %7994 }
 0x9ab   :  { %v3393_v37 = vadd.f32 1.0, %v7995_v26  ;;  %v9700_v26 = vld [vmem:[#allocation23 + $0x218] ss:$24 sps:$4 sm:$0xff]  }
 0x9ac   :  { %3953 = vmatpush1.bf16.msra.mxu0 %v9700_v26 }
 0x9ad   :  { %7996 = vrcp.f32 %v3393_v37  ;;  %4555 = vmatprep.subr.bf16.mxu0 %v9565_v47  ;;  %v6939_v37 = vmul.f32 -1.442695, %v9553_v46 }
 0x9ae   :  { %3426 = vperm.xlu1 %7412, %v3424_v43   ;;  %v9695_v43 = vld [vmem:[#allocation23 + $0x210] ss:$24 sps:$4 sm:$0xff]  }
 0x9af   :  { %3912 = vmatpush1.bf16.msra.mxu1 %v9695_v43 }
 0x9b0   :  { %3971 = vmatprep.subr.bf16.mxu1 %v9706_v44 }
 0x9b7   :  { %v9558_v17 = vpop.eup %7996 }
 0x9b8   :  { %v3400_v58 = vmul.f32 %v9558_v17, %v9687_v11 }
 0xa1c   :  { %v3403_v24 = vpop.permute.xlu1 %3402 }
 0xa1d   :  { %v3405_v41 = vmul.f32 %v9558_v17, %v3403_v24 }
 0xa1f   :  { %3407 = vrot.lane.b32.xlu0 %v3405_v41, %s8457_s21 }
 0xa23   :  { %3419 = vperm.xlu0 %7413, %v3417_v21  }
 0xa2d   :  { %v9714_v21 = vpop.permute.xlu1 %3426 }
 0xa2e   :  { %vm3428_vm4 = vcmp.eq.s32.totalorder %v9714_v21, 1 }
 0xa91   :  { %v3408_v62 = vpop.permute.xlu0 %3407 }
 0xa92   :  { %v9693_v49 = vadd.f32 %v3408_v62, %v3400_v58 }
 0xa94   :  { %7998 = vtanh.f32 %v9693_v49 }
 0xa95   :  { %8000 = vpow2.f32 %v6937_v16 }
 0xa96   :  { %8002 = vpow2.f32 %v6939_v37 }
 0xa97   :  { %8004 = vtanh.f32 %v9549_v32 }
 0xa9e   :  { %v7999_v1 = vpop.eup %7998 }
 0xa9f   :  { %3413 = vrot.lane.b32.xlu1 %v7999_v1, %s8457_s21  ;;  %v8001_v7 = vpop.eup %8000 }
 0xaa0   :  { %v8003_v17 = vpop.eup %8002  ;;  %v3374_v24 = vadd.f32 1.0, %v8001_v7 }
 0xaa1   :  { %v3394_v41 = vadd.f32 1.0, %v8003_v17  ;;  %v8005_v58 = vpop.eup %8004 }
 0xaa2   :  { %8006 = vrcp.f32 %v3374_v24  ;;  %v9716_v47 = vpop.permute.xlu0 %3419  ;;  %v9732_v24 = vld [vmem:[#allocation23 + $0x10] ss:$24 sps:$4 sm:$0xff]  }
 0xaa3   :  { %8008 = vrcp.f32 %v3394_v41  ;;  %vm3421_vm3 = vcmp.eq.s32.totalorder %v9716_v47, 1 }
 0xaac   :  { %v8007_v62 = vpop.eup %8006 }
 0xaad   :  { %v8009_v38 = vpop.eup %8008  ;;  %v3386_v46 = vmul.f32 %v8007_v62, %v8005_v58  ;;  %v9736_v58 = vld [vmem:[#allocation23 + $0x44] ss:$24 sps:$4 sm:$0xff]   ;;  %v9742_v62 = vld [vmem:[#allocation23 + $0x40] ss:$24 sps:$4 sm:$0xff]  }
 0xaaf   :  { %v9723_v37 = vsel %vm3421_vm3, %v3386_v46, %v9499_v48  ;;  %v9750_v46 = vld [vmem:[#allocation23 + $0x70] ss:$24 sps:$4 sm:$0xff]  }
 0xab0   :  { %10549 = vst [vmem:[#allocation60_spill] sm:$0xff] %v9723_v37  ;;  %v3452_v41 = vpack.c.bf16 %v9723_v37, %v9723_v37  ;;  %v9805_v48 = vld [vmem:[#allocation23 + $0x1f0] ss:$24 sps:$4 sm:$0xff]  }
 0xb11   :  { %v3414_v1 = vpop.permute.xlu1 %3413 }
 0xb12   :  { %v3416_v16 = vmul.f32 %v8009_v38, %v3414_v1  ;;  %v9745_v38 = vld [vmem:[#allocation23 + $0x74] ss:$24 sps:$4 sm:$0xff]   ;;  %v9753_v1 = vld [vmem:[#allocation23 + $0xa4] ss:$24 sps:$4 sm:$0xff]  }
 0xb14   :  { %v9728_v7 = vsel %vm3428_vm4, %v3416_v16, %v9504_v15  ;;  %v9758_v16 = vld [vmem:[#allocation23 + $0xa0] ss:$24 sps:$4 sm:$0xff]   ;;  %v9802_v15 = vld [vmem:[#allocation23 + $0x1f4] ss:$24 sps:$4 sm:$0xff]  }
 0xb15   :  { %10550 = vst [vmem:[#allocation61_spill] sm:$0xff] %v9728_v7  ;;  %v3453_v17 = vpack.c.bf16 %v9728_v7, %v9728_v7 }
 0xb17   :  { %7012 = vmatprep.mubr.msk.bf16.mxu1 %vm209_vm0, %v3453_v17  ;;  %7013 = vmatprep.mubr.msk.bf16.mxu0 %vm209_vm0, %v3453_v17 }
 0xb18   :  { %3922 = vmatmul.mubr.bf16.vlgmr.msra.gmra.mrb[40].mxu1 %v3452_v41  ;;  %3963 = vmatmul.mubr.bf16.vlgmr.msra.gmra.mrb[56].mxu0 %v3452_v41 }
 0xb19   :  { %3972 = vmatpush1.bf16.msra.mxu1 %v9732_v24  ;;  %7014 = vmatprep.mubr.msk.bf16.mxu1 %vm209_vm0, %v3453_v17  ;;  %v9784_v17 = vld [vmem:[#allocation23 + $0x164] ss:$24 sps:$4 sm:$0xff]  }
 0xb1a   :  { %3973 = vmatprep.subr.bf16.mxu1 %v9736_v58  ;;  %4556 = vmatpush1.bf16.msra.mxu0 %v9563_v53  ;;  %v9761_v53 = vld [vmem:[#allocation23 + $0xd4] ss:$24 sps:$4 sm:$0xff]  }
 0xb1b   :  { %4557 = vmatprep.subr.bf16.mxu0 %v9571_v9  ;;  %v9766_v9 = vld [vmem:[#allocation23 + $0xd0] ss:$24 sps:$4 sm:$0xff]  }
 0xb1d   :  { %3974 = vmatpush1.bf16.msra.mxu1 %v9742_v62 }
 0xb1e   :  { %3975 = vmatprep.subr.bf16.mxu1 %v9745_v38  ;;  %4558 = vmatpush1.bf16.msra.mxu0 %v9578_v18  ;;  %v9769_v18 = vld [vmem:[#allocation23 + $0x104] ss:$24 sps:$4 sm:$0xff]  }
 0xb1f   :  { %4559 = vmatprep.subr.bf16.mxu0 %v9584_v31  ;;  %v9774_v31 = vld [vmem:[#allocation23 + $0x100] ss:$24 sps:$4 sm:$0xff]  }
 0xb21   :  { %3976 = vmatpush1.bf16.msra.mxu1 %v9750_v46 }
 0xb22   :  { %3977 = vmatprep.subr.bf16.mxu1 %v9753_v1  ;;  %4560 = vmatpush1.bf16.msra.mxu0 %v9590_v45  ;;  %v9777_v45 = vld [vmem:[#allocation23 + $0x134] ss:$24 sps:$4 sm:$0xff]  }
 0xb23   :  { %4561 = vmatprep.subr.bf16.mxu0 %v9596_v60  ;;  %v9781_v60 = vld [vmem:[#allocation23 + $0x130] ss:$24 sps:$4 sm:$0xff]  }
 0xb25   :  { %3978 = vmatpush1.bf16.msra.mxu1 %v9758_v16 }
 0xb26   :  { %3979 = vmatprep.subr.bf16.mxu1 %v9761_v53  ;;  %4562 = vmatpush1.bf16.msra.mxu0 %v9602_v35  ;;  %v9787_v35 = vld [vmem:[#allocation23 + $0x160] ss:$24 sps:$4 sm:$0xff]  }
 0xb27   :  { %4563 = vmatprep.subr.bf16.mxu0 %v9608_v50  ;;  %10551 = vst [vmem:[#allocation62_spill] sm:$0xff] %v9787_v35  ;;  %v9790_v50 = vld [vmem:[#allocation23 + $0x194] ss:$24 sps:$4 sm:$0xff]  }
 0xb28   :  { %10552 = vst [vmem:[#allocation63_spill] sm:$0xff] %v9790_v50 }
 0xb29   :  { %3980 = vmatpush1.bf16.msra.mxu1 %v9766_v9 }
 0xb2a   :  { %3981 = vmatprep.subr.bf16.mxu1 %v9769_v18  ;;  %4564 = vmatpush1.bf16.msra.mxu0 %v9614_v22  ;;  %v9796_v22 = vld [vmem:[#allocation23 + $0x1c4] ss:$24 sps:$4 sm:$0xff]  }
 0xb2d   :  { %3982 = vmatpush1.bf16.msra.mxu1 %v9774_v31 }
 0xb2e   :  { %3983 = vmatprep.subr.bf16.mxu1 %v9777_v45 }
 0xb31   :  { %3984 = vmatpush1.bf16.msra.mxu1 %v9781_v60 }
 0xb32   :  { %3985 = vmatprep.subr.bf16.mxu1 %v9784_v17 }
 0xb35   :  { %3986 = vmatpush1.bf16.msra.mxu1 %v9787_v35  ;;  %v9808_v35 = vld [vmem:[#allocation23 + $0x224] ss:$24 sps:$4 sm:$0xff]  }
 0xb36   :  { %3987 = vmatprep.subr.bf16.mxu1 %v9790_v50  ;;  %v9811_v50 = vld [vmem:[#allocation23 + $0x220] ss:$24 sps:$4 sm:$0xff]  }
 0xb39   :  { %3988 = vmatpush1.bf16.msra.mxu1 %v9793_v59 }
 0xb3a   :  { %3989 = vmatprep.subr.bf16.mxu1 %v9796_v22 }
 0xb3d   :  { %3990 = vmatpush1.bf16.msra.mxu1 %v9799_v52 }
 0xb3e   :  { %3991 = vmatprep.subr.bf16.mxu1 %v9802_v15 }
 0xb41   :  { %3992 = vmatpush1.bf16.msra.mxu1 %v9805_v48 }
 0xb42   :  { %3993 = vmatprep.subr.bf16.mxu1 %v9808_v35 }
 0xb45   :  { %3994 = vmatpush1.bf16.msra.mxu1 %v9811_v50 }
 0xb46   :  { %4596 = vmatprep.subr.bf16.mxu1 %v9569_v57 }
 0xb48   :  { %4004 = vmatmul.mubr.bf16.vlgmr.msra.gmra.mrb[44].mxu1 %v3452_v41 }
 0xb49   :  { %4597 = vmatpush1.bf16.msra.mxu1 %v9567_v51  ;;  %v10553_v51 = vld [vmem:[#allocation44_spill] sm:$0xff] }
 0xb4a   :  { %4598 = vmatprep.subr.bf16.mxu1 %v9574_v8  ;;  %v4015_v57 = vunpack.c.l.bf16 %v10553_v51  ;;  %v10554_v8 = vld [vmem:[#allocation43_spill] sm:$0xff] }
 0xb4d   :  { %4599 = vmatpush1.bf16.msra.mxu1 %v9582_v39  ;;  %v4017_v39 = vunpack.c.l.bf16 %v10554_v8 }
 0xb4e   :  { %4600 = vmatprep.subr.bf16.mxu1 %v9587_v12 }
 0xb51   :  { %4601 = vmatpush1.bf16.msra.mxu1 %v9594_v27 }
 0xb52   :  { %4602 = vmatprep.subr.bf16.mxu1 %v9599_v30  ;;  %v4016_v30 = vunpack.c.h.bf16 %v10553_v51 }
 0xb55   :  { %4603 = vmatpush1.bf16.msra.mxu1 %v9606_v40  ;;  %v4018_v40 = vunpack.c.h.bf16 %v10554_v8 }
 0xb56   :  { %4604 = vmatprep.subr.bf16.mxu1 %v9611_v10 }
 0xb59   :  { %4605 = vmatpush1.bf16.msra.mxu1 %v9618_v20 }
 0xb5a   :  { %4606 = vmatprep.subr.bf16.mxu1 %v9621_v42 }
 0xb5d   :  { %4607 = vmatpush1.bf16.msra.mxu1 %v9626_v19 }
 0xb5e   :  { %4608 = vmatprep.subr.bf16.mxu1 %v9629_v3 }
 0xb61   :  { %4609 = vmatpush1.bf16.msra.mxu1 %v9634_v13 }
 0xb62   :  { %4610 = vmatprep.subr.bf16.mxu1 %v9637_v23 }
 0xb65   :  { %4611 = vmatpush1.bf16.msra.mxu1 %v9642_v25 }
 0xb66   :  { %4612 = vmatprep.subr.bf16.mxu1 %v9647_v28 }
 0xb69   :  { %4613 = vmatpush1.bf16.msra.mxu1 %v9654_v4 }
 0xb6a   :  { %4614 = vmatprep.subr.bf16.mxu1 %v9659_v2 }
 0xb6d   :  { %4615 = vmatpush1.bf16.msra.mxu1 %v9666_v5 }
 0xb6e   :  { %4616 = vmatprep.subr.bf16.mxu1 %v9671_v54 }
 0xb71   :  { %4617 = vmatpush1.bf16.msra.mxu1 %v9678_v29 }
 0xb72   :  { %4618 = vmatprep.subr.bf16.mxu1 %v9697_v33 }
 0xb75   :  { %4619 = vmatpush1.bf16.msra.mxu1 %v9700_v26 }
 0xbeb   :  { %v3923_v12 = vpop.f32.mrb[40].mxu1  ;;  %v3964_v27 = vpop.f32.mrb[56].mxu0 }
 0xbec   :  { %v4019_v10 = vadd.f32 %v4015_v57, %v3923_v12  ;;  %v9843_v20 = vadd.f32 %v4017_v39, %v3964_v27  ;;  %v3925_v42 = vpop.f32.mrb[41].mxu1  ;;  %v3966_v19 = vpop.f32.mrb[57].mxu0  ;;  %v9849_v39 = vsel %vm3421_vm3, %v9549_v32, %v9546_v14 }
 0xbed   :  { %v4020_v3 = vadd.f32 %v4016_v30, %v3925_v42  ;;  %v4022_v13 = vadd.f32 %v4018_v40, %v3966_v19  ;;  %v3927_v23 = vpop.f32.mrb[42].mxu1  ;;  %v3968_v25 = vpop.f32.mrb[58].mxu0  ;;  %v10555_v30 = vld [vmem:[#allocation52_spill] sm:$0xff] }
 0xbee   :  { %v7015_v28 = vmul.f32 -1.442695, %v4019_v10  ;;  %v3928_v4 = vpop.f32.mrb[43].mxu1  ;;  %v3969_v2 = vpop.f32.mrb[59].mxu0  ;;  %v4025_v40 = vunpack.c.l.bf16 %v10555_v30  ;;  %v4026_v42 = vunpack.c.h.bf16 %v10555_v30  ;;  %v9871_v30 = vld [vmem:[#allocation23 + $0x154] ss:$24 sps:$4 sm:$0xff]  }
 0xbef   :  { %v7016_v5 = vmul.f32 -1.442695, %v4020_v3 }
 0xbf0   :  { %8010 = vpow2.f32 %v7015_v28  ;;  %v3445_v28 = vld [vmem:[#allocation16 + $0x20] sm:$0xff] }
 0xbf1   :  { %8012 = vpow2.f32 %v7016_v5  ;;  %v3448_v4 = vand.u32 2, %v3445_v28 }
 0xbf2   :  { %8014 = vtanh.f32 %v4022_v13 }
 0xbf3   :  { %vm3449_vm5 = vcmp.gt.s32.totalorder %v3448_v4, 0 }
 0xbf4   :  { %v4090_v32 = vsel %vm3449_vm5, 1, %v10539_v61 }
 0xbfa   :  { %v8011_v54 = vpop.eup %8010 }
 0xbfb   :  { %v4038_v29 = vadd.f32 1.0, %v8011_v54  ;;  %v8013_v33 = vpop.eup %8012  ;;  %v3446_v54 = vand.u32 1, %v3445_v28 }
 0xbfc   :  { %v4039_v26 = vadd.f32 1.0, %v8013_v33  ;;  %v8015_v41 = vpop.eup %8014 }
 0xbfd   :  { %8016 = vrcp.f32 %v4038_v29  ;;  %vm3447_vm6 = vcmp.gt.s32.totalorder %v3446_v54, 0 }
 0xbfe   :  { %8018 = vrcp.f32 %v4039_v26 }
 0xc07   :  { %v8017_v51 = vpop.eup %8016 }
 0xc08   :  { %v4049_v57 = vmul.f32 %v8017_v51, %v8015_v41  ;;  %v8019_v8 = vpop.eup %8018  ;;  %v4083_v41 = vsel %vm3447_vm6, 1, %v10539_v61  ;;  %v9860_v51 = vld [vmem:[#allocation23 + $0xf0] ss:$24 sps:$4 sm:$0xff]  }
 0xc09   :  { %v4048_v12 = vmul.f32 %v8019_v8, %v9849_v39  ;;  %v9864_v8 = vld [vmem:[#allocation23 + $0x124] ss:$24 sps:$4 sm:$0xff]  }
 0xc0b   :  { %v9852_v27 = vadd.f32 %v4049_v57, %v4048_v12  ;;  %v9862_v57 = vld [vmem:[#allocation23 + $0xf4] ss:$24 sps:$4 sm:$0xff]   ;;  %v9868_v12 = vld [vmem:[#allocation23 + $0x120] ss:$24 sps:$4 sm:$0xff]  }
 0xc0c   :  { %4565 = vmatprep.subr.bf16.mxu0 %v9862_v57 }
 0xc0d   :  { %4566 = vmatpush1.bf16.msra.mxu0 %v9860_v51 }
 0xc0e   :  { %4567 = vmatprep.subr.bf16.mxu0 %v9864_v8 }
 0xc11   :  { %4568 = vmatpush1.bf16.msra.mxu0 %v9868_v12 }
 0xc12   :  { %4569 = vmatprep.subr.bf16.mxu0 %v9871_v30 }
 0xc1b   :  { %v4005_v10 = vpop.f32.mrb[44].mxu1 }
 0xc1c   :  { %v4027_v19 = vadd.f32 %v4025_v40, %v4005_v10  ;;  %v4007_v3 = vpop.f32.mrb[45].mxu1  ;;  %v9874_v40 = vld [vmem:[#allocation23 + $0x150] ss:$24 sps:$4 sm:$0xff]  }
 0xc1d   :  { %v4028_v13 = vadd.f32 %v4026_v42, %v4007_v3  ;;  %v4009_v23 = vpop.f32.mrb[46].mxu1  ;;  %4570 = vmatpush1.bf16.msra.mxu0 %v9874_v40 }
 0xc1e   :  { %v4010_v25 = vpop.f32.mrb[47].mxu1  ;;  %v7018_v47 = vmul.f32 -1.442695, %v4027_v19  ;;  %4571 = vmatprep.subr.bf16.mxu0 %v9644_v55  ;;  %v9891_v55 = vsel %vm3428_vm4, %v9693_v49, %v9687_v11 }
 0xc1f   :  { %8020 = vtanh.f32 %v4028_v13 }
 0xc20   :  { %8022 = vpow2.f32 %v7018_v47 }
 0xc21   :  { %4572 = vmatpush1.bf16.msra.mxu0 %v9650_v0 }
 0xc22   :  { %4573 = vmatprep.subr.bf16.mxu0 %v9656_v34 }
 0xc25   :  { %4574 = vmatpush1.bf16.msra.mxu0 %v9662_v36 }
 0xc26   :  { %4575 = vmatprep.subr.bf16.mxu0 %v9668_v63 }
 0xc29   :  { %v8021_v14 = vpop.eup %8020  ;;  %4576 = vmatpush1.bf16.msra.mxu0 %v9674_v56  ;;  %v7017_v56 = vmul.f32 -1.442695, %v9843_v20 }
 0xc2a   :  { %4068 = vrot.lane.b32.xlu0 %v8021_v14, %s8457_s21  ;;  %v8023_v2 = vpop.eup %8022  ;;  %4577 = vmatprep.subr.bf16.mxu0 %v9691_v6  ;;  %v7019_v6 = vmul.f32 -1.442695, %v4028_v13 }
 0xc2b   :  { %v4059_v5 = vadd.f32 1.0, %v8023_v2 }
 0xc2d   :  { %8024 = vrcp.f32 %v4059_v5  ;;  %4578 = vmatpush1.bf16.msra.mxu0 %v9695_v43 }
 0xc2e   :  { %4092 = vperm.xlu0 %7413, %v4090_v32   ;;  %4637 = vmatprep.subr.bf16.mxu0 %v9706_v44 }
 0xc37   :  { %v8025_v29 = vpop.eup %8024 }
 0xc38   :  { %v4066_v0 = vmul.f32 %v8025_v29, %v9891_v55 }
 0xc9c   :  { %v4069_v33 = vpop.permute.xlu0 %4068 }
 0xc9d   :  { %v4071_v26 = vmul.f32 %v8025_v29, %v4069_v33 }
 0xc9f   :  { %4073 = vrot.lane.b32.xlu1 %v4071_v26, %s8457_s21 }
 0xca3   :  { %4085 = vperm.xlu1 %7412, %v4083_v41  }
 0xcad   :  { %v9900_v49 = vpop.permute.xlu0 %4092 }
 0xcae   :  { %vm4094_vm8 = vcmp.eq.s32.totalorder %v9900_v49, 1 }
 0xd11   :  { %v4074_v34 = vpop.permute.xlu1 %4073 }
 0xd12   :  { %v9894_v36 = vadd.f32 %v4074_v34, %v4066_v0 }
 0xd14   :  { %8026 = vtanh.f32 %v9894_v36 }
 0xd15   :  { %8028 = vpow2.f32 %v7017_v56  ;;  %v10562_v56 = vld [vmem:[#allocation53_spill] sm:$0xff] }
 0xd16   :  { %8030 = vpow2.f32 %v7019_v6  ;;  %v4691_v6 = vunpack.c.l.bf16 %v10562_v56 }
 0xd17   :  { %8032 = vtanh.f32 %v9852_v27 }
 0xd1e   :  { %v8027_v63 = vpop.eup %8026 }
 0xd1f   :  { %4079 = vrot.lane.b32.xlu0 %v8027_v63, %s8457_s21  ;;  %v8029_v43 = vpop.eup %8028 }
 0xd20   :  { %v8031_v44 = vpop.eup %8030  ;;  %v4040_v21 = vadd.f32 1.0, %v8029_v43 }
 0xd21   :  { %v4060_v11 = vadd.f32 1.0, %v8031_v44  ;;  %v8033_v42 = vpop.eup %8032  ;;  %v4692_v44 = vunpack.c.h.bf16 %v10562_v56  ;;  %v10070_v56 = vld [vmem:[#allocation23 + $0x1b4] ss:$24 sps:$4 sm:$0xff]  }
 0xd22   :  { %8034 = vrcp.f32 %v4040_v21  ;;  %v9902_v10 = vpop.permute.xlu1 %4085 }
 0xd23   :  { %8036 = vrcp.f32 %v4060_v11  ;;  %vm4087_vm7 = vcmp.eq.s32.totalorder %v9902_v10, 1  ;;  %v9966_v10 = vld [vmem:[#allocation16 + $0x28] sm:$0xff] }
 0xd24   :  { %v9956_v0 = vsel %vm4087_vm7, %v9852_v27, %v9849_v39  ;;  %10563 = vst [vmem:[#allocation51_spill] sm:$0xff] %v9966_v10  ;;  %v4114_v39 = vand.u32 2, %v9966_v10 }
 0xd26   :  { %vm4115_vm9 = vcmp.gt.s32.totalorder %v4114_v39, 0 }
 0xd2c   :  { %v8035_v19 = vpop.eup %8034 }
 0xd2d   :  { %v8037_v20 = vpop.eup %8036  ;;  %v4052_v3 = vmul.f32 %v8035_v19, %v8033_v42 }
 0xd2f   :  { %v9909_v25 = vsel %vm4087_vm7, %v4052_v3, %v9723_v37  ;;  %v4756_v3 = vsel %vm4115_vm9, 1, %v10539_v61  ;;  %v10207_v37 = vld [vmem:[#allocation23 + $0x190] ss:$24 sps:$4 sm:$0xff]  }
 0xd30   :  { %10556 = vst [vmem:[#allocation42_spill] sm:$0xff] %v9909_v25  ;;  %v4118_v14 = vpack.c.bf16 %v9909_v25, %v9909_v25 }
 0xd91   :  { %v4080_v13 = vpop.permute.xlu0 %4079 }
 0xd92   :  { %v4082_v23 = vmul.f32 %v8037_v20, %v4080_v13 }
 0xd94   :  { %v9914_v28 = vsel %vm4094_vm8, %v4082_v23, %v9728_v7  ;;  %v10198_v7 = vld [vmem:[#allocation23 + $0x164] ss:$24 sps:$4 sm:$0xff]  }
 0xd95   :  { %10557 = vst [vmem:[#allocation41_spill] sm:$0xff] %v9914_v28  ;;  %v4119_v4 = vpack.c.bf16 %v9914_v28, %v9914_v28 }
 0xd97   :  { %7092 = vmatprep.mubr.msk.bf16.mxu0 %vm209_vm0, %v4119_v4  ;;  %7093 = vmatprep.mubr.msk.bf16.mxu1 %vm209_vm0, %v4119_v4 }
 0xd98   :  { %4588 = vmatmul.mubr.bf16.vlgmr.msra.gmra.mrb[60].mxu0 %v4118_v14  ;;  %4629 = vmatmul.mubr.bf16.vlgmr.msra.gmra.mrb[48].mxu1 %v4118_v14 }
 0xd99   :  { %4638 = vmatpush1.bf16.msra.mxu0 %v9732_v24  ;;  %7094 = vmatprep.mubr.msk.bf16.mxu0 %vm209_vm0, %v4119_v4  ;;  %v10558_v24 = vld [vmem:[#allocation62_spill] sm:$0xff] }
 0xd9a   :  { %4639 = vmatprep.subr.bf16.mxu0 %v9736_v58  ;;  %v10559_v58 = vld [vmem:[#allocation63_spill] sm:$0xff] }
 0xd9d   :  { %4640 = vmatpush1.bf16.msra.mxu0 %v9742_v62  ;;  %v10560_v62 = vld [vmem:[#allocation46_spill] sm:$0xff] }
 0xd9e   :  { %4641 = vmatprep.subr.bf16.mxu0 %v9745_v38  ;;  %v4681_v38 = vunpack.c.l.bf16 %v10560_v62 }
 0xda1   :  { %4642 = vmatpush1.bf16.msra.mxu0 %v9750_v46  ;;  %v10561_v46 = vld [vmem:[#allocation45_spill] sm:$0xff] }
 0xda2   :  { %4643 = vmatprep.subr.bf16.mxu0 %v9753_v1  ;;  %v4683_v1 = vunpack.c.l.bf16 %v10561_v46 }
 0xda5   :  { %4644 = vmatpush1.bf16.msra.mxu0 %v9758_v16 }
 0xda6   :  { %4645 = vmatprep.subr.bf16.mxu0 %v9761_v53 }
 0xda9   :  { %4646 = vmatpush1.bf16.msra.mxu0 %v9766_v9  ;;  %v4684_v9 = vunpack.c.h.bf16 %v10561_v46  ;;  %v9977_v46 = vld [vmem:[#allocation23] ss:$24 sps:$4 sm:$0xff]  }
 0xdaa   :  { %4647 = vmatprep.subr.bf16.mxu0 %v9769_v18 }
 0xdad   :  { %4648 = vmatpush1.bf16.msra.mxu0 %v9774_v31 }
 0xdae   :  { %4649 = vmatprep.subr.bf16.mxu0 %v9777_v45 }
 0xdb1   :  { %4650 = vmatpush1.bf16.msra.mxu0 %v9781_v60 }
 0xdb2   :  { %4651 = vmatprep.subr.bf16.mxu0 %v9784_v17 }
 0xdb5   :  { %4652 = vmatpush1.bf16.msra.mxu0 %v10558_v24 }
 0xdb6   :  { %4653 = vmatprep.subr.bf16.mxu0 %v10559_v58 }
 0xdb9   :  { %4654 = vmatpush1.bf16.msra.mxu0 %v9793_v59  ;;  %v4682_v59 = vunpack.c.h.bf16 %v10560_v62 }
 0xdba   :  { %4655 = vmatprep.subr.bf16.mxu0 %v9796_v22 }
 0xdbd   :  { %4656 = vmatpush1.bf16.msra.mxu0 %v9799_v52 }
 0xdbe   :  { %4657 = vmatprep.subr.bf16.mxu0 %v9802_v15 }
 0xdc1   :  { %4658 = vmatpush1.bf16.msra.mxu0 %v9805_v48 }
 0xdc2   :  { %4659 = vmatprep.subr.bf16.mxu0 %v9808_v35 }
 0xdc5   :  { %4660 = vmatpush1.bf16.msra.mxu0 %v9811_v50 }
 0xdc8   :  { %4670 = vmatmul.mubr.bf16.vlgmr.msra.gmra.mrb[64].mxu0 %v4118_v14  ;;  %v4112_v14 = vand.u32 1, %v9966_v10  ;;  %v10219_v10 = vld [vmem:[#allocation23 + $0x1f0] ss:$24 sps:$4 sm:$0xff]  }
 0xdca   :  { %vm4113_vm10 = vcmp.gt.s32.totalorder %v4112_v14, 0 }
 0xe6b   :  { %v4589_v16 = vpop.f32.mrb[60].mxu0  ;;  %v4630_v53 = vpop.f32.mrb[48].mxu1 }
 0xe6c   :  { %v4685_v52 = vadd.f32 %v4681_v38, %v4589_v16  ;;  %v9950_v18 = vadd.f32 %v4683_v1, %v4630_v53  ;;  %v4591_v15 = vpop.f32.mrb[61].mxu0  ;;  %v4632_v48 = vpop.f32.mrb[49].mxu1  ;;  %v4749_v38 = vsel %vm4113_vm10, 1, %v10539_v61  ;;  %v9979_v1 = vld [vmem:[#allocation23 + $0x4] ss:$24 sps:$4 sm:$0xff]  }
 0xe6d   :  { %v4686_v31 = vadd.f32 %v4682_v59, %v4591_v15  ;;  %v4688_v45 = vadd.f32 %v4684_v9, %v4632_v48  ;;  %v4593_v60 = vpop.f32.mrb[62].mxu0  ;;  %v4634_v17 = vpop.f32.mrb[50].mxu1  ;;  %v9981_v16 = vld [vmem:[#allocation23 + $0x8] ss:$24 sps:$4 sm:$0xff]   ;;  %v9983_v53 = vld [vmem:[#allocation23 + $0xc] ss:$24 sps:$4 sm:$0xff]   ;;  %5221 = vmatprep.subr.bf16.mxu1 %v9979_v1 }
 0xe6e   :  { %v7095_v35 = vmul.f32 -1.442695, %v4685_v52  ;;  %v4594_v50 = vpop.f32.mrb[63].mxu0  ;;  %v4635_v22 = vpop.f32.mrb[51].mxu1  ;;  %v9985_v59 = vld [vmem:[#allocation23 + $0x34] ss:$24 sps:$4 sm:$0xff]   ;;  %5222 = vmatpush1.bf16.msra.mxu1 %v9977_v46  ;;  %5262 = vmatprep.subr.bf16.mxu0 %v9983_v53 }
 0xe6f   :  { %v7096_v32 = vmul.f32 -1.442695, %v4686_v31  ;;  %v9988_v9 = vld [vmem:[#allocation23 + $0x3c] ss:$24 sps:$4 sm:$0xff]   ;;  %v9992_v52 = vld [vmem:[#allocation23 + $0x30] ss:$24 sps:$4 sm:$0xff]   ;;  %5263 = vmatpush1.bf16.msra.mxu0 %v9981_v16  ;;  %5223 = vmatprep.subr.bf16.mxu1 %v9985_v59 }
 0xe70   :  { %8038 = vpow2.f32 %v7095_v35  ;;  %v9996_v15 = vld [vmem:[#allocation23 + $0x38] ss:$24 sps:$4 sm:$0xff]   ;;  %v9998_v48 = vld [vmem:[#allocation23 + $0x64] ss:$24 sps:$4 sm:$0xff]   ;;  %5264 = vmatprep.subr.bf16.mxu0 %v9988_v9  ;;  %v10008_v60 = vld [vmem:[#allocation23 + $0x68] ss:$24 sps:$4 sm:$0xff]  }
 0xe71   :  { %8040 = vpow2.f32 %v7096_v32  ;;  %v10001_v31 = vld [vmem:[#allocation23 + $0x6c] ss:$24 sps:$4 sm:$0xff]   ;;  %v10013_v35 = vld [vmem:[#allocation23 + $0x9c] ss:$24 sps:$4 sm:$0xff]   ;;  %v10016_v50 = vld [vmem:[#allocation23 + $0x90] ss:$24 sps:$4 sm:$0xff]  }
 0xe72   :  { %8042 = vtanh.f32 %v4688_v45  ;;  %5224 = vmatpush1.bf16.msra.mxu1 %v9992_v52  ;;  %v10004_v45 = vld [vmem:[#allocation23 + $0x60] ss:$24 sps:$4 sm:$0xff]   ;;  %v10010_v17 = vld [vmem:[#allocation23 + $0x94] ss:$24 sps:$4 sm:$0xff]   ;;  %v10022_v32 = vld [vmem:[#allocation23 + $0xc4] ss:$24 sps:$4 sm:$0xff]  }
 0xe73   :  { %5265 = vmatpush1.bf16.msra.mxu0 %v9996_v15  ;;  %5225 = vmatprep.subr.bf16.mxu1 %v9998_v48  ;;  %v10020_v22 = vld [vmem:[#allocation23 + $0x98] ss:$24 sps:$4 sm:$0xff]   ;;  %v7097_v49 = vmul.f32 -1.442695, %v9950_v18 }
 0xe74   :  { %5266 = vmatprep.subr.bf16.mxu0 %v10001_v31 }
 0xe76   :  { %5226 = vmatpush1.bf16.msra.mxu1 %v10004_v45 }
 0xe77   :  { %5267 = vmatpush1.bf16.msra.mxu0 %v10008_v60  ;;  %5227 = vmatprep.subr.bf16.mxu1 %v10010_v17 }
 0xe78   :  { %5268 = vmatprep.subr.bf16.mxu0 %v10013_v35 }
 0xe7a   :  { %v8039_v47 = vpop.eup %8038  ;;  %5228 = vmatpush1.bf16.msra.mxu1 %v10016_v50 }
 0xe7b   :  { %v4704_v2 = vadd.f32 1.0, %v8039_v47  ;;  %v8041_v5 = vpop.eup %8040  ;;  %v10025_v47 = vld [vmem:[#allocation23 + $0xcc] ss:$24 sps:$4 sm:$0xff]   ;;  %5269 = vmatpush1.bf16.msra.mxu0 %v10020_v22  ;;  %5229 = vmatprep.subr.bf16.mxu1 %v10022_v32 }
 0xe7c   :  { %v4705_v54 = vadd.f32 1.0, %v8041_v5  ;;  %v8043_v29 = vpop.eup %8042  ;;  %v10032_v5 = vld [vmem:[#allocation23 + $0xc8] ss:$24 sps:$4 sm:$0xff]   ;;  %5270 = vmatprep.subr.bf16.mxu0 %v10025_v47 }
 0xe7d   :  { %8044 = vrcp.f32 %v4704_v2  ;;  %v10028_v2 = vld [vmem:[#allocation23 + $0xc0] ss:$24 sps:$4 sm:$0xff]  }
 0xe7e   :  { %8046 = vrcp.f32 %v4705_v54  ;;  %v10035_v54 = vld [vmem:[#allocation23 + $0xfc] ss:$24 sps:$4 sm:$0xff]   ;;  %5230 = vmatpush1.bf16.msra.mxu1 %v10028_v2 }
 0xe7f   :  { %5271 = vmatpush1.bf16.msra.mxu0 %v10032_v5  ;;  %5231 = vmatprep.subr.bf16.mxu1 %v9862_v57  ;;  %v10056_v57 = vld [vmem:[#allocation23 + $0x158] ss:$24 sps:$4 sm:$0xff]  }
 0xe80   :  { %5272 = vmatprep.subr.bf16.mxu0 %v10035_v54 }
 0xe82   :  { %5232 = vmatpush1.bf16.msra.mxu1 %v9860_v51  ;;  %v10061_v51 = vld [vmem:[#allocation23 + $0x18c] ss:$24 sps:$4 sm:$0xff]  }
 0xe83   :  { %5233 = vmatprep.subr.bf16.mxu1 %v9864_v8  ;;  %v10064_v8 = vld [vmem:[#allocation23 + $0x180] ss:$24 sps:$4 sm:$0xff]  }
 0xe86   :  { %5234 = vmatpush1.bf16.msra.mxu1 %v9868_v12  ;;  %v10068_v12 = vld [vmem:[#allocation23 + $0x188] ss:$24 sps:$4 sm:$0xff]  }
 0xe87   :  { %v8045_v33 = vpop.eup %8044  ;;  %5235 = vmatprep.subr.bf16.mxu1 %v9871_v30  ;;  %v10073_v30 = vld [vmem:[#allocation23 + $0x1bc] ss:$24 sps:$4 sm:$0xff]  }
 0xe88   :  { %v4715_v26 = vmul.f32 %v8045_v33, %v8043_v29  ;;  %v8047_v41 = vpop.eup %8046  ;;  %v10040_v29 = vld [vmem:[#allocation23 + $0xf8] ss:$24 sps:$4 sm:$0xff]   ;;  %v10043_v33 = vld [vmem:[#allocation23 + $0x12c] ss:$24 sps:$4 sm:$0xff]  }
 0xe89   :  { %v4714_v34 = vmul.f32 %v8047_v41, %v9956_v0  ;;  %5273 = vmatpush1.bf16.msra.mxu0 %v10040_v29  ;;  %v10051_v41 = vld [vmem:[#allocation23 + $0x15c] ss:$24 sps:$4 sm:$0xff]  }
 0xe8a   :  { %5274 = vmatprep.subr.bf16.mxu0 %v10043_v33  ;;  %5236 = vmatpush1.bf16.msra.mxu1 %v9874_v40  ;;  %v10080_v40 = vld [vmem:[#allocation23 + $0x1b8] ss:$24 sps:$4 sm:$0xff]  }
 0xe8b   :  { %v9959_v63 = vadd.f32 %v4715_v26, %v4714_v34  ;;  %v10048_v26 = vld [vmem:[#allocation23 + $0x128] ss:$24 sps:$4 sm:$0xff]   ;;  %v10058_v34 = vld [vmem:[#allocation23 + $0x184] ss:$24 sps:$4 sm:$0xff]  }
 0xe8c   :  { %5237 = vmatprep.subr.bf16.mxu1 %v10058_v34 }
 0xe8d   :  { %5275 = vmatpush1.bf16.msra.mxu0 %v10048_v26 }
 0xe8e   :  { %5276 = vmatprep.subr.bf16.mxu0 %v10051_v41  ;;  %5238 = vmatpush1.bf16.msra.mxu1 %v10064_v8 }
 0xe8f   :  { %5239 = vmatprep.subr.bf16.mxu1 %v10070_v56 }
 0xe91   :  { %5277 = vmatpush1.bf16.msra.mxu0 %v10056_v57 }
 0xe92   :  { %5278 = vmatprep.subr.bf16.mxu0 %v10061_v51 }
 0xe95   :  { %5279 = vmatpush1.bf16.msra.mxu0 %v10068_v12 }
 0xe96   :  { %5280 = vmatprep.subr.bf16.mxu0 %v10073_v30 }
 0xe99   :  { %5281 = vmatpush1.bf16.msra.mxu0 %v10080_v40 }
 0xe9b   :  { %v4671_v43 = vpop.f32.mrb[64].mxu0 }
 0xe9c   :  { %v4693_v21 = vadd.f32 %v4691_v6, %v4671_v43  ;;  %v4673_v11 = vpop.f32.mrb[65].mxu0  ;;  %v10076_v6 = vld [vmem:[#allocation23 + $0x1b0] ss:$24 sps:$4 sm:$0xff]   ;;  %v10082_v43 = vld [vmem:[#allocation23 + $0x1e4] ss:$24 sps:$4 sm:$0xff]  }
 0xe9d   :  { %v9963_v42 = vadd.f32 %v4692_v44, %v4673_v11  ;;  %v4675_v19 = vpop.f32.mrb[66].mxu0  ;;  %v10085_v44 = vld [vmem:[#allocation23 + $0x1ec] ss:$24 sps:$4 sm:$0xff]   ;;  %5240 = vmatpush1.bf16.msra.mxu1 %v10076_v6  ;;  %v10092_v11 = vld [vmem:[#allocation23 + $0x1e8] ss:$24 sps:$4 sm:$0xff]  }
 0xe9e   :  { %v4676_v20 = vpop.f32.mrb[67].mxu0  ;;  %v7098_v13 = vmul.f32 -1.442695, %v4693_v21  ;;  %v10088_v21 = vld [vmem:[#allocation23 + $0x1e0] ss:$24 sps:$4 sm:$0xff]   ;;  %5241 = vmatprep.subr.bf16.mxu1 %v10082_v43  ;;  %5282 = vmatprep.subr.bf16.mxu0 %v10085_v44  ;;  %v10101_v19 = vsel %vm4094_vm8, %v9894_v36, %v9891_v55 }
 0xe9f   :  { %8048 = vtanh.f32 %v9963_v42  ;;  %5283 = vmatpush1.bf16.msra.mxu0 %v10092_v11  ;;  %v10120_v55 = vld [vmem:[#allocation23 + $0x14] ss:$24 sps:$4 sm:$0xff]   ;;  %v7099_v14 = vmul.f32 -1.442695, %v9963_v42 }
 0xea0   :  { %8050 = vpow2.f32 %v7098_v13  ;;  %v10109_v13 = vld [vmem:[#allocation23 + $0x210] ss:$24 sps:$4 sm:$0xff]  }
 0xea1   :  { %5242 = vmatpush1.bf16.msra.mxu1 %v10088_v21 }
 0xea9   :  { %v8049_v27 = vpop.eup %8048 }
 0xeaa   :  { %4734 = vrot.lane.b32.xlu1 %v8049_v27, %s8457_s21  ;;  %v8051_v23 = vpop.eup %8050  ;;  %v10105_v27 = vld [vmem:[#allocation23 + $0x214] ss:$24 sps:$4 sm:$0xff]  }
 0xeab   :  { %v4725_v4 = vadd.f32 1.0, %v8051_v23  ;;  %v10111_v23 = vld [vmem:[#allocation23 + $0x21c] ss:$24 sps:$4 sm:$0xff]   ;;  %5243 = vmatprep.subr.bf16.mxu1 %v10105_v27 }
 0xeac   :  { %5244 = vmatpush1.bf16.msra.mxu1 %v10109_v13  ;;  %5284 = vmatprep.subr.bf16.mxu0 %v10111_v23 }
 0xead   :  { %8052 = vrcp.f32 %v4725_v4  ;;  %v10114_v4 = vld [vmem:[#allocation23 + $0x218] ss:$24 sps:$4 sm:$0xff]   ;;  %5303 = vmatprep.subr.bf16.mxu1 %v10120_v55 }
 0xeae   :  { %4758 = vperm.xlu1 %7412, %v4756_v3   ;;  %5285 = vmatpush1.bf16.msra.mxu0 %v10114_v4 }
 0xeaf   :  { %5887 = vmatprep.subr.bf16.mxu0 %v9979_v1 }
 0xeb7   :  { %v9972_v24 = vpop.eup %8052 }
 0xeb8   :  { %v4732_v20 = vmul.f32 %v9972_v24, %v10101_v19 }
 0xf1c   :  { %v4735_v58 = vpop.permute.xlu1 %4734 }
 0xf1d   :  { %v4737_v62 = vmul.f32 %v9972_v24, %v4735_v58 }
 0xf1f   :  { %4739 = vrot.lane.b32.xlu0 %v4737_v62, %s8457_s21 }
 0xf23   :  { %4751 = vperm.xlu0 %7413, %v4749_v38  }
 0xf2d   :  { %v10128_v1 = vpop.permute.xlu1 %4758 }
 0xf2e   :  { %vm4760_vm12 = vcmp.eq.s32.totalorder %v10128_v1, 1 }
 0xf91   :  { %v4740_v39 = vpop.permute.xlu0 %4739 }
 0xf92   :  { %v10107_v3 = vadd.f32 %v4740_v39, %v4732_v20 }
 0xf94   :  { %8054 = vtanh.f32 %v10107_v3 }
 0xf95   :  { %8056 = vpow2.f32 %v7097_v49 }
 0xf96   :  { %8058 = vpow2.f32 %v7099_v14 }
 0xf97   :  { %8060 = vtanh.f32 %v9959_v63 }
 0xf9e   :  { %v8055_v36 = vpop.eup %8054 }
 0xf9f   :  { %4745 = vrot.lane.b32.xlu1 %v8055_v36, %s8457_s21  ;;  %v8057_v24 = vpop.eup %8056 }
 0xfa0   :  { %v8059_v58 = vpop.eup %8058  ;;  %v4706_v62 = vadd.f32 1.0, %v8057_v24 }
 0xfa1   :  { %v4726_v38 = vadd.f32 1.0, %v8059_v58  ;;  %v8061_v39 = vpop.eup %8060 }
 0xfa2   :  { %8062 = vrcp.f32 %v4706_v62  ;;  %v10130_v20 = vpop.permute.xlu0 %4751 }
 0xfa3   :  { %8064 = vrcp.f32 %v4726_v38  ;;  %vm4753_vm11 = vcmp.eq.s32.totalorder %v10130_v20, 1  ;;  %v10146_v38 = vld [vmem:[#allocation23 + $0x10] ss:$24 sps:$4 sm:$0xff]  }
 0xfac   :  { %v8063_v36 = vpop.eup %8062 }
 0xfad   :  { %v8065_v18 = vpop.eup %8064  ;;  %v4718_v42 = vmul.f32 %v8063_v36, %v8061_v39  ;;  %v10150_v36 = vld [vmem:[#allocation23 + $0x44] ss:$24 sps:$4 sm:$0xff]  }
 0xfaf   :  { %v10137_v24 = vsel %vm4753_vm11, %v4718_v42, %v9909_v25  ;;  %v10159_v42 = vld [vmem:[#allocation23 + $0x74] ss:$24 sps:$4 sm:$0xff]  }
 0xfb0   :  { %v4784_v39 = vpack.c.bf16 %v10137_v24, %v10137_v24  ;;  %v10216_v25 = vld [vmem:[#allocation23 + $0x1f4] ss:$24 sps:$4 sm:$0xff]  }
0x1011   :  { %v4746_v49 = vpop.permute.xlu1 %4745 }
0x1012   :  { %v4748_v14 = vmul.f32 %v8065_v18, %v4746_v49  ;;  %v10156_v18 = vld [vmem:[#allocation23 + $0x40] ss:$24 sps:$4 sm:$0xff]   ;;  %v10164_v49 = vld [vmem:[#allocation23 + $0x70] ss:$24 sps:$4 sm:$0xff]  }
0x1014   :  { %v10142_v58 = vsel %vm4760_vm12, %v4748_v14, %v9914_v28  ;;  %v10167_v14 = vld [vmem:[#allocation23 + $0xa4] ss:$24 sps:$4 sm:$0xff]   ;;  %v10213_v28 = vld [vmem:[#allocation23 + $0x1c0] ss:$24 sps:$4 sm:$0xff]  }
0x1015   :  { %v4785_v62 = vpack.c.bf16 %v10142_v58, %v10142_v58 }
0x1017   :  { %7172 = vmatprep.mubr.msk.bf16.mxu1 %vm209_vm0, %v4785_v62  ;;  %7173 = vmatprep.mubr.msk.bf16.mxu0 %vm209_vm0, %v4785_v62 }
0x1018   :  { %5254 = vmatmul.mubr.bf16.vlgmr.msra.gmra.mrb[52].mxu1 %v4784_v39  ;;  %5295 = vmatmul.mubr.bf16.vlgmr.msra.gmra.mrb[68].mxu0 %v4784_v39 }
0x1019   :  { %5304 = vmatpush1.bf16.msra.mxu1 %v10146_v38  ;;  %7174 = vmatprep.mubr.msk.bf16.mxu1 %vm209_vm0, %v4785_v62  ;;  %v10172_v62 = vld [vmem:[#allocation23 + $0xa0] ss:$24 sps:$4 sm:$0xff]  }
0x101a   :  { %5305 = vmatprep.subr.bf16.mxu1 %v10150_v36  ;;  %5888 = vmatpush1.bf16.msra.mxu0 %v9977_v46  ;;  %v10175_v46 = vld [vmem:[#allocation23 + $0xd4] ss:$24 sps:$4 sm:$0xff]  }
0x101b   :  { %5889 = vmatprep.subr.bf16.mxu0 %v9985_v59  ;;  %v10180_v59 = vld [vmem:[#allocation23 + $0xd0] ss:$24 sps:$4 sm:$0xff]  }
0x101d   :  { %5306 = vmatpush1.bf16.msra.mxu1 %v10156_v18 }
0x101e   :  { %5307 = vmatprep.subr.bf16.mxu1 %v10159_v42  ;;  %5890 = vmatpush1.bf16.msra.mxu0 %v9992_v52  ;;  %v10183_v52 = vld [vmem:[#allocation23 + $0x104] ss:$24 sps:$4 sm:$0xff]  }
0x101f   :  { %5891 = vmatprep.subr.bf16.mxu0 %v9998_v48  ;;  %v10188_v48 = vld [vmem:[#allocation23 + $0x100] ss:$24 sps:$4 sm:$0xff]  }
0x1021   :  { %5308 = vmatpush1.bf16.msra.mxu1 %v10164_v49 }
0x1022   :  { %5309 = vmatprep.subr.bf16.mxu1 %v10167_v14  ;;  %5892 = vmatpush1.bf16.msra.mxu0 %v10004_v45  ;;  %v10191_v45 = vld [vmem:[#allocation23 + $0x134] ss:$24 sps:$4 sm:$0xff]  }
0x1023   :  { %5893 = vmatprep.subr.bf16.mxu0 %v10010_v17  ;;  %v10195_v17 = vld [vmem:[#allocation23 + $0x130] ss:$24 sps:$4 sm:$0xff]  }
0x1025   :  { %5310 = vmatpush1.bf16.msra.mxu1 %v10172_v62 }
0x1026   :  { %5311 = vmatprep.subr.bf16.mxu1 %v10175_v46  ;;  %5894 = vmatpush1.bf16.msra.mxu0 %v10016_v50  ;;  %v10201_v50 = vld [vmem:[#allocation23 + $0x160] ss:$24 sps:$4 sm:$0xff]  }
0x1027   :  { %5895 = vmatprep.subr.bf16.mxu0 %v10022_v32  ;;  %10564 = vst [vmem:[#allocation44_spill] sm:$0xff] %v10201_v50  ;;  %v10204_v32 = vld [vmem:[#allocation23 + $0x194] ss:$24 sps:$4 sm:$0xff]  }
0x1028   :  { %10565 = vst [vmem:[#allocation43_spill] sm:$0xff] %v10204_v32 }
0x1029   :  { %5312 = vmatpush1.bf16.msra.mxu1 %v10180_v59 }
0x102a   :  { %5313 = vmatprep.subr.bf16.mxu1 %v10183_v52  ;;  %5896 = vmatpush1.bf16.msra.mxu0 %v10028_v2  ;;  %v10210_v2 = vld [vmem:[#allocation23 + $0x1c4] ss:$24 sps:$4 sm:$0xff]  }
0x102d   :  { %5314 = vmatpush1.bf16.msra.mxu1 %v10188_v48 }
0x102e   :  { %5315 = vmatprep.subr.bf16.mxu1 %v10191_v45 }
0x1031   :  { %5316 = vmatpush1.bf16.msra.mxu1 %v10195_v17 }
0x1032   :  { %5317 = vmatprep.subr.bf16.mxu1 %v10198_v7 }
0x1035   :  { %5318 = vmatpush1.bf16.msra.mxu1 %v10201_v50  ;;  %v10222_v50 = vld [vmem:[#allocation23 + $0x224] ss:$24 sps:$4 sm:$0xff]  }
0x1036   :  { %5319 = vmatprep.subr.bf16.mxu1 %v10204_v32  ;;  %v10225_v32 = vld [vmem:[#allocation23 + $0x220] ss:$24 sps:$4 sm:$0xff]  }
0x1039   :  { %5320 = vmatpush1.bf16.msra.mxu1 %v10207_v37 }
0x103a   :  { %5321 = vmatprep.subr.bf16.mxu1 %v10210_v2 }
0x103d   :  { %5322 = vmatpush1.bf16.msra.mxu1 %v10213_v28 }
0x103e   :  { %5323 = vmatprep.subr.bf16.mxu1 %v10216_v25 }
0x1041   :  { %5324 = vmatpush1.bf16.msra.mxu1 %v10219_v10 }
0x1042   :  { %5325 = vmatprep.subr.bf16.mxu1 %v10222_v50 }
0x1045   :  { %5326 = vmatpush1.bf16.msra.mxu1 %v10225_v32 }
0x1046   :  { %5928 = vmatprep.subr.bf16.mxu1 %v9983_v53 }
0x1048   :  { %5336 = vmatmul.mubr.bf16.vlgmr.msra.gmra.mrb[56].mxu1 %v4784_v39 }
0x1049   :  { %5929 = vmatpush1.bf16.msra.mxu1 %v9981_v16  ;;  %v10566_v16 = vld [vmem:[#allocation48_spill] sm:$0xff] }
0x104a   :  { %5930 = vmatprep.subr.bf16.mxu1 %v9988_v9  ;;  %v5347_v53 = vunpack.c.l.bf16 %v10566_v16  ;;  %v10567_v9 = vld [vmem:[#allocation47_spill] sm:$0xff] }
0x104d   :  { %5931 = vmatpush1.bf16.msra.mxu1 %v9996_v15  ;;  %v5349_v15 = vunpack.c.l.bf16 %v10567_v9 }
0x104e   :  { %5932 = vmatprep.subr.bf16.mxu1 %v10001_v31 }
0x1051   :  { %5933 = vmatpush1.bf16.msra.mxu1 %v10008_v60 }
0x1052   :  { %5934 = vmatprep.subr.bf16.mxu1 %v10013_v35  ;;  %v5348_v35 = vunpack.c.h.bf16 %v10566_v16 }
0x1055   :  { %5935 = vmatpush1.bf16.msra.mxu1 %v10020_v22  ;;  %v5350_v22 = vunpack.c.h.bf16 %v10567_v9 }
0x1056   :  { %5936 = vmatprep.subr.bf16.mxu1 %v10025_v47 }
0x1059   :  { %5937 = vmatpush1.bf16.msra.mxu1 %v10032_v5 }
0x105a   :  { %5938 = vmatprep.subr.bf16.mxu1 %v10035_v54 }
0x105d   :  { %5939 = vmatpush1.bf16.msra.mxu1 %v10040_v29 }
0x105e   :  { %5940 = vmatprep.subr.bf16.mxu1 %v10043_v33 }
0x1061   :  { %5941 = vmatpush1.bf16.msra.mxu1 %v10048_v26 }
0x1062   :  { %5942 = vmatprep.subr.bf16.mxu1 %v10051_v41 }
0x1065   :  { %5943 = vmatpush1.bf16.msra.mxu1 %v10056_v57 }
0x1066   :  { %5944 = vmatprep.subr.bf16.mxu1 %v10061_v51 }
0x1069   :  { %5945 = vmatpush1.bf16.msra.mxu1 %v10068_v12 }
0x106a   :  { %5946 = vmatprep.subr.bf16.mxu1 %v10073_v30 }
0x106d   :  { %5947 = vmatpush1.bf16.msra.mxu1 %v10080_v40 }
0x106e   :  { %5948 = vmatprep.subr.bf16.mxu1 %v10085_v44 }
0x1071   :  { %5949 = vmatpush1.bf16.msra.mxu1 %v10092_v11 }
0x1072   :  { %5950 = vmatprep.subr.bf16.mxu1 %v10111_v23 }
0x1075   :  { %5951 = vmatpush1.bf16.msra.mxu1 %v10114_v4 }
0x10eb   :  { %v5255_v31 = vpop.f32.mrb[52].mxu1  ;;  %v5296_v60 = vpop.f32.mrb[68].mxu0 }
0x10ec   :  { %v5351_v47 = vadd.f32 %v5347_v53, %v5255_v31  ;;  %v10257_v5 = vadd.f32 %v5349_v15, %v5296_v60  ;;  %v5257_v54 = vpop.f32.mrb[53].mxu1  ;;  %v5298_v29 = vpop.f32.mrb[69].mxu0  ;;  %v10263_v15 = vsel %vm4753_vm11, %v9959_v63, %v9956_v0 }
0x10ed   :  { %v5352_v33 = vadd.f32 %v5348_v35, %v5257_v54  ;;  %v5354_v26 = vadd.f32 %v5350_v22, %v5298_v29  ;;  %v5259_v41 = vpop.f32.mrb[54].mxu1  ;;  %v5300_v57 = vpop.f32.mrb[70].mxu0  ;;  %v10568_v35 = vld [vmem:[#allocation54_spill] sm:$0xff] }
0x10ee   :  { %v7175_v51 = vmul.f32 -1.442695, %v5351_v47  ;;  %v5260_v12 = vpop.f32.mrb[55].mxu1  ;;  %v5301_v30 = vpop.f32.mrb[71].mxu0  ;;  %v5357_v22 = vunpack.c.l.bf16 %v10568_v35  ;;  %v5358_v54 = vunpack.c.h.bf16 %v10568_v35  ;;  %v7877_v35 = vld [vmem:[#allocation23 + $0x154] ss:$24 sps:$4 sm:$0xff]  }
0x10ef   :  { %v7176_v40 = vmul.f32 -1.442695, %v5352_v33 }
0x10f0   :  { %8066 = vpow2.f32 %v7175_v51  ;;  %v10270_v51 = vld [vmem:[#allocation16 + $0x30] sm:$0xff] }
0x10f1   :  { %8068 = vpow2.f32 %v7176_v40  ;;  %v4780_v0 = vand.u32 2, %v10270_v51 }
0x10f2   :  { %8070 = vtanh.f32 %v5354_v26 }
0x10f3   :  { %vm4781_vm13 = vcmp.gt.s32.totalorder %v4780_v0, 0 }
0x10f4   :  { %v5422_v20 = vsel %vm4781_vm13, 1, %v10539_v61  ;;  %vm1444_vm13 = vcmask 519168  }
0x10fa   :  { %v8067_v44 = vpop.eup %8066 }
0x10fb   :  { %v5370_v11 = vadd.f32 1.0, %v8067_v44  ;;  %v8069_v23 = vpop.eup %8068  ;;  %v4778_v44 = vand.u32 1, %v10270_v51 }
0x10fc   :  { %v5371_v4 = vadd.f32 1.0, %v8069_v23  ;;  %v8071_v39 = vpop.eup %8070 }
0x10fd   :  { %8072 = vrcp.f32 %v5370_v11  ;;  %vm4779_vm14 = vcmp.gt.s32.totalorder %v4778_v44, 0 }
0x10fe   :  { %8074 = vrcp.f32 %v5371_v4 }
0x1107   :  { %v8073_v16 = vpop.eup %8072 }
0x1108   :  { %v5381_v53 = vmul.f32 %v8073_v16, %v8071_v39  ;;  %v8075_v9 = vpop.eup %8074  ;;  %v5415_v39 = vsel %vm4779_vm14, 1, %v10539_v61  ;;  %v7869_v16 = vld [vmem:[#allocation23 + $0xf0] ss:$24 sps:$4 sm:$0xff]  }
0x1109   :  { %v5380_v31 = vmul.f32 %v8075_v9, %v10263_v15  ;;  %v7874_v9 = vld [vmem:[#allocation23 + $0x124] ss:$24 sps:$4 sm:$0xff]  }
0x110b   :  { %v10266_v60 = vadd.f32 %v5381_v53, %v5380_v31  ;;  %v7871_v53 = vld [vmem:[#allocation23 + $0xf4] ss:$24 sps:$4 sm:$0xff]   ;;  %v7872_v31 = vld [vmem:[#allocation23 + $0x120] ss:$24 sps:$4 sm:$0xff]  }
0x110c   :  { %5897 = vmatprep.subr.bf16.mxu0 %v7871_v53 }
0x110d   :  { %5898 = vmatpush1.bf16.msra.mxu0 %v7869_v16 }
0x110e   :  { %5899 = vmatprep.subr.bf16.mxu0 %v7874_v9 }
0x1111   :  { %5900 = vmatpush1.bf16.msra.mxu0 %v7872_v31 }
0x1112   :  { %5901 = vmatprep.subr.bf16.mxu0 %v7877_v35 }
0x111b   :  { %v5337_v47 = vpop.f32.mrb[56].mxu1 }
0x111c   :  { %v5359_v29 = vadd.f32 %v5357_v22, %v5337_v47  ;;  %v5339_v33 = vpop.f32.mrb[57].mxu1  ;;  %v7875_v22 = vld [vmem:[#allocation23 + $0x150] ss:$24 sps:$4 sm:$0xff]  }
0x111d   :  { %v5360_v26 = vadd.f32 %v5358_v54, %v5339_v33  ;;  %v5341_v41 = vpop.f32.mrb[58].mxu1  ;;  %5902 = vmatpush1.bf16.msra.mxu0 %v7875_v22 }
0x111e   :  { %v5342_v57 = vpop.f32.mrb[59].mxu1  ;;  %v7178_v12 = vmul.f32 -1.442695, %v5359_v29  ;;  %5903 = vmatprep.subr.bf16.mxu0 %v10058_v34  ;;  %v10291_v34 = vsel %vm4760_vm12, %v10107_v3, %v10101_v19 }
0x111f   :  { %8076 = vtanh.f32 %v5360_v26 }
0x1120   :  { %8078 = vpow2.f32 %v7178_v12 }
0x1121   :  { %5904 = vmatpush1.bf16.msra.mxu0 %v10064_v8 }
0x1122   :  { %5905 = vmatprep.subr.bf16.mxu0 %v10070_v56 }
0x1125   :  { %5906 = vmatpush1.bf16.msra.mxu0 %v10076_v6 }
0x1126   :  { %5907 = vmatprep.subr.bf16.mxu0 %v10082_v43 }
0x1129   :  { %v8077_v63 = vpop.eup %8076  ;;  %5908 = vmatpush1.bf16.msra.mxu0 %v10088_v21  ;;  %v7177_v21 = vmul.f32 -1.442695, %v10257_v5 }
0x112a   :  { %5400 = vrot.lane.b32.xlu0 %v8077_v63, %s8457_s21  ;;  %v8079_v30 = vpop.eup %8078  ;;  %5909 = vmatprep.subr.bf16.mxu0 %v10105_v27  ;;  %v7179_v27 = vmul.f32 -1.442695, %v5360_v26 }
0x112b   :  { %v5391_v40 = vadd.f32 1.0, %v8079_v30 }
0x112d   :  { %8080 = vrcp.f32 %v5391_v40  ;;  %5910 = vmatpush1.bf16.msra.mxu0 %v10109_v13 }
0x112e   :  { %5424 = vperm.xlu0 %7413, %v5422_v20   ;;  %5969 = vmatprep.subr.bf16.mxu0 %v10120_v55 }
0x1137   :  { %v8081_v11 = vpop.eup %8080 }
0x1138   :  { %v5398_v8 = vmul.f32 %v8081_v11, %v10291_v34 }
0x119c   :  { %v5401_v23 = vpop.permute.xlu0 %5400 }
0x119d   :  { %v5403_v4 = vmul.f32 %v8081_v11, %v5401_v23 }
0x119f   :  { %5405 = vrot.lane.b32.xlu1 %v5403_v4, %s8457_s21 }
0x11a3   :  { %5417 = vperm.xlu1 %7412, %v5415_v39  }
0x11ad   :  { %v10300_v3 = vpop.permute.xlu0 %5424 }
0x11ae   :  { %vm5426_vm1 = vcmp.eq.s32.totalorder %v10300_v3, 1 }
0x1211   :  { %v5406_v56 = vpop.permute.xlu1 %5405 }
0x1212   :  { %v10294_v6 = vadd.f32 %v5406_v56, %v5398_v8 }
0x1214   :  { %8082 = vtanh.f32 %v10294_v6 }
0x1215   :  { %8084 = vpow2.f32 %v7177_v21 }
0x1216   :  { %8086 = vpow2.f32 %v7179_v27  ;;  %v10573_v27 = vld [vmem:[#allocation55_spill] sm:$0xff] }
0x1217   :  { %8088 = vtanh.f32 %v10266_v60 }
0x121e   :  { %v8083_v43 = vpop.eup %8082 }
0x121f   :  { %5411 = vrot.lane.b32.xlu0 %v8083_v43, %s8457_s21  ;;  %v8085_v13 = vpop.eup %8084 }
0x1220   :  { %v8087_v55 = vpop.eup %8086  ;;  %v5372_v1 = vadd.f32 1.0, %v8085_v13  ;;  %v6023_v13 = vunpack.c.l.bf16 %v10573_v27 }
0x1221   :  { %v5392_v19 = vadd.f32 1.0, %v8087_v55  ;;  %v8089_v54 = vpop.eup %8088 }
0x1222   :  { %8090 = vrcp.f32 %v5372_v1  ;;  %v10302_v47 = vpop.permute.xlu1 %5417  ;;  %v6024_v1 = vunpack.c.h.bf16 %v10573_v27 }
0x1223   :  { %8092 = vrcp.f32 %v5392_v19  ;;  %vm5419_vm15 = vcmp.eq.s32.totalorder %v10302_v47, 1 }
0x1224   :  { %v5421_v31 = vsel %vm5419_vm15, %v10266_v60, %v10263_v15  ;;  %v8148_v60 = vld [vmem:[#allocation16] sm:$0xff] }
0x122c   :  { %v8091_v29 = vpop.eup %8090 }
0x122d   :  { %v8093_v5 = vpop.eup %8092  ;;  %v5384_v33 = vmul.f32 %v8091_v29, %v8089_v54 }
0x122f   :  { %v10309_v57 = vsel %vm5419_vm15, %v5384_v33, %v10137_v24  ;;  %v8149_v33 = vld [vmem:[#allocation16 + $0x10] sm:$0xff] }
0x1230   :  { %v5450_v20 = vpack.c.bf16 %v10309_v57, %v10309_v57 }
0x1291   :  { %v5412_v26 = vpop.permute.xlu0 %5411 }
0x1292   :  { %v5414_v41 = vmul.f32 %v8093_v5, %v5412_v26  ;;  %v784_v5 = vand.u32 4, %v8148_v60  ;;  %v2118_v26 = vand.u32 4, %v8149_v33  ;;  %v10580_v60 = vld [vmem:[#allocation41_spill] sm:$0xff] }
0x1294   :  { %v10314_v0 = vsel %vm5426_vm1, %v5414_v41, %v10142_v58  ;;  %vm785_vm2 = vcmp.gt.s32.totalorder %v784_v5, 0  ;;  %vm2119_vm3 = vcmp.gt.s32.totalorder %v2118_v26, 0 }
0x1295   :  { %v5451_v63 = vpack.c.bf16 %v10314_v0, %v10314_v0 }
0x1297   :  { %7252 = vmatprep.mubr.msk.bf16.mxu0 %vm209_vm0, %v5451_v63  ;;  %7253 = vmatprep.mubr.msk.bf16.mxu1 %vm209_vm0, %v5451_v63 }
0x1298   :  { %5920 = vmatmul.mubr.bf16.vlgmr.msra.gmra.mrb[72].mxu0 %v5450_v20  ;;  %5961 = vmatmul.mubr.bf16.vlgmr.msra.gmra.mrb[60].mxu1 %v5450_v20 }
0x1299   :  { %5970 = vmatpush1.bf16.msra.mxu0 %v10146_v38  ;;  %7254 = vmatprep.mubr.msk.bf16.mxu0 %vm209_vm0, %v5451_v63  ;;  %v10569_v38 = vld [vmem:[#allocation44_spill] sm:$0xff]  ;;  %v1434_v63 = vsel %vm785_vm2, 1, %v10539_v61 }
0x129a   :  { %5971 = vmatprep.subr.bf16.mxu0 %v10150_v36  ;;  %v10570_v36 = vld [vmem:[#allocation43_spill] sm:$0xff] }
0x129d   :  { %5972 = vmatpush1.bf16.msra.mxu0 %v10156_v18 }
0x129e   :  { %5973 = vmatprep.subr.bf16.mxu0 %v10159_v42  ;;  %v10572_v42 = vld [vmem:[#allocation49_spill] sm:$0xff] }
0x12a1   :  { %5974 = vmatpush1.bf16.msra.mxu0 %v10164_v49  ;;  %v6015_v49 = vunpack.c.l.bf16 %v10572_v42 }
0x12a2   :  { %5975 = vmatprep.subr.bf16.mxu0 %v10167_v14 }
0x12a5   :  { %5976 = vmatpush1.bf16.msra.mxu0 %v10172_v62 }
0x12a6   :  { %5977 = vmatprep.subr.bf16.mxu0 %v10175_v46  ;;  %v6016_v46 = vunpack.c.h.bf16 %v10572_v42 }
0x12a9   :  { %5978 = vmatpush1.bf16.msra.mxu0 %v10180_v59 }
0x12aa   :  { %5979 = vmatprep.subr.bf16.mxu0 %v10183_v52 }
0x12ad   :  { %5980 = vmatpush1.bf16.msra.mxu0 %v10188_v48 }
0x12ae   :  { %5981 = vmatprep.subr.bf16.mxu0 %v10191_v45 }
0x12b1   :  { %5982 = vmatpush1.bf16.msra.mxu0 %v10195_v17 }
0x12b2   :  { %5983 = vmatprep.subr.bf16.mxu0 %v10198_v7  ;;  %v10571_v7 = vld [vmem:[#allocation50_spill] sm:$0xff] }
0x12b3   :  { %v6013_v18 = vunpack.c.l.bf16 %v10571_v7 }
0x12b5   :  { %5984 = vmatpush1.bf16.msra.mxu0 %v10569_v38 }
0x12b6   :  { %5985 = vmatprep.subr.bf16.mxu0 %v10570_v36  ;;  %v5443_v36 = vld [vmem:[#allocation16 + $0x38] sm:$0xff] }
0x12b9   :  { %5986 = vmatpush1.bf16.msra.mxu0 %v10207_v37  ;;  %v6014_v37 = vunpack.c.h.bf16 %v10571_v7  ;;  %v2765_v7 = vsel %vm2119_vm3, 1, %v10539_v61 }
0x12ba   :  { %5987 = vmatprep.subr.bf16.mxu0 %v10210_v2 }
0x12bd   :  { %5988 = vmatpush1.bf16.msra.mxu0 %v10213_v28 }
0x12be   :  { %5989 = vmatprep.subr.bf16.mxu0 %v10216_v25 }
0x12c1   :  { %5990 = vmatpush1.bf16.msra.mxu0 %v10219_v10 }
0x12c2   :  { %5991 = vmatprep.subr.bf16.mxu0 %v10222_v50 }
0x12c5   :  { %5992 = vmatpush1.bf16.msra.mxu0 %v10225_v32 }
0x12c8   :  { %6002 = vmatmul.mubr.bf16.vlgmr.msra.gmra.mrb[76].mxu0 %v5450_v20  ;;  %v8150_v20 = vld [vmem:[#allocation16 + $0x20] sm:$0xff] }
0x12c9   :  { %v3450_v38 = vand.u32 4, %v8150_v20 }
0x12cb   :  { %vm3451_vm4 = vcmp.gt.s32.totalorder %v3450_v38, 0 }
0x12cc   :  { %v4097_v42 = vsel %vm3451_vm4, 1, %v10539_v61 }
0x136b   :  { %v5921_v14 = vpop.f32.mrb[72].mxu0  ;;  %v5962_v62 = vpop.f32.mrb[60].mxu1 }
0x136c   :  { %v6017_v28 = vadd.f32 %v6013_v18, %v5921_v14  ;;  %v6019_v59 = vadd.f32 %v6015_v49, %v5962_v62  ;;  %v5923_v25 = vpop.f32.mrb[73].mxu0  ;;  %v5964_v52 = vpop.f32.mrb[61].mxu1  ;;  %v5446_v18 = vand.u32 2, %v5443_v36  ;;  %v5448_v49 = vand.u32 4, %v5443_v36 }
0x136d   :  { %v6018_v10 = vadd.f32 %v6014_v37, %v5923_v25  ;;  %v6020_v48 = vadd.f32 %v6016_v46, %v5964_v52  ;;  %v5925_v45 = vpop.f32.mrb[74].mxu0  ;;  %v5966_v17 = vpop.f32.mrb[62].mxu1  ;;  %v5444_v62 = vand.u32 1, %v5443_v36  ;;  %v8151_v52 = vld [vmem:[#allocation16 + $0x8] sm:$0xff] }
0x136e   :  { %v7255_v50 = vmul.f32 -1.442695, %v6017_v28  ;;  %v5926_v32 = vpop.f32.mrb[75].mxu0  ;;  %v5967_v2 = vpop.f32.mrb[63].mxu1  ;;  %v7257_v30 = vmul.f32 -1.442695, %v6019_v59 }
0x136f   :  { %v7256_v12 = vmul.f32 -1.442695, %v6018_v10  ;;  %vm5447_vm5 = vcmp.gt.s32.totalorder %v5446_v18, 0  ;;  %vm5449_vm6 = vcmp.gt.s32.totalorder %v5448_v49, 0  ;;  %vm5445_vm7 = vcmp.gt.s32.totalorder %v5444_v62, 0 }
0x1370   :  { %8094 = vpow2.f32 %v7255_v50  ;;  %v6088_v14 = vsel %vm5447_vm5, 1, %v10539_v61  ;;  %v6095_v37 = vsel %vm5449_vm6, 1, %v10539_v61  ;;  %v6081_v46 = vsel %vm5445_vm7, 1, %v10539_v61  ;;  %v8152_v50 = vld [vmem:[#allocation16 + $0x18] sm:$0xff] }
0x1371   :  { %8096 = vpow2.f32 %v7256_v12  ;;  %v1452_v10 = vand.u32 4, %v8151_v52  ;;  %v2784_v32 = vand.u32 4, %v8152_v50  ;;  %v10574_v12 = vld [vmem:[#allocation51_spill] sm:$0xff]  ;;  %v10583_v52 = vld [vmem:[#allocation60_spill] sm:$0xff] }
0x1372   :  { %8098 = vtanh.f32 %v6020_v48 }
0x1373   :  { %8100 = vpow2.f32 %v7257_v30  ;;  %vm1453_vm8 = vcmp.gt.s32.totalorder %v1452_v10, 0  ;;  %vm2785_vm9 = vcmp.gt.s32.totalorder %v2784_v32, 0  ;;  %v4116_v30 = vand.u32 4, %v10574_v12 }
0x1374   :  { %v2099_v2 = vsel %vm1453_vm8, 1, %v10539_v61  ;;  %vm6528_vm8 = vcmask 1041409  }
0x1375   :  { %vm4117_vm10 = vcmp.gt.s32.totalorder %v4116_v30, 0 }
0x137a   :  { %v8095_v40 = vpop.eup %8094 }
0x137b   :  { %v6036_v44 = vadd.f32 1.0, %v8095_v40  ;;  %v8097_v11 = vpop.eup %8096  ;;  %v7878_v40 = vld [vmem:[#allocation26] sm:$0xff]  }
0x137c   :  { %v6037_v23 = vadd.f32 1.0, %v8097_v11  ;;  %v8099_v4 = vpop.eup %8098  ;;  %7340 = vmatprep.subr.bf16.mxu1 %v7878_v40  ;;  %v4782_v11 = vand.u32 4, %v10270_v51 }
0x137d   :  { %8102 = vrcp.f32 %v6036_v44  ;;  %v8101_v39 = vpop.eup %8100  ;;  %v3431_v44 = vsel %vm2785_vm9, 1, %v10539_v61  ;;  %7341 = vmatpush3.bf16.msra.mxu1 %v7878_v40  ;;  %vm6530_vm9 = vcmask 1042434  }
0x137e   :  { %8104 = vrcp.f32 %v6037_v23  ;;  %v6038_v35 = vadd.f32 1.0, %v8101_v39  ;;  %v7879_v23 = vld [vmem:[#allocation26 + $0x8] sm:$0xff]   ;;  %vm4783_vm11 = vcmp.gt.s32.totalorder %v4782_v11, 0  ;;  %v7880_v39 = vld [vmem:[#allocation26 + $0x10] sm:$0xff]  }
0x137f   :  { %7342 = vmatprep.subr.bf16.mxu1 %v7879_v23 }
0x1380   :  { %8106 = vrcp.f32 %v6038_v35  ;;  %v10576_v35 = vld [vmem:[#allocation56_spill] sm:$0xff] }
0x1381   :  { %7343 = vmatpush3.bf16.msra.mxu1 %v7879_v23 }
0x1382   :  { %7344 = vmatprep.subr.bf16.mxu1 %v7880_v39 }
0x1385   :  { %7345 = vmatpush3.bf16.msra.mxu1 %v7880_v39 }
0x1387   :  { %v8103_v16 = vpop.eup %8102 }
0x1388   :  { %v6047_v53 = vmul.f32 %v8103_v16, %v8099_v4  ;;  %v8105_v9 = vpop.eup %8104  ;;  %v4763_v4 = vsel %vm4117_vm10, 1, %v10539_v61  ;;  %v5429_v16 = vsel %vm4783_vm11, 1, %v10539_v61  ;;  %v10577_v61 = vld [vmem:[#allocation64_spill] sm:$0xff]  ;;  %vm6532_vm10 = vcmask 1043459  }
0x1389   :  { %v6046_v22 = vmul.f32 %v8105_v9, %v5421_v31  ;;  %v7881_v9 = vld [vmem:[#allocation26 + $0x18] sm:$0xff]   ;;  %vm6534_vm11 = vcmask 1044484  }
0x138a   :  { %v8107_v56 = vpop.eup %8106  ;;  %v10575_v31 = vld [vmem:[#allocation57_spill] sm:$0xff]  ;;  %7346 = vmatprep.subr.bf16.mxu1 %v7881_v9 }
0x138b   :  { %v6048_v8 = vadd.f32 %v6047_v53, %v6046_v22  ;;  %7347 = vmatpush3.bf16.msra.mxu1 %v7881_v9 }
0x138d   :  { %8108 = vtanh.f32 %v6048_v8 }
0x1397   :  { %v8109_v43 = vpop.eup %8108 }
0x1398   :  { %v10354_v21 = vmul.f32 %v8109_v43, %v8107_v56 }
0x139b   :  { %v6003_v55 = vpop.f32.mrb[76].mxu0 }
0x139c   :  { %v6025_v19 = vadd.f32 %v6023_v13, %v6003_v55  ;;  %v6005_v54 = vpop.f32.mrb[77].mxu0  ;;  %v10578_v13 = vld [vmem:[#allocation65_spill] sm:$0xff] }
0x139d   :  { %v10358_v29 = vadd.f32 %v6024_v1, %v6005_v54  ;;  %v6007_v47 = vpop.f32.mrb[78].mxu0 }
0x139e   :  { %v6008_v15 = vpop.f32.mrb[79].mxu0  ;;  %v7258_v28 = vmul.f32 -1.442695, %v6025_v19  ;;  %v10579_v47 = vld [vmem:[#allocation42_spill] sm:$0xff] }
0x139f   :  { %8110 = vtanh.f32 %v10358_v29 }
0x13a0   :  { %8112 = vpow2.f32 %v7258_v28 }
0x13a9   :  { %v8111_v41 = vpop.eup %8110 }
0x13aa   :  { %6066 = vrot.lane.b32.xlu1 %v8111_v41, %s8457_s21  ;;  %v8113_v59 = vpop.eup %8112  ;;  %v7885_v41 = vld [vmem:[#allocation25] sm:$0xff]  }
0x13ab   :  { %v6057_v25 = vadd.f32 1.0, %v8113_v59  ;;  %7356 = vmatprep.subr.bf16.mxu1 %v7885_v41  ;;  %v10582_v59 = vld [vmem:[#allocation59_spill] sm:$0xff] }
0x13ad   :  { %8114 = vrcp.f32 %v6057_v25 }
0x13ae   :  { %1436 = vperm.xlu1 %7412, %v1434_v63  }
0x13b2   :  { %2767 = vperm.xlu1 %7412, %v2765_v7  }
0x13b6   :  { %4099 = vperm.xlu1 %7412, %v4097_v42   ;;  %v10400_v42 = vsel %vm5426_vm1, %v10294_v6, %v10291_v34 }
0x13b7   :  { %v10368_v48 = vpop.eup %8114 }
0x13b8   :  { %v6064_v49 = vmul.f32 %v10368_v48, %v10400_v42 }
0x13ba   :  { %6090 = vperm.xlu1 %7412, %v6088_v14  }
0x13be   :  { %6097 = vperm.xlu1 %7412, %v6095_v37  }
0x13c2   :  { %6083 = vperm.xlu1 %7412, %v6081_v46   ;;  %v10581_v46 = vld [vmem:[#allocation58_spill] sm:$0xff] }
0x141c   :  { %v6067_v45 = vpop.permute.xlu1 %6066 }
0x141d   :  { %v6069_v17 = vmul.f32 %v10368_v48, %v6067_v45  ;;  %v10584_v48 = vld [vmem:[#allocation61_spill] sm:$0xff] }
0x141f   :  { %6071 = vrot.lane.b32.xlu0 %v6069_v17, %s8457_s21 }
0x1423   :  { %2101 = vperm.xlu0 %7413, %v2099_v2  }
0x1427   :  { %3433 = vperm.xlu0 %7413, %v3431_v44  }
0x142b   :  { %4765 = vperm.xlu0 %7413, %v4763_v4  }
0x142d   :  { %v1437_v53 = vpop.permute.xlu1 %1436 }
0x142e   :  { %vm1438_vm12 = vcmp.eq.s32.totalorder %v1437_v53, 1  ;;  %v7886_v53 = vld [vmem:[#allocation25 + $0x8] sm:$0xff]  }
0x142f   :  { %v1439_v51 = vsel %vm1438_vm12, %v10575_v31, 0.0  ;;  %v1442_v22 = vsel %vm1438_vm12, %v10576_v35, 0.0  ;;  %5431 = vperm.xlu0 %7413, %v5429_v16   ;;  %v7889_v31 = vld [vmem:[#allocation25 + $0x20] sm:$0xff]   ;;  %v7892_v35 = vld [vmem:[#allocation25 + $0x30] sm:$0xff]   ;;  %vm6536_vm12 = vcmask 1045509  }
0x1430   :  { %v1440_v8 = vpack.c.bf16 %v1439_v51, %v1439_v51  ;;  %v1443_v56 = vpack.c.bf16 %v1442_v22, %v1442_v22  ;;  %v7890_v51 = vld [vmem:[#allocation25 + $0x28] sm:$0xff]   ;;  %v7894_v22 = vld [vmem:[#allocation25 + $0x38] sm:$0xff]  }
0x1431   :  { %v2768_v43 = vpop.permute.xlu1 %2767 }
0x1432   :  { %1441 = vst [vmem:[#allocation4] sm:$0xf] %v1440_v8  ;;  %1445 = vst.msk [vmem:[#allocation5] sm:$0xf] %vm1444_vm13, %v1443_v56  ;;  %vm2769_vm14 = vcmp.eq.s32.totalorder %v2768_v43, 1 }
0x1433   :  { %v2770_v27 = vsel %vm2769_vm14, %v10577_v61, 0.0  ;;  %v2774_v55 = vsel %vm2769_vm14, %v10578_v13, 0.0  ;;  %v7259_v8 = vmul.f32 -1.442695, %v10358_v29  ;;  %vm6540_vm14 = vcmask 1047559  }
0x1434   :  { %v2771_v1 = vpack.c.bf16 %v2770_v27, %v2770_v27  ;;  %v2775_v19 = vpack.c.bf16 %v2774_v55, %v2774_v55 }
0x1435   :  { %v4100_v54 = vpop.permute.xlu1 %4099 }
0x1436   :  { %2773 = vst [vmem:[#allocation4 + $0x8] sm:$0xf] %v2771_v1  ;;  %2777 = vst.msk [vmem:[#allocation5 + $0x8] sm:$0xf] %vm1444_vm13, %v2775_v19  ;;  %vm4101_vm15 = vcmp.eq.s32.totalorder %v4100_v54, 1 }
0x1437   :  { %v4102_v15 = vsel %vm4101_vm15, %v10579_v47, 0.0  ;;  %v4106_v5 = vsel %vm4101_vm15, %v10580_v60, 0.0  ;;  %vm6543_vm15 = vcmask 64512  }
0x1438   :  { %v4103_v33 = vpack.c.bf16 %v4102_v15, %v4102_v15  ;;  %v4107_v26 = vpack.c.bf16 %v4106_v5, %v4106_v5 }
0x1439   :  { %v10386_v63 = vpop.permute.xlu1 %6090 }
0x143a   :  { %4105 = vst [vmem:[#allocation4 + $0x10] sm:$0xf] %v4103_v33  ;;  %4109 = vst.msk [vmem:[#allocation5 + $0x10] sm:$0xf] %vm1444_vm13, %v4107_v26  ;;  %vm6092_vm7 = vcmp.eq.s32.totalorder %v10386_v63, 1 }
0x143b   :  { %v7285_v33 = vld [vmem:[#allocation29] ss:$0 sm:$0xff] }
0x143d   :  { %v10389_v20 = vpop.permute.xlu1 %6097 }
0x143e   :  { %vm6099_vm3 = vcmp.eq.s32.totalorder %v10389_v20, 1 }
0x1441   :  { %v6084_v38 = vpop.permute.xlu1 %6083 }
0x1442   :  { %vm6085_vm2 = vcmp.eq.s32.totalorder %v6084_v38, 1 }
0x1443   :  { %v6086_v36 = vsel %vm6085_vm2, %v10354_v21, %v10309_v57 }
0x1444   :  { %v6100_v7 = vsel %vm6099_vm3, %v6086_v36, 0.0 }
0x1445   :  { %v6101_v18 = vpack.c.bf16 %v6100_v7, %v6100_v7 }
0x1447   :  { %6103 = vst [vmem:[#allocation4 + $0x1c] sm:$0xf] %v6101_v18 }
0x1491   :  { %v6072_v14 = vpop.permute.xlu0 %6071 }
0x1492   :  { %v10404_v62 = vadd.f32 %v6072_v14, %v6064_v49 }
0x1494   :  { %8116 = vtanh.f32 %v10404_v62 }
0x1495   :  { %8118 = vpow2.f32 %v7259_v8 }
0x149e   :  { %v8117_v21 = vpop.eup %8116 }
0x149f   :  { %6077 = vrot.lane.b32.xlu0 %v8117_v21, %s8457_s21  ;;  %v8119_v56 = vpop.eup %8118 }
0x14a0   :  { %v6058_v43 = vadd.f32 1.0, %v8119_v56 }
0x14a2   :  { %v2102_v37 = vpop.permute.xlu0 %2101  ;;  %8120 = vrcp.f32 %v6058_v43 }
0x14a3   :  { %vm2103_vm4 = vcmp.eq.s32.totalorder %v2102_v37, 1 }
0x14a4   :  { %v2104_v28 = vsel %vm2103_vm4, %v10581_v46, 0.0  ;;  %v2108_v25 = vsel %vm2103_vm4, %v10582_v59, 0.0 }
0x14a5   :  { %v2105_v3 = vpack.c.bf16 %v2104_v28, %v2104_v28  ;;  %v2109_v34 = vpack.c.bf16 %v2108_v25, %v2108_v25 }
0x14a6   :  { %v3434_v6 = vpop.permute.xlu0 %3433 }
0x14a7   :  { %2107 = vst [vmem:[#allocation4 + $0x4] sm:$0xf] %v2105_v3  ;;  %2111 = vst.msk [vmem:[#allocation5 + $0x4] sm:$0xf] %vm1444_vm13, %v2109_v34  ;;  %vm3435_vm1 = vcmp.eq.s32.totalorder %v3434_v6, 1 }
0x14a8   :  { %v3436_v10 = vsel %vm3435_vm1, %v10583_v52, 0.0  ;;  %v3440_v45 = vsel %vm3435_vm1, %v10584_v48, 0.0 }
0x14a9   :  { %v3437_v17 = vpack.c.bf16 %v3436_v10, %v3436_v10  ;;  %v3441_v50 = vpack.c.bf16 %v3440_v45, %v3440_v45 }
0x14aa   :  { %v4766_v32 = vpop.permute.xlu0 %4765 }
0x14ab   :  { %3439 = vst [vmem:[#allocation4 + $0xc] sm:$0xf] %v3437_v17  ;;  %3443 = vst.msk [vmem:[#allocation5 + $0xc] sm:$0xf] %vm1444_vm13, %v3441_v50  ;;  %vm4767_vm5 = vcmp.eq.s32.totalorder %v4766_v32, 1 }
0x14ac   :  { %v4768_v2 = vsel %vm4767_vm5, %v10137_v24, 0.0  ;;  %v4772_v12 = vsel %vm4767_vm5, %v10142_v58, 0.0  ;;  %v7887_v58 = vld [vmem:[#allocation25 + $0x10] sm:$0xff]   ;;  %v8121_v61 = vpop.eup %8120 }
0x14ad   :  { %v4769_v30 = vpack.c.bf16 %v4768_v2, %v4768_v2  ;;  %v4773_v40 = vpack.c.bf16 %v4772_v12, %v4772_v12 }
0x14ae   :  { %v5432_v44 = vpop.permute.xlu0 %5431  ;;  %v7882_v11 = vld [vmem:[#allocation5] sm:$0xff]  }
0x14af   :  { %4771 = vst [vmem:[#allocation4 + $0x14] sm:$0xf] %v4769_v30  ;;  %4775 = vst.msk [vmem:[#allocation5 + $0x14] sm:$0xf] %vm1444_vm13, %v4773_v40  ;;  %vm5433_vm6 = vcmp.eq.s32.totalorder %v5432_v44, 1  ;;  %7348 = vmatprep.mubr.msk.bf16.mxu1 %vm209_vm0, %v7882_v11  ;;  %v7893_v54 = vld [vmem:[#allocation4] sm:$0xff]  }
0x14b0   :  { %v5434_v23 = vsel %vm5433_vm6, %v10309_v57, 0.0  ;;  %v5438_v4 = vsel %vm5433_vm6, %v10314_v0, 0.0  ;;  %v7888_v57 = vld [vmem:[#allocation25 + $0x18] sm:$0xff]  }
0x14b1   :  { %v5435_v39 = vpack.c.bf16 %v5434_v23, %v5434_v23  ;;  %v5439_v16 = vpack.c.bf16 %v5438_v4, %v5438_v4  ;;  %v7286_v23 = vld [vmem:[#allocation10] ss:$0 sm:$0xff]  ;;  %v6094_v4 = vsel %vm6092_vm7, %v10404_v62, %v10400_v42 }
0x14b2   :  { %v7883_v24 = vld [vmem:[#allocation5 + $0x8] sm:$0xff]  }
0x14b3   :  { %5437 = vst [vmem:[#allocation4 + $0x18] sm:$0xf] %v5435_v39  ;;  %5441 = vst.msk [vmem:[#allocation5 + $0x18] sm:$0xf] %vm1444_vm13, %v5439_v16  ;;  %7349 = vmatmul.mubr.msk.bf16.vlgmr.msra.gmra.mrb[64].mxu1 %vm209_vm0, %v7883_v24  ;;  %v7895_v47 = vld [vmem:[#allocation4 + $0x8] sm:$0xff]  }
0x14b4   :  { %7357 = vmatpush3.bf16.msra.mxu1 %v7885_v41 }
0x14b5   :  { %7358 = vmatprep.subr.bf16.mxu1 %v7886_v53 }
0x14b6   :  { %v7884_v9 = vld [vmem:[#allocation5 + $0x10] sm:$0xff]  }
0x14b7   :  { %7352 = vmatprep.mubr.msk.bf16.mxu1 %vm209_vm0, %v7884_v9  ;;  %v7896_v15 = vld [vmem:[#allocation4 + $0x10] sm:$0xff]   ;;  %v10585_v9 = vlaneseq }
0x14b8   :  { %7359 = vmatpush3.bf16.msra.mxu1 %v7886_v53 }
0x14b9   :  { %7360 = vmatprep.subr.bf16.mxu1 %v7887_v58 }
0x14ba   :  { %v7897_v60 = vld [vmem:[#allocation4 + $0x18] sm:$0xff]  }
0x14bc   :  { %7361 = vmatpush3.bf16.msra.mxu1 %v7887_v58 }
0x14bd   :  { %7362 = vmatprep.subr.bf16.mxu1 %v7888_v57 }
0x14c0   :  { %7363 = vmatpush3.bf16.msra.mxu1 %v7888_v57  ;;  %v6495_v57 = vand.u32 127, %v10585_v9 }
0x14c1   :  { %7364 = vmatprep.subr.bf16.mxu1 %v7889_v31 }
0x14c4   :  { %7365 = vmatpush3.bf16.msra.mxu1 %v7889_v31 }
0x14c5   :  { %7366 = vmatprep.subr.bf16.mxu1 %v7890_v51 }
0x14c8   :  { %7367 = vmatpush3.bf16.msra.mxu1 %v7890_v51 }
0x14c9   :  { %7368 = vmatprep.subr.bf16.mxu1 %v7892_v35 }
0x14cc   :  { %7369 = vmatpush3.bf16.msra.mxu1 %v7892_v35  ;;  %v10586_v35 = vld [vmem:[#allocation40_spill] sm:$0xff] }
0x14cd   :  { %7370 = vmatprep.subr.bf16.mxu1 %v7894_v22 }
0x14d0   :  { %7371 = vmatpush3.bf16.msra.mxu1 %v7894_v22  ;;  %v6498_v22 = vsub.s32 %v6495_v57, %v10586_v35 }
0x1511   :  { %v6078_v27 = vpop.permute.xlu0 %6077 }
0x1512   :  { %v6080_v13 = vmul.f32 %v8121_v61, %v6078_v27 }
0x1514   :  { %v6093_v55 = vsel %vm6092_vm7, %v6080_v13, %v10314_v0  ;;  %v7284_v0 = vld [vmem:[#allocation28] ss:$0 sm:$0xff] }
0x1515   :  { %v6104_v1 = vsel %vm6099_vm3, %v6093_v55, 0.0  ;;  %6110 = vst.msk [vmem:[#allocation8] sm:$0xff] %vm209_vm0, %v6093_v55 }
0x1516   :  { %v6105_v19 = vpack.c.bf16 %v6104_v1, %v6104_v1 }
0x1518   :  { %6107 = vst.msk [vmem:[#allocation5 + $0x1c] sm:$0xf] %vm1444_vm13, %v6105_v19  ;;  %vm6538_vm13 = vcmask 1046534  }
0x151f   :  { %v7891_v29 = vld [vmem:[#allocation5 + $0x18] sm:$0xff]  }
0x1520   :  { %7353 = vmatmul.mubr.msk.bf16.gmra.mrb[68].mxu1 %vm209_vm0, %v7891_v29 }
0x1521   :  { %7372 = vmatprep.mubr.bf16.mxu1 %v7893_v54 }
0x1528   :  { %7373 = vmatmul.mubr.bf16.vlgmr.msra.gmra.mrb[64].mxu1 %v7895_v47 }
0x1529   :  { %7376 = vmatprep.mubr.bf16.mxu1 %v7896_v15 }
0x1530   :  { %7377 = vmatmul.mubr.bf16.gmra.mrb[68].mxu1 %v7897_v60 }
0x15fb   :  { %v7374_v5 = vpop.f32.mrb[64].mxu1 }
0x15fc   :  { %v6423_v26 = vadd.f32 %v7374_v5, %v7284_v0  ;;  %v6383_v41 = vpop.f32.mrb[65].mxu1 }
0x15fd   :  { %v6421_v20 = vadd.f32 %v7284_v0, %v6383_v41  ;;  %v7375_v38 = vpop.f32.mrb[66].mxu1 }
0x15fe   :  { %v6386_v36 = vpop.f32.mrb[67].mxu1  ;;  %v6438_v7 = vmul.f32 %v7285_v33, %v6423_v26  ;;  %v6424_v18 = vadd.f32 %v7375_v38, %v7284_v0 }
0x15ff   :  { %v6422_v49 = vadd.f32 %v7284_v0, %v6386_v36  ;;  %v6436_v21 = vmul.f32 %v7285_v33, %v6421_v20 }
0x1600   :  { %v6450_v14 = vsel %vm209_vm0, %v6438_v7, 0.0  ;;  %v6439_v59 = vmul.f32 %v7285_v33, %v6424_v18 }
0x1601   :  { %6451 = vadd.xlane.f32.xlu0 %v6450_v14  ;;  %v6437_v37 = vmul.f32 %v7285_v33, %v6422_v49  ;;  %v6444_v34 = vsel %vm209_vm0, %v6436_v21, 0.0 }
0x1602   :  { %v6453_v17 = vsel %vm209_vm0, %v6439_v59, 0.0 }
0x1603   :  { %v7378_v46 = vpop.f32.mrb[68].mxu1  ;;  %v6447_v28 = vsel %vm209_vm0, %v6437_v37, 0.0 }
0x1604   :  { %v6427_v25 = vadd.f32 %v7378_v46, %v7284_v0  ;;  %6448 = vadd.xlane.f32.xlu1 %v6447_v28  ;;  %v6399_v3 = vpop.f32.mrb[69].mxu1 }
0x1605   :  { %v6425_v6 = vadd.f32 %v7284_v0, %v6399_v3  ;;  %6445 = vadd.xlane.f32.xlu0 %v6444_v34  ;;  %v7379_v52 = vpop.f32.mrb[70].mxu1 }
0x1606   :  { %v6428_v10 = vadd.f32 %v7379_v52, %v7284_v0  ;;  %v6402_v48 = vpop.f32.mrb[71].mxu1  ;;  %v6442_v45 = vmul.f32 %v7285_v33, %v6427_v25 }
0x1607   :  { %v6426_v50 = vadd.f32 %v7284_v0, %v6402_v48  ;;  %v6440_v2 = vmul.f32 %v7285_v33, %v6425_v6 }
0x1608   :  { %v6462_v32 = vsel %vm209_vm0, %v6442_v45, 0.0  ;;  %v6443_v12 = vmul.f32 %v7285_v33, %v6428_v10 }
0x1609   :  { %6454 = vadd.xlane.f32.xlu0 %v6453_v17  ;;  %6463 = vadd.xlane.f32.xlu1 %v6462_v32  ;;  %v6456_v30 = vsel %vm209_vm0, %v6440_v2, 0.0  ;;  %v6441_v44 = vmul.f32 %v7285_v33, %v6426_v50 }
0x160a   :  { %v6465_v40 = vsel %vm209_vm0, %v6443_v12, 0.0 }
0x160b   :  { %v6459_v11 = vsel %vm209_vm0, %v6441_v44, 0.0 }
0x160d   :  { %6457 = vadd.xlane.f32.xlu1 %v6456_v30  ;;  %6466 = vadd.xlane.f32.xlu0 %v6465_v40 }
0x1611   :  { %6460 = vadd.xlane.f32.xlu0 %v6459_v11 }
0x161e   :  { %6475 = vperm.xlu1 %7412, %v7286_v23  }
0x1627   :  { %6112 = vrot.lane.b32.xlu0 %v6094_v4, %s8457_s21  ;;  %s6551_s21 = sshll.u32 %s8478_s11, 4  ;;  %s6552_s21 = int_to_ptr.vmem [resolvable:$true] %s6551_s21 }
0x1628   :  { %s8417_s6 = scalar_lea.vmem %s6552_s21, 128  ;;  %p8422_p13 = scmp.lt.s32.totalorder %s6552_s21, %s6552_s21 }
0x1629   :  { %p8418_p12 = scmp.ne.s32.totalorder %s6552_s21, %s8417_s6  ;;  %p8423_p0 = scmp.lt.s32.totalorder %s8417_s6, %s8417_s6 }
0x162b   :  { %p8424_p1 = por %p8423_p0, %p8422_p13 }
0x162d   :  { %p8425_p2 = pnand %p8424_p1, %p8418_p12 }
0x168e   :  { %v6452_v39 = vpop.xlane.xlu0 %6451 }
0x1691   :  { %v6449_v16 = vpop.xlane.xlu1 %6448 }
0x1692   :  { %v6446_v53 = vpop.xlane.xlu0 %6445 }
0x1696   :  { %v6455_v24 = vpop.xlane.xlu0 %6454  ;;  %v6464_v58 = vpop.xlane.xlu1 %6463 }
0x169a   :  { %v6458_v31 = vpop.xlane.xlu1 %6457  ;;  %v6467_v51 = vpop.xlane.xlu0 %6466 }
0x169e   :  { %v6476_v8 = vpop.permute.xlu1 %6475  ;;  %v6461_v56 = vpop.xlane.xlu0 %6460 }
0x169f   :  { %v6478_v43 = vadd.f32 %v6476_v8, %v6446_v53  ;;  %v6479_v61 = vadd.f32 %v6476_v8, %v6449_v16  ;;  %v6480_v27 = vadd.f32 %v6476_v8, %v6452_v39  ;;  %v6481_v63 = vadd.f32 %v6476_v8, %v6455_v24 }
0x16a0   :  { %v6482_v42 = vadd.f32 %v6476_v8, %v6458_v31  ;;  %v6483_v1 = vadd.f32 %v6476_v8, %v6461_v56  ;;  %v6484_v29 = vadd.f32 %v6476_v8, %v6464_v58  ;;  %v6485_v15 = vadd.f32 %v6476_v8, %v6467_v51 }
0x16a1   :  { %v6499_v62 = vrot.slane %v6478_v43, %v6498_v22  ;;  %v6503_v13 = vrot.slane %v6479_v61, %v6498_v22  ;;  %v6507_v55 = vrot.slane %v6480_v27, %v6498_v22  ;;  %v6511_v54 = vrot.slane %v6481_v63, %v6498_v22 }
0x16a2   :  { %v6113_v19 = vpop.permute.xlu0 %6112  ;;  %v6515_v60 = vrot.slane %v6482_v42, %v6498_v22  ;;  %v6519_v33 = vrot.slane %v6483_v1, %v6498_v22  ;;  %v6523_v41 = vrot.slane %v6484_v29, %v6498_v22  ;;  %v6527_v38 = vrot.slane %v6485_v15, %v6498_v22 }
0x16a3   :  { %v6529_v47 = vsel %vm6528_vm8, %v6503_v13, %v6499_v62  ;;  %6115 = vst.msk [vmem:[#allocation9] sm:$0xff] %vm209_vm0, %v6113_v19 }
0x16a4   :  { %v6531_v0 = vsel %vm6530_vm9, %v6507_v55, %v6529_v47 }
0x16a5   :  { %v6533_v5 = vsel %vm6532_vm10, %v6511_v54, %v6531_v0 }
0x16a6   :  { %v6535_v26 = vsel %vm6534_vm11, %v6515_v60, %v6533_v5 }
0x16a7   :  { %v6537_v20 = vsel %vm6536_vm12, %v6519_v33, %v6535_v26 }
0x16a8   :  { %v6539_v36 = vsel %vm6538_vm13, %v6523_v41, %v6537_v20 }
0x16a9   :  { %v6541_v7 = vsel %vm6540_vm14, %v6527_v38, %v6539_v36 }
0x16aa   :  { %6544 = vst.msk [vmem:[#allocation31] sm:$0xff] %vm6543_vm15, %v6541_v7 }
0x16ab   :  { %8428 = shalt.err (!%p8425_p2)
}
0x16ac   :  { %s8429_s16 = scalar_lea.hbm %s10474_s13, 128 }
0x16ad   :  { %p8430_p3 = scmp.ne.s32.totalorder %s10474_s13, %s8429_s16  ;;  %p8433_p4 = scmp.lt.u32.totalorder %s8429_s16, %s10474_s13 }
0x16af   :  { %p8435_p5 = pnand %p8433_p4, %p8430_p3 }
0x16b1   :  { %8438 = shalt.err (!%p8435_p5)
}
0x16b2   :  { %6554 = dma.vmem_to_hbm [thread:$0]  %s6552_s21, 128, %s10474_s13, [#allocation13]  }
0x16b3   :  { %8453 = dma.done.wait [#allocation13], 128  }
0x16b4   :  { %8454 = vsyncadd [#allocation13], 4294967168 }
0x16b5   :  { %6558 = vsyncpa [#allocation12], 1 }
0x16b6   :  { %6559 = vsyncpa [#allocation15], 1 }
0x16b7   :  { %6560 = vsyncpa [#allocation18], 1 }
0x16b8   :  { %6561 = vsyncpa [#allocation21], 1 }
0x16b9   :  { %6562 = vsyncpa [#allocation24], 1 }
0x16ba   :  { %6563 = vsyncpa [#allocation27], 1 }
0x16bb   :  { %6564 = vsyncpa [#allocation30], 1 }
0x16bc   :  { %6565 = vsyncpa [#allocation13], 1 }

</bundles_post_ra>
